<compile_context>
chip_gen: v7x
topology: tpu7x:2x2x1
jax: 0.10.0
libtpu: 0.0.40
codegen_flags: <defaults>
</compile_context>

<pallas_src>
import functools

import jax
import jax.numpy as jnp
from jax.experimental import pallas as pl
from jax.experimental.pallas import tpu as pltpu

EPS = 1e-5          # nn.BatchNorm2d default eps
LEAKY_SLOPE = 0.1   # nn.LeakyReLU(0.1)


# --------------------------------------------------------------------------
# Fused Pallas kernel: whole network for one chunk of `nb` images
# --------------------------------------------------------------------------
def _fused_cnn_kernel(x_ref,
                      w1_ref, sc1_ref, sh1_ref,
                      w2_ref, sc2_ref, sh2_ref,
                      w3_ref, sc3_ref, sh3_ref,
                      w4_ref, sc4_ref, sh4_ref,
                      fcw_ref, fcb_ref,
                      out_ref,
                      pad2_ref, pad3_ref, pad4_ref,
                      *, nb, height, width):
    f32 = jnp.float32

    def bn_lrelu(acc, sc_ref, sh_ref):
        # Folded conv-bias + eval-mode BatchNorm, then LeakyReLU(0.1), in f32.
        y = acc * sc_ref[...] + sh_ref[...]
        return jnp.maximum(y, LEAKY_SLOPE * y)

    def maxpool2x2(y2d, h, w):
        # y2d: (nb*h*w, c) with rows ordered (n, h, w); keep c on the lane dim.
        c = y2d.shape[-1]
        y = y2d.reshape(nb * h * (w // 2), 2, c)
        y = jnp.maximum(y[:, 0, :], y[:, 1, :])              # pool along W
        y = y.reshape(nb * (h // 2), 2, w // 2, c)
        y = jnp.maximum(y[:, 0, :, :], y[:, 1, :, :])        # pool along H
        return y.reshape(nb, h // 2, w // 2, c)

    def fill_pad(pad_ref, act):
        # Zero ONLY the 1-pixel border strips (every grid step — safe under the
        # megacore "parallel" split), and write the pooled activation straight
        # into the interior: no separate staging copy, no full-buffer zero.
        _, hp, wp, c = pad_ref.shape
        h, w = hp - 2, wp - 2
        zrow = jnp.zeros((nb, 1, wp, c), pad_ref.dtype)
        zcol = jnp.zeros((nb, hp, 1, c), pad_ref.dtype)
        pad_ref[:, 0:1, :, :] = zrow
        pad_ref[:, h + 1:h + 2, :, :] = zrow
        pad_ref[:, :, 0:1, :] = zcol
        pad_ref[:, :, w + 1:w + 2, :] = zcol
        pad_ref[:, 1:h + 1, 1:w + 1, :] = act.astype(pad_ref.dtype)

    def conv_block(pad_ref, w_ref, sc_ref, sh_ref):
        # In-kernel im2col -> ONE long-K matmul (K = 9*Cin), bf16 operands,
        # f32 accumulation on the MXU.
        _, hp, wp, cin = pad_ref.shape
        h, w = hp - 2, wp - 2
        taps = [pad_ref[:, dy:dy + h, dx:dx + w, :]
                for dy in range(3) for dx in range(3)]
        patches = jnp.concatenate(taps, axis=-1)             # (nb, h, w, 9*cin)
        lhs = patches.reshape(nb * h * w, 9 * cin).astype(jnp.bfloat16)
        acc = jnp.dot(lhs, w_ref[...], preferred_element_type=f32)
        return maxpool2x2(bn_lrelu(acc, sc_ref, sh_ref), h, w)

    h, w = height, width

    # ---- Layer 1: wrapper already im2col'ed the input (K = 27, bf16) ----
    k1 = x_ref.shape[-1]
    lhs1 = x_ref[...].reshape(nb * h * w, k1)
    acc1 = jnp.dot(lhs1, w1_ref[...], preferred_element_type=f32)
    y = maxpool2x2(bn_lrelu(acc1, sc1_ref, sh1_ref), h, w)
    h, w = h // 2, w // 2

    # ---- Layers 2-4: pool output lands directly in the next padded scratch ----
    fill_pad(pad2_ref, y)
    y = conv_block(pad2_ref, w2_ref, sc2_ref, sh2_ref)
    h, w = h // 2, w // 2

    fill_pad(pad3_ref, y)
    y = conv_block(pad3_ref, w3_ref, sc3_ref, sh3_ref)
    h, w = h // 2, w // 2

    fill_pad(pad4_ref, y)
    y = conv_block(pad4_ref, w4_ref, sc4_ref, sh4_ref)
    h, w = h // 2, w // 2

    # ---- Epilogue: global-average-pool + Linear(256 -> 1) ----
    # FC as a VPU multiply + lane reduce (an N=1 MXU matmul wastes the array).
    # TODO(synk): nn.Dropout(p=0.3) is applied as inference-mode identity.
    cf = y.shape[-1]
    pooled = jnp.sum(y.reshape(nb, h * w, cf), axis=1) * (1.0 / (h * w))
    logits = jnp.sum(pooled * fcw_ref[...], axis=-1, keepdims=True) + fcb_ref[...]
    out_ref[...] = logits.reshape(1, nb, 1)


# --------------------------------------------------------------------------
# Wrapper: parameter folding, layer-1 im2col, chunking, pallas_call plumbing
# --------------------------------------------------------------------------
def fold_bn(bias, gamma, beta, mean, var):
    """Fold conv bias + eval-mode BatchNorm into per-channel scale/shift."""
    s = gamma / jnp.sqrt(var + EPS)
    t = beta + (bias - mean) * s
    return (s.reshape(1, -1).astype(jnp.float32),
            t.reshape(1, -1).astype(jnp.float32))


def _num_chunks(n, height, width):
    # Per-image VMEM footprint (bytes): double-buffered bf16 layer-1 patches
    # + the three f32 padded scratches.
    per_img = 2 * (2 * height * width * 27) + 4 * (
        (height // 2 + 2) * (width // 2 + 2) * 32
        + (height // 4 + 2) * (width // 4 + 2) * 64
        + (height // 8 + 2) * (width // 8 + 2) * 128)
    budget = 40 * 1024 * 1024   # headroom under v7x's 64 MiB physical VMEM
    chunks = 1
    # 2-way "parallel" split (v7x dual TensorCore) only when each half still
    # feeds the deepest conv layer an MXU-worthy M (>= 256 rows); on single-TC
    # v5e/v6e a split would just be serial-loop overhead at small batch.
    if n % 2 == 0 and (n // 2) * (height // 8) * (width // 8) >= 256:
        chunks = 2
    while n % (2 * chunks) == 0 and (n // chunks) * per_img > budget:
        chunks *= 2
    return chunks


def binary_improved_cnn_forward(x_nchw, params):
    x = jnp.transpose(x_nchw, (0, 2, 3, 1)).astype(jnp.float32)  # NCHW -> NHWC
    n, height, width, _ = x.shape
    assert height % 16 == 0 and width % 16 == 0, "four 2x2 pools need H,W % 16 == 0"

    num_chunks = _num_chunks(n, height, width)
    nb = n // num_chunks

    # Layer-1 im2col on the XLA side (cin=3 gives terribly shaped in-kernel
    # taps); columns ordered (dy, dx, cin) to match the weight reshape below.
    xp = jnp.pad(x, ((0, 0), (1, 1), (1, 1), (0, 0)))
    x_patches = jnp.concatenate(
        [xp[:, dy:dy + height, dx:dx + width, :]
         for dy in range(3) for dx in range(3)],
        axis=-1).astype(jnp.bfloat16)                          # (n, H, W, 27)

    ws, scales, shifts, couts = [], [], [], []
    for (wk, b, gamma, beta, mean, var) in params["blocks"]:
        kh, kw, ci, co = wk.shape
        ws.append(wk.reshape(kh * kw * ci, co).astype(jnp.bfloat16))  # (9*cin, cout)
        s, t = fold_bn(b, gamma, beta, mean, var)
        scales.append(s)
        shifts.append(t)
        couts.append(co)
    fc_w = params["fc_w"].reshape(1, -1).astype(jnp.float32)          # (1, 256)
    fc_b = params["fc_b"].reshape(1, 1).astype(jnp.float32)           # (1, 1)

    def whole(a):  # full-array block, resident across grid steps
        nd = a.ndim
        return pl.BlockSpec(a.shape, lambda i: (0,) * nd)

    in_specs = [pl.BlockSpec((nb, height, width, x_patches.shape[-1]),
                             lambda i: (i, 0, 0, 0))]
    flat_inputs = [x_patches]
    for l in range(4):
        in_specs += [whole(ws[l]), whole(scales[l]), whole(shifts[l])]
        flat_inputs += [ws[l], scales[l], shifts[l]]
    in_specs += [whole(fc_w), whole(fc_b)]
    flat_inputs += [fc_w, fc_b]

    scratch_shapes = [
        pltpu.VMEM((nb, height // 2 + 2, width // 2 + 2, couts[0]), jnp.float32),
        pltpu.VMEM((nb, height // 4 + 2, width // 4 + 2, couts[1]), jnp.float32),
        pltpu.VMEM((nb, height // 8 + 2, width // 8 + 2, couts[2]), jnp.float32),
    ]

    kernel = functools.partial(_fused_cnn_kernel, nb=nb, height=height, width=width)
    out = pl.pallas_call(
        kernel,
        out_shape=jax.ShapeDtypeStruct((num_chunks, nb, 1), jnp.float32),
        grid=(num_chunks,),
        in_specs=in_specs,
        out_specs=pl.BlockSpec((1, nb, 1), lambda i: (i, 0, 0)),
        scratch_shapes=scratch_shapes,
        compiler_params=pltpu.CompilerParams(
            dimension_semantics=("parallel",),
            # Safe on every generation (v7x physical VMEM is 64 MiB); can be
            # raised toward ~100 MiB on v5e/v6e for very large batches.
            vmem_limit_bytes=48 * 1024 * 1024,
        ),
    )(*flat_inputs)
    return out.reshape(n, 1)


# --------------------------------------------------------------------------
# Pure-JAX reference (independent implementation) for validation
# --------------------------------------------------------------------------
def reference_forward(x_nchw, params):
    x = jnp.transpose(x_nchw, (0, 2, 3, 1)).astype(jnp.float32)
    for (w, bias, gamma, beta, mean, var) in params["blocks"]:
        y = jax.lax.conv_general_dilated(
            x, w, window_strides=(1, 1), padding="SAME",
            dimension_numbers=("NHWC", "HWIO", "NHWC"),
            precision=jax.lax.Precision.HIGHEST)
        y = y + bias
        y = (y - mean) / jnp.sqrt(var + EPS) * gamma + beta
        y = jnp.where(y >= 0, y, LEAKY_SLOPE * y)
        nn_, hh, ww, cc = y.shape
        x = y.reshape(nn_, hh // 2, 2, ww // 2, 2, cc).max(axis=(2, 4))
    pooled = x.mean(axis=(1, 2))                                  # (N, 256)
    return jnp.dot(pooled, params["fc_w"],
                   precision=jax.lax.Precision.HIGHEST) + params["fc_b"]


# --------------------------------------------------------------------------
if __name__ == "__main__":
    key = jax.random.PRNGKey(0)
    N, H, W = 2, 16, 16
    chans = [(3, 32), (32, 64), (64, 128), (128, 256)]

    keys = jax.random.split(key, 6 * len(chans) + 3)
    ki = 0
    blocks = []
    for cin, cout in chans:
        wstd = 1.0 / (3.0 * (cin ** 0.5))     # keep activations O(1) through depth
        w = wstd * jax.random.normal(keys[ki], (3, 3, cin, cout), jnp.float32); ki += 1
        b = 0.1 * jax.random.normal(keys[ki], (cout,), jnp.float32); ki += 1
        gamma = 1.0 + 0.1 * jax.random.normal(keys[ki], (cout,), jnp.float32); ki += 1
        beta = 0.1 * jax.random.normal(keys[ki], (cout,), jnp.float32); ki += 1
        mean = 0.1 * jax.random.normal(keys[ki], (cout,), jnp.float32); ki += 1
        var = 1.0 + 0.1 * jnp.abs(jax.random.normal(keys[ki], (cout,), jnp.float32)); ki += 1
        blocks.append((w, b, gamma, beta, mean, var))

    fc_w = 0.1 * jax.random.normal(keys[ki], (256, 1), jnp.float32); ki += 1
    fc_b = 0.1 * jax.random.normal(keys[ki], (1,), jnp.float32); ki += 1
    params = {"blocks": blocks, "fc_w": fc_w, "fc_b": fc_b}

    # Input in PyTorch NCHW convention: (batch=2, channels=3, 16, 16)
    x = jax.random.normal(keys[ki], (N, 3, H, W), jnp.float32)

    fwd = jax.jit(binary_improved_cnn_forward)
    out = jax.block_until_ready(fwd(x, params))
    ref = jax.block_until_ready(reference_forward(x, params))

    assert out.shape == (N, 1), out.shape
    # bf16 MXU operands (f32 accumulation) -> compare at bf16-level tolerance.
    if not jnp.allclose(out, ref, atol=3e-2, rtol=3e-2):
        raise AssertionError(f"Pallas/reference mismatch:\n{out}\nvs\n{ref}")
    print("KERNEL_OK")
</pallas_src>

<mosaic_0001>
module attributes {stable_mosaic.version = 11 : i64} {
  func.func @_fused_cnn_kernel(%arg0: i32, %arg1: memref<2x16x16x27xbf16, #tpu.memory_space<vmem>>, %arg2: memref<27x32xbf16, #tpu.memory_space<vmem>>, %arg3: memref<1x32xf32, #tpu.memory_space<vmem>>, %arg4: memref<1x32xf32, #tpu.memory_space<vmem>>, %arg5: memref<288x64xbf16, #tpu.memory_space<vmem>>, %arg6: memref<1x64xf32, #tpu.memory_space<vmem>>, %arg7: memref<1x64xf32, #tpu.memory_space<vmem>>, %arg8: memref<576x128xbf16, #tpu.memory_space<vmem>>, %arg9: memref<1x128xf32, #tpu.memory_space<vmem>>, %arg10: memref<1x128xf32, #tpu.memory_space<vmem>>, %arg11: memref<1152x256xbf16, #tpu.memory_space<vmem>>, %arg12: memref<1x256xf32, #tpu.memory_space<vmem>>, %arg13: memref<1x256xf32, #tpu.memory_space<vmem>>, %arg14: memref<1x256xf32, #tpu.memory_space<vmem>>, %arg15: memref<1x1xf32, #tpu.memory_space<vmem>>, %arg16: memref<1x2x1xf32, #tpu.memory_space<vmem>>, %arg17: memref<2x10x10x32xf32, #tpu.memory_space<vmem>>, %arg18: memref<2x6x6x64xf32, #tpu.memory_space<vmem>>, %arg19: memref<2x4x4x128xf32, #tpu.memory_space<vmem>>) attributes {dimension_semantics = [#tpu.dimension_semantics<parallel>], iteration_bounds = array<i64: 1>, scalar_prefetch = 0 : i64, scratch_operands = 3 : i64, tpu.core_type = #tpu.core_type<tc>, window_params = [{transform_indices = @transform_0, window_bounds = array<i64: 2, 16, 16, 27>}, {pipeline_mode = #tpu.pipeline_mode<synchronous>, transform_indices = @transform_1, window_bounds = array<i64: 27, 32>}, {pipeline_mode = #tpu.pipeline_mode<synchronous>, transform_indices = @transform_2, window_bounds = array<i64: 1, 32>}, {pipeline_mode = #tpu.pipeline_mode<synchronous>, transform_indices = @transform_3, window_bounds = array<i64: 1, 32>}, {pipeline_mode = #tpu.pipeline_mode<synchronous>, transform_indices = @transform_4, window_bounds = array<i64: 288, 64>}, {pipeline_mode = #tpu.pipeline_mode<synchronous>, transform_indices = @transform_5, window_bounds = array<i64: 1, 64>}, {pipeline_mode = #tpu.pipeline_mode<synchronous>, transform_indices = @transform_6, window_bounds = array<i64: 1, 64>}, {pipeline_mode = #tpu.pipeline_mode<synchronous>, transform_indices = @transform_7, window_bounds = array<i64: 576, 128>}, {pipeline_mode = #tpu.pipeline_mode<synchronous>, transform_indices = @transform_8, window_bounds = array<i64: 1, 128>}, {pipeline_mode = #tpu.pipeline_mode<synchronous>, transform_indices = @transform_9, window_bounds = array<i64: 1, 128>}, {pipeline_mode = #tpu.pipeline_mode<synchronous>, transform_indices = @transform_10, window_bounds = array<i64: 1152, 256>}, {pipeline_mode = #tpu.pipeline_mode<synchronous>, transform_indices = @transform_11, window_bounds = array<i64: 1, 256>}, {pipeline_mode = #tpu.pipeline_mode<synchronous>, transform_indices = @transform_12, window_bounds = array<i64: 1, 256>}, {pipeline_mode = #tpu.pipeline_mode<synchronous>, transform_indices = @transform_13, window_bounds = array<i64: 1, 256>}, {pipeline_mode = #tpu.pipeline_mode<synchronous>, transform_indices = @transform_14, window_bounds = array<i64: 1, 1>}, {transform_indices = @transform_15, window_bounds = array<i64: 1, 2, 1>}]} {
    %c0 = arith.constant 0 : index
    %c0_0 = arith.constant 0 : index
    %c0_1 = arith.constant 0 : index
    %c0_2 = arith.constant 0 : index
    %0 = vector.load %arg1[%c0, %c0_0, %c0_1, %c0_2] : memref<2x16x16x27xbf16, #tpu.memory_space<vmem>>, vector<2x16x16x27xbf16>
    %1 = vector.shape_cast %0 : vector<2x16x16x27xbf16> to vector<512x27xbf16>
    %c0_3 = arith.constant 0 : index
    %c0_4 = arith.constant 0 : index
    %2 = vector.load %arg2[%c0_3, %c0_4] : memref<27x32xbf16, #tpu.memory_space<vmem>>, vector<27x32xbf16>
    %cst = arith.constant dense<0.000000e+00> : vector<512x32xf32>
    %3 = tpu.matmul %1, %2, %cst {dimension_numbers = #tpu.dot_dimension_numbers<[1], [0], [0], [1], [0, 0, 1, 1], [], []>} : vector<512x27xbf16>, vector<27x32xbf16>, vector<512x32xf32> -> vector<512x32xf32>
    %c0_5 = arith.constant 0 : index
    %c0_6 = arith.constant 0 : index
    %4 = vector.load %arg3[%c0_5, %c0_6] : memref<1x32xf32, #tpu.memory_space<vmem>>, vector<1x32xf32>
    %5 = vector.broadcast %4 : vector<1x32xf32> to vector<512x32xf32>
    %6 = arith.mulf %3, %5 : vector<512x32xf32>
    %c0_7 = arith.constant 0 : index
    %c0_8 = arith.constant 0 : index
    %7 = vector.load %arg4[%c0_7, %c0_8] : memref<1x32xf32, #tpu.memory_space<vmem>>, vector<1x32xf32>
    %8 = vector.broadcast %7 : vector<1x32xf32> to vector<512x32xf32>
    %9 = arith.addf %6, %8 : vector<512x32xf32>
    %cst_9 = arith.constant 1.000000e-01 : f32
    %10 = vector.broadcast %cst_9 : f32 to vector<512x32xf32>
    %11 = arith.mulf %10, %9 : vector<512x32xf32>
    %12 = arith.maximumf %9, %11 : vector<512x32xf32>
    %13 = vector.shape_cast %12 : vector<512x32xf32> to vector<256x2x32xf32>
    %14 = vector.extract_strided_slice %13 {offsets = [0, 0, 0], sizes = [256, 1, 32], strides = [1, 1, 1]} : vector<256x2x32xf32> to vector<256x1x32xf32>
    %15 = vector.shape_cast %14 : vector<256x1x32xf32> to vector<256x32xf32>
    %16 = vector.extract_strided_slice %13 {offsets = [0, 1, 0], sizes = [256, 1, 32], strides = [1, 1, 1]} : vector<256x2x32xf32> to vector<256x1x32xf32>
    %17 = vector.shape_cast %16 : vector<256x1x32xf32> to vector<256x32xf32>
    %18 = arith.maximumf %15, %17 : vector<256x32xf32>
    %19 = vector.shape_cast %18 : vector<256x32xf32> to vector<16x2x8x32xf32>
    %20 = vector.extract_strided_slice %19 {offsets = [0, 0, 0, 0], sizes = [16, 1, 8, 32], strides = [1, 1, 1, 1]} : vector<16x2x8x32xf32> to vector<16x1x8x32xf32>
    %21 = vector.shape_cast %20 : vector<16x1x8x32xf32> to vector<16x8x32xf32>
    %22 = vector.extract_strided_slice %19 {offsets = [0, 1, 0, 0], sizes = [16, 1, 8, 32], strides = [1, 1, 1, 1]} : vector<16x2x8x32xf32> to vector<16x1x8x32xf32>
    %23 = vector.shape_cast %22 : vector<16x1x8x32xf32> to vector<16x8x32xf32>
    %24 = arith.maximumf %21, %23 : vector<16x8x32xf32>
    %25 = vector.shape_cast %24 : vector<16x8x32xf32> to vector<2x8x8x32xf32>
    %cst_10 = arith.constant 0.000000e+00 : f32
    %26 = vector.broadcast %cst_10 : f32 to vector<2x1x10x32xf32>
    %cst_11 = arith.constant 0.000000e+00 : f32
    %27 = vector.broadcast %cst_11 : f32 to vector<2x10x1x32xf32>
    %c0_12 = arith.constant 0 : index
    %c0_13 = arith.constant 0 : index
    %c0_14 = arith.constant 0 : index
    %c0_15 = arith.constant 0 : index
    %28 = vector.load %arg17[%c0_12, %c0_13, %c0_14, %c0_15] : memref<2x10x10x32xf32, #tpu.memory_space<vmem>>, vector<2x1x10x32xf32>
    tpu.vector_store %arg17[%c0_12, %c0_13, %c0_14, %c0_15], %26 {strides = array<i32>} : memref<2x10x10x32xf32, #tpu.memory_space<vmem>>, vector<2x1x10x32xf32>,
    %c0_16 = arith.constant 0 : index
    %c9 = arith.constant 9 : index
    %c0_17 = arith.constant 0 : index
    %c0_18 = arith.constant 0 : index
    %29 = vector.load %arg17[%c0_16, %c9, %c0_17, %c0_18] : memref<2x10x10x32xf32, #tpu.memory_space<vmem>>, vector<2x1x10x32xf32>
    tpu.vector_store %arg17[%c0_16, %c9, %c0_17, %c0_18], %26 {strides = array<i32>} : memref<2x10x10x32xf32, #tpu.memory_space<vmem>>, vector<2x1x10x32xf32>,
    %c0_19 = arith.constant 0 : index
    %c0_20 = arith.constant 0 : index
    %c0_21 = arith.constant 0 : index
    %c0_22 = arith.constant 0 : index
    %30 = vector.load %arg17[%c0_19, %c0_20, %c0_21, %c0_22] : memref<2x10x10x32xf32, #tpu.memory_space<vmem>>, vector<2x10x1x32xf32>
    tpu.vector_store %arg17[%c0_19, %c0_20, %c0_21, %c0_22], %27 {strides = array<i32>} : memref<2x10x10x32xf32, #tpu.memory_space<vmem>>, vector<2x10x1x32xf32>,
    %c0_23 = arith.constant 0 : index
    %c0_24 = arith.constant 0 : index
    %c9_25 = arith.constant 9 : index
    %c0_26 = arith.constant 0 : index
    %31 = vector.load %arg17[%c0_23, %c0_24, %c9_25, %c0_26] : memref<2x10x10x32xf32, #tpu.memory_space<vmem>>, vector<2x10x1x32xf32>
    tpu.vector_store %arg17[%c0_23, %c0_24, %c9_25, %c0_26], %27 {strides = array<i32>} : memref<2x10x10x32xf32, #tpu.memory_space<vmem>>, vector<2x10x1x32xf32>,
    %c0_27 = arith.constant 0 : index
    %c1 = arith.constant 1 : index
    %c1_28 = arith.constant 1 : index
    %c0_29 = arith.constant 0 : index
    %32 = vector.load %arg17[%c0_27, %c1, %c1_28, %c0_29] : memref<2x10x10x32xf32, #tpu.memory_space<vmem>>, vector<2x8x8x32xf32>
    tpu.vector_store %arg17[%c0_27, %c1, %c1_28, %c0_29], %25 {strides = array<i32>} : memref<2x10x10x32xf32, #tpu.memory_space<vmem>>, vector<2x8x8x32xf32>,
    %c0_30 = arith.constant 0 : index
    %c0_31 = arith.constant 0 : index
    %c0_32 = arith.constant 0 : index
    %c0_33 = arith.constant 0 : index
    %33 = vector.load %arg17[%c0_30, %c0_31, %c0_32, %c0_33] : memref<2x10x10x32xf32, #tpu.memory_space<vmem>>, vector<2x8x8x32xf32>
    %c0_34 = arith.constant 0 : index
    %c0_35 = arith.constant 0 : index
    %c1_36 = arith.constant 1 : index
    %c0_37 = arith.constant 0 : index
    %34 = vector.load %arg17[%c0_34, %c0_35, %c1_36, %c0_37] : memref<2x10x10x32xf32, #tpu.memory_space<vmem>>, vector<2x8x8x32xf32>
    %c0_38 = arith.constant 0 : index
    %c0_39 = arith.constant 0 : index
    %c2 = arith.constant 2 : index
    %c0_40 = arith.constant 0 : index
    %35 = vector.load %arg17[%c0_38, %c0_39, %c2, %c0_40] : memref<2x10x10x32xf32, #tpu.memory_space<vmem>>, vector<2x8x8x32xf32>
    %c0_41 = arith.constant 0 : index
    %c1_42 = arith.constant 1 : index
    %c0_43 = arith.constant 0 : index
    %c0_44 = arith.constant 0 : index
    %36 = vector.load %arg17[%c0_41, %c1_42, %c0_43, %c0_44] : memref<2x10x10x32xf32, #tpu.memory_space<vmem>>, vector<2x8x8x32xf32>
    %c0_45 = arith.constant 0 : index
    %c1_46 = arith.constant 1 : index
    %c1_47 = arith.constant 1 : index
    %c0_48 = arith.constant 0 : index
    %37 = vector.load %arg17[%c0_45, %c1_46, %c1_47, %c0_48] : memref<2x10x10x32xf32, #tpu.memory_space<vmem>>, vector<2x8x8x32xf32>
    %c0_49 = arith.constant 0 : index
    %c1_50 = arith.constant 1 : index
    %c2_51 = arith.constant 2 : index
    %c0_52 = arith.constant 0 : index
    %38 = vector.load %arg17[%c0_49, %c1_50, %c2_51, %c0_52] : memref<2x10x10x32xf32, #tpu.memory_space<vmem>>, vector<2x8x8x32xf32>
    %c0_53 = arith.constant 0 : index
    %c2_54 = arith.constant 2 : index
    %c0_55 = arith.constant 0 : index
    %c0_56 = arith.constant 0 : index
    %39 = vector.load %arg17[%c0_53, %c2_54, %c0_55, %c0_56] : memref<2x10x10x32xf32, #tpu.memory_space<vmem>>, vector<2x8x8x32xf32>
    %c0_57 = arith.constant 0 : index
    %c2_58 = arith.constant 2 : index
    %c1_59 = arith.constant 1 : index
    %c0_60 = arith.constant 0 : index
    %40 = vector.load %arg17[%c0_57, %c2_58, %c1_59, %c0_60] : memref<2x10x10x32xf32, #tpu.memory_space<vmem>>, vector<2x8x8x32xf32>
    %c0_61 = arith.constant 0 : index
    %c2_62 = arith.constant 2 : index
    %c2_63 = arith.constant 2 : index
    %c0_64 = arith.constant 0 : index
    %41 = vector.load %arg17[%c0_61, %c2_62, %c2_63, %c0_64] : memref<2x10x10x32xf32, #tpu.memory_space<vmem>>, vector<2x8x8x32xf32>
    %42 = tpu.concatenate %33, %34, %35, %36, %37, %38, %39, %40, %41 in 3 : vector<2x8x8x32xf32>, vector<2x8x8x32xf32>, vector<2x8x8x32xf32>, vector<2x8x8x32xf32>, vector<2x8x8x32xf32>, vector<2x8x8x32xf32>, vector<2x8x8x32xf32>, vector<2x8x8x32xf32>, vector<2x8x8x32xf32> -> vector<2x8x8x288xf32>
    %43 = vector.shape_cast %42 : vector<2x8x8x288xf32> to vector<128x288xf32>
    %44 = arith.truncf %43 : vector<128x288xf32> to vector<128x288xbf16>
    %c0_65 = arith.constant 0 : index
    %c0_66 = arith.constant 0 : index
    %45 = vector.load %arg5[%c0_65, %c0_66] : memref<288x64xbf16, #tpu.memory_space<vmem>>, vector<288x64xbf16>
    %cst_67 = arith.constant dense<0.000000e+00> : vector<128x64xf32>
    %46 = tpu.matmul %44, %45, %cst_67 {dimension_numbers = #tpu.dot_dimension_numbers<[1], [0], [0], [1], [0, 0, 1, 1], [], []>} : vector<128x288xbf16>, vector<288x64xbf16>, vector<128x64xf32> -> vector<128x64xf32>
    %c0_68 = arith.constant 0 : index
    %c0_69 = arith.constant 0 : index
    %47 = vector.load %arg6[%c0_68, %c0_69] : memref<1x64xf32, #tpu.memory_space<vmem>>, vector<1x64xf32>
    %48 = vector.broadcast %47 : vector<1x64xf32> to vector<128x64xf32>
    %49 = arith.mulf %46, %48 : vector<128x64xf32>
    %c0_70 = arith.constant 0 : index
    %c0_71 = arith.constant 0 : index
    %50 = vector.load %arg7[%c0_70, %c0_71] : memref<1x64xf32, #tpu.memory_space<vmem>>, vector<1x64xf32>
    %51 = vector.broadcast %50 : vector<1x64xf32> to vector<128x64xf32>
    %52 = arith.addf %49, %51 : vector<128x64xf32>
    %cst_72 = arith.constant 1.000000e-01 : f32
    %53 = vector.broadcast %cst_72 : f32 to vector<128x64xf32>
    %54 = arith.mulf %53, %52 : vector<128x64xf32>
    %55 = arith.maximumf %52, %54 : vector<128x64xf32>
    %56 = vector.shape_cast %55 : vector<128x64xf32> to vector<64x2x64xf32>
    %57 = vector.extract_strided_slice %56 {offsets = [0, 0, 0], sizes = [64, 1, 64], strides = [1, 1, 1]} : vector<64x2x64xf32> to vector<64x1x64xf32>
    %58 = vector.shape_cast %57 : vector<64x1x64xf32> to vector<64x64xf32>
    %59 = vector.extract_strided_slice %56 {offsets = [0, 1, 0], sizes = [64, 1, 64], strides = [1, 1, 1]} : vector<64x2x64xf32> to vector<64x1x64xf32>
    %60 = vector.shape_cast %59 : vector<64x1x64xf32> to vector<64x64xf32>
    %61 = arith.maximumf %58, %60 : vector<64x64xf32>
    %62 = vector.shape_cast %61 : vector<64x64xf32> to vector<8x2x4x64xf32>
    %63 = vector.extract_strided_slice %62 {offsets = [0, 0, 0, 0], sizes = [8, 1, 4, 64], strides = [1, 1, 1, 1]} : vector<8x2x4x64xf32> to vector<8x1x4x64xf32>
    %64 = vector.shape_cast %63 : vector<8x1x4x64xf32> to vector<8x4x64xf32>
    %65 = vector.extract_strided_slice %62 {offsets = [0, 1, 0, 0], sizes = [8, 1, 4, 64], strides = [1, 1, 1, 1]} : vector<8x2x4x64xf32> to vector<8x1x4x64xf32>
    %66 = vector.shape_cast %65 : vector<8x1x4x64xf32> to vector<8x4x64xf32>
    %67 = arith.maximumf %64, %66 : vector<8x4x64xf32>
    %68 = vector.shape_cast %67 : vector<8x4x64xf32> to vector<2x4x4x64xf32>
    %cst_73 = arith.constant 0.000000e+00 : f32
    %69 = vector.broadcast %cst_73 : f32 to vector<2x1x6x64xf32>
    %cst_74 = arith.constant 0.000000e+00 : f32
    %70 = vector.broadcast %cst_74 : f32 to vector<2x6x1x64xf32>
    %c0_75 = arith.constant 0 : index
    %c0_76 = arith.constant 0 : index
    %c0_77 = arith.constant 0 : index
    %c0_78 = arith.constant 0 : index
    %71 = vector.load %arg18[%c0_75, %c0_76, %c0_77, %c0_78] : memref<2x6x6x64xf32, #tpu.memory_space<vmem>>, vector<2x1x6x64xf32>
    tpu.vector_store %arg18[%c0_75, %c0_76, %c0_77, %c0_78], %69 {strides = array<i32>} : memref<2x6x6x64xf32, #tpu.memory_space<vmem>>, vector<2x1x6x64xf32>,
    %c0_79 = arith.constant 0 : index
    %c5 = arith.constant 5 : index
    %c0_80 = arith.constant 0 : index
    %c0_81 = arith.constant 0 : index
    %72 = vector.load %arg18[%c0_79, %c5, %c0_80, %c0_81] : memref<2x6x6x64xf32, #tpu.memory_space<vmem>>, vector<2x1x6x64xf32>
    tpu.vector_store %arg18[%c0_79, %c5, %c0_80, %c0_81], %69 {strides = array<i32>} : memref<2x6x6x64xf32, #tpu.memory_space<vmem>>, vector<2x1x6x64xf32>,
    %c0_82 = arith.constant 0 : index
    %c0_83 = arith.constant 0 : index
    %c0_84 = arith.constant 0 : index
    %c0_85 = arith.constant 0 : index
    %73 = vector.load %arg18[%c0_82, %c0_83, %c0_84, %c0_85] : memref<2x6x6x64xf32, #tpu.memory_space<vmem>>, vector<2x6x1x64xf32>
    tpu.vector_store %arg18[%c0_82, %c0_83, %c0_84, %c0_85], %70 {strides = array<i32>} : memref<2x6x6x64xf32, #tpu.memory_space<vmem>>, vector<2x6x1x64xf32>,
    %c0_86 = arith.constant 0 : index
    %c0_87 = arith.constant 0 : index
    %c5_88 = arith.constant 5 : index
    %c0_89 = arith.constant 0 : index
    %74 = vector.load %arg18[%c0_86, %c0_87, %c5_88, %c0_89] : memref<2x6x6x64xf32, #tpu.memory_space<vmem>>, vector<2x6x1x64xf32>
    tpu.vector_store %arg18[%c0_86, %c0_87, %c5_88, %c0_89], %70 {strides = array<i32>} : memref<2x6x6x64xf32, #tpu.memory_space<vmem>>, vector<2x6x1x64xf32>,
    %c0_90 = arith.constant 0 : index
    %c1_91 = arith.constant 1 : index
    %c1_92 = arith.constant 1 : index
    %c0_93 = arith.constant 0 : index
    %75 = vector.load %arg18[%c0_90, %c1_91, %c1_92, %c0_93] : memref<2x6x6x64xf32, #tpu.memory_space<vmem>>, vector<2x4x4x64xf32>
    tpu.vector_store %arg18[%c0_90, %c1_91, %c1_92, %c0_93], %68 {strides = array<i32>} : memref<2x6x6x64xf32, #tpu.memory_space<vmem>>, vector<2x4x4x64xf32>,
    %c0_94 = arith.constant 0 : index
    %c0_95 = arith.constant 0 : index
    %c0_96 = arith.constant 0 : index
    %c0_97 = arith.constant 0 : index
    %76 = vector.load %arg18[%c0_94, %c0_95, %c0_96, %c0_97] : memref<2x6x6x64xf32, #tpu.memory_space<vmem>>, vector<2x4x4x64xf32>
    %c0_98 = arith.constant 0 : index
    %c0_99 = arith.constant 0 : index
    %c1_100 = arith.constant 1 : index
    %c0_101 = arith.constant 0 : index
    %77 = vector.load %arg18[%c0_98, %c0_99, %c1_100, %c0_101] : memref<2x6x6x64xf32, #tpu.memory_space<vmem>>, vector<2x4x4x64xf32>
    %c0_102 = arith.constant 0 : index
    %c0_103 = arith.constant 0 : index
    %c2_104 = arith.constant 2 : index
    %c0_105 = arith.constant 0 : index
    %78 = vector.load %arg18[%c0_102, %c0_103, %c2_104, %c0_105] : memref<2x6x6x64xf32, #tpu.memory_space<vmem>>, vector<2x4x4x64xf32>
    %c0_106 = arith.constant 0 : index
    %c1_107 = arith.constant 1 : index
    %c0_108 = arith.constant 0 : index
    %c0_109 = arith.constant 0 : index
    %79 = vector.load %arg18[%c0_106, %c1_107, %c0_108, %c0_109] : memref<2x6x6x64xf32, #tpu.memory_space<vmem>>, vector<2x4x4x64xf32>
    %c0_110 = arith.constant 0 : index
    %c1_111 = arith.constant 1 : index
    %c1_112 = arith.constant 1 : index
    %c0_113 = arith.constant 0 : index
    %80 = vector.load %arg18[%c0_110, %c1_111, %c1_112, %c0_113] : memref<2x6x6x64xf32, #tpu.memory_space<vmem>>, vector<2x4x4x64xf32>
    %c0_114 = arith.constant 0 : index
    %c1_115 = arith.constant 1 : index
    %c2_116 = arith.constant 2 : index
    %c0_117 = arith.constant 0 : index
    %81 = vector.load %arg18[%c0_114, %c1_115, %c2_116, %c0_117] : memref<2x6x6x64xf32, #tpu.memory_space<vmem>>, vector<2x4x4x64xf32>
    %c0_118 = arith.constant 0 : index
    %c2_119 = arith.constant 2 : index
    %c0_120 = arith.constant 0 : index
    %c0_121 = arith.constant 0 : index
    %82 = vector.load %arg18[%c0_118, %c2_119, %c0_120, %c0_121] : memref<2x6x6x64xf32, #tpu.memory_space<vmem>>, vector<2x4x4x64xf32>
    %c0_122 = arith.constant 0 : index
    %c2_123 = arith.constant 2 : index
    %c1_124 = arith.constant 1 : index
    %c0_125 = arith.constant 0 : index
    %83 = vector.load %arg18[%c0_122, %c2_123, %c1_124, %c0_125] : memref<2x6x6x64xf32, #tpu.memory_space<vmem>>, vector<2x4x4x64xf32>
    %c0_126 = arith.constant 0 : index
    %c2_127 = arith.constant 2 : index
    %c2_128 = arith.constant 2 : index
    %c0_129 = arith.constant 0 : index
    %84 = vector.load %arg18[%c0_126, %c2_127, %c2_128, %c0_129] : memref<2x6x6x64xf32, #tpu.memory_space<vmem>>, vector<2x4x4x64xf32>
    %85 = tpu.concatenate %76, %77, %78, %79, %80, %81, %82, %83, %84 in 3 : vector<2x4x4x64xf32>, vector<2x4x4x64xf32>, vector<2x4x4x64xf32>, vector<2x4x4x64xf32>, vector<2x4x4x64xf32>, vector<2x4x4x64xf32>, vector<2x4x4x64xf32>, vector<2x4x4x64xf32>, vector<2x4x4x64xf32> -> vector<2x4x4x576xf32>
    %86 = vector.shape_cast %85 : vector<2x4x4x576xf32> to vector<32x576xf32>
    %87 = arith.truncf %86 : vector<32x576xf32> to vector<32x576xbf16>
    %c0_130 = arith.constant 0 : index
    %c0_131 = arith.constant 0 : index
    %88 = vector.load %arg8[%c0_130, %c0_131] : memref<576x128xbf16, #tpu.memory_space<vmem>>, vector<576x128xbf16>
    %cst_132 = arith.constant dense<0.000000e+00> : vector<32x128xf32>
    %89 = tpu.matmul %87, %88, %cst_132 {dimension_numbers = #tpu.dot_dimension_numbers<[1], [0], [0], [1], [0, 0, 1, 1], [], []>} : vector<32x576xbf16>, vector<576x128xbf16>, vector<32x128xf32> -> vector<32x128xf32>
    %c0_133 = arith.constant 0 : index
    %c0_134 = arith.constant 0 : index
    %90 = vector.load %arg9[%c0_133, %c0_134] : memref<1x128xf32, #tpu.memory_space<vmem>>, vector<1x128xf32>
    %91 = vector.broadcast %90 : vector<1x128xf32> to vector<32x128xf32>
    %92 = arith.mulf %89, %91 : vector<32x128xf32>
    %c0_135 = arith.constant 0 : index
    %c0_136 = arith.constant 0 : index
    %93 = vector.load %arg10[%c0_135, %c0_136] : memref<1x128xf32, #tpu.memory_space<vmem>>, vector<1x128xf32>
    %94 = vector.broadcast %93 : vector<1x128xf32> to vector<32x128xf32>
    %95 = arith.addf %92, %94 : vector<32x128xf32>
    %cst_137 = arith.constant 1.000000e-01 : f32
    %96 = vector.broadcast %cst_137 : f32 to vector<32x128xf32>
    %97 = arith.mulf %96, %95 : vector<32x128xf32>
    %98 = arith.maximumf %95, %97 : vector<32x128xf32>
    %99 = vector.shape_cast %98 : vector<32x128xf32> to vector<16x2x128xf32>
    %100 = vector.extract_strided_slice %99 {offsets = [0, 0, 0], sizes = [16, 1, 128], strides = [1, 1, 1]} : vector<16x2x128xf32> to vector<16x1x128xf32>
    %101 = vector.shape_cast %100 : vector<16x1x128xf32> to vector<16x128xf32>
    %102 = vector.extract_strided_slice %99 {offsets = [0, 1, 0], sizes = [16, 1, 128], strides = [1, 1, 1]} : vector<16x2x128xf32> to vector<16x1x128xf32>
    %103 = vector.shape_cast %102 : vector<16x1x128xf32> to vector<16x128xf32>
    %104 = arith.maximumf %101, %103 : vector<16x128xf32>
    %105 = vector.shape_cast %104 : vector<16x128xf32> to vector<4x2x2x128xf32>
    %106 = vector.extract_strided_slice %105 {offsets = [0, 0, 0, 0], sizes = [4, 1, 2, 128], strides = [1, 1, 1, 1]} : vector<4x2x2x128xf32> to vector<4x1x2x128xf32>
    %107 = vector.shape_cast %106 : vector<4x1x2x128xf32> to vector<4x2x128xf32>
    %108 = vector.extract_strided_slice %105 {offsets = [0, 1, 0, 0], sizes = [4, 1, 2, 128], strides = [1, 1, 1, 1]} : vector<4x2x2x128xf32> to vector<4x1x2x128xf32>
    %109 = vector.shape_cast %108 : vector<4x1x2x128xf32> to vector<4x2x128xf32>
    %110 = arith.maximumf %107, %109 : vector<4x2x128xf32>
    %111 = vector.shape_cast %110 : vector<4x2x128xf32> to vector<2x2x2x128xf32>
    %cst_138 = arith.constant 0.000000e+00 : f32
    %112 = vector.broadcast %cst_138 : f32 to vector<2x1x4x128xf32>
    %cst_139 = arith.constant 0.000000e+00 : f32
    %113 = vector.broadcast %cst_139 : f32 to vector<2x4x1x128xf32>
    %c0_140 = arith.constant 0 : index
    %c0_141 = arith.constant 0 : index
    %c0_142 = arith.constant 0 : index
    %c0_143 = arith.constant 0 : index
    %114 = vector.load %arg19[%c0_140, %c0_141, %c0_142, %c0_143] : memref<2x4x4x128xf32, #tpu.memory_space<vmem>>, vector<2x1x4x128xf32>
    tpu.vector_store %arg19[%c0_140, %c0_141, %c0_142, %c0_143], %112 {strides = array<i32>} : memref<2x4x4x128xf32, #tpu.memory_space<vmem>>, vector<2x1x4x128xf32>,
    %c0_144 = arith.constant 0 : index
    %c3 = arith.constant 3 : index
    %c0_145 = arith.constant 0 : index
    %c0_146 = arith.constant 0 : index
    %115 = vector.load %arg19[%c0_144, %c3, %c0_145, %c0_146] : memref<2x4x4x128xf32, #tpu.memory_space<vmem>>, vector<2x1x4x128xf32>
    tpu.vector_store %arg19[%c0_144, %c3, %c0_145, %c0_146], %112 {strides = array<i32>} : memref<2x4x4x128xf32, #tpu.memory_space<vmem>>, vector<2x1x4x128xf32>,
    %c0_147 = arith.constant 0 : index
    %c0_148 = arith.constant 0 : index
    %c0_149 = arith.constant 0 : index
    %c0_150 = arith.constant 0 : index
    %116 = vector.load %arg19[%c0_147, %c0_148, %c0_149, %c0_150] : memref<2x4x4x128xf32, #tpu.memory_space<vmem>>, vector<2x4x1x128xf32>
    tpu.vector_store %arg19[%c0_147, %c0_148, %c0_149, %c0_150], %113 {strides = array<i32>} : memref<2x4x4x128xf32, #tpu.memory_space<vmem>>, vector<2x4x1x128xf32>,
    %c0_151 = arith.constant 0 : index
    %c0_152 = arith.constant 0 : index
    %c3_153 = arith.constant 3 : index
    %c0_154 = arith.constant 0 : index
    %117 = vector.load %arg19[%c0_151, %c0_152, %c3_153, %c0_154] : memref<2x4x4x128xf32, #tpu.memory_space<vmem>>, vector<2x4x1x128xf32>
    tpu.vector_store %arg19[%c0_151, %c0_152, %c3_153, %c0_154], %113 {strides = array<i32>} : memref<2x4x4x128xf32, #tpu.memory_space<vmem>>, vector<2x4x1x128xf32>,
    %c0_155 = arith.constant 0 : index
    %c1_156 = arith.constant 1 : index
    %c1_157 = arith.constant 1 : index
    %c0_158 = arith.constant 0 : index
    %118 = vector.load %arg19[%c0_155, %c1_156, %c1_157, %c0_158] : memref<2x4x4x128xf32, #tpu.memory_space<vmem>>, vector<2x2x2x128xf32>
    tpu.vector_store %arg19[%c0_155, %c1_156, %c1_157, %c0_158], %111 {strides = array<i32>} : memref<2x4x4x128xf32, #tpu.memory_space<vmem>>, vector<2x2x2x128xf32>,
    %c0_159 = arith.constant 0 : index
    %c0_160 = arith.constant 0 : index
    %c0_161 = arith.constant 0 : index
    %c0_162 = arith.constant 0 : index
    %119 = vector.load %arg19[%c0_159, %c0_160, %c0_161, %c0_162] : memref<2x4x4x128xf32, #tpu.memory_space<vmem>>, vector<2x2x2x128xf32>
    %c0_163 = arith.constant 0 : index
    %c0_164 = arith.constant 0 : index
    %c1_165 = arith.constant 1 : index
    %c0_166 = arith.constant 0 : index
    %120 = vector.load %arg19[%c0_163, %c0_164, %c1_165, %c0_166] : memref<2x4x4x128xf32, #tpu.memory_space<vmem>>, vector<2x2x2x128xf32>
    %c0_167 = arith.constant 0 : index
    %c0_168 = arith.constant 0 : index
    %c2_169 = arith.constant 2 : index
    %c0_170 = arith.constant 0 : index
    %121 = vector.load %arg19[%c0_167, %c0_168, %c2_169, %c0_170] : memref<2x4x4x128xf32, #tpu.memory_space<vmem>>, vector<2x2x2x128xf32>
    %c0_171 = arith.constant 0 : index
    %c1_172 = arith.constant 1 : index
    %c0_173 = arith.constant 0 : index
    %c0_174 = arith.constant 0 : index
    %122 = vector.load %arg19[%c0_171, %c1_172, %c0_173, %c0_174] : memref<2x4x4x128xf32, #tpu.memory_space<vmem>>, vector<2x2x2x128xf32>
    %c0_175 = arith.constant 0 : index
    %c1_176 = arith.constant 1 : index
    %c1_177 = arith.constant 1 : index
    %c0_178 = arith.constant 0 : index
    %123 = vector.load %arg19[%c0_175, %c1_176, %c1_177, %c0_178] : memref<2x4x4x128xf32, #tpu.memory_space<vmem>>, vector<2x2x2x128xf32>
    %c0_179 = arith.constant 0 : index
    %c1_180 = arith.constant 1 : index
    %c2_181 = arith.constant 2 : index
    %c0_182 = arith.constant 0 : index
    %124 = vector.load %arg19[%c0_179, %c1_180, %c2_181, %c0_182] : memref<2x4x4x128xf32, #tpu.memory_space<vmem>>, vector<2x2x2x128xf32>
    %c0_183 = arith.constant 0 : index
    %c2_184 = arith.constant 2 : index
    %c0_185 = arith.constant 0 : index
    %c0_186 = arith.constant 0 : index
    %125 = vector.load %arg19[%c0_183, %c2_184, %c0_185, %c0_186] : memref<2x4x4x128xf32, #tpu.memory_space<vmem>>, vector<2x2x2x128xf32>
    %c0_187 = arith.constant 0 : index
    %c2_188 = arith.constant 2 : index
    %c1_189 = arith.constant 1 : index
    %c0_190 = arith.constant 0 : index
    %126 = vector.load %arg19[%c0_187, %c2_188, %c1_189, %c0_190] : memref<2x4x4x128xf32, #tpu.memory_space<vmem>>, vector<2x2x2x128xf32>
    %c0_191 = arith.constant 0 : index
    %c2_192 = arith.constant 2 : index
    %c2_193 = arith.constant 2 : index
    %c0_194 = arith.constant 0 : index
    %127 = vector.load %arg19[%c0_191, %c2_192, %c2_193, %c0_194] : memref<2x4x4x128xf32, #tpu.memory_space<vmem>>, vector<2x2x2x128xf32>
    %128 = tpu.concatenate %119, %120, %121, %122, %123, %124, %125, %126, %127 in 3 : vector<2x2x2x128xf32>, vector<2x2x2x128xf32>, vector<2x2x2x128xf32>, vector<2x2x2x128xf32>, vector<2x2x2x128xf32>, vector<2x2x2x128xf32>, vector<2x2x2x128xf32>, vector<2x2x2x128xf32>, vector<2x2x2x128xf32> -> vector<2x2x2x1152xf32>
    %129 = vector.shape_cast %128 : vector<2x2x2x1152xf32> to vector<8x1152xf32>
    %130 = arith.truncf %129 : vector<8x1152xf32> to vector<8x1152xbf16>
    %c0_195 = arith.constant 0 : index
    %c0_196 = arith.constant 0 : index
    %131 = vector.load %arg11[%c0_195, %c0_196] : memref<1152x256xbf16, #tpu.memory_space<vmem>>, vector<1152x256xbf16>
    %cst_197 = arith.constant dense<0.000000e+00> : vector<8x256xf32>
    %132 = tpu.matmul %130, %131, %cst_197 {dimension_numbers = #tpu.dot_dimension_numbers<[1], [0], [0], [1], [0, 0, 1, 1], [], []>} : vector<8x1152xbf16>, vector<1152x256xbf16>, vector<8x256xf32> -> vector<8x256xf32>
    %c0_198 = arith.constant 0 : index
    %c0_199 = arith.constant 0 : index
    %133 = vector.load %arg12[%c0_198, %c0_199] : memref<1x256xf32, #tpu.memory_space<vmem>>, vector<1x256xf32>
    %134 = vector.broadcast %133 : vector<1x256xf32> to vector<8x256xf32>
    %135 = arith.mulf %132, %134 : vector<8x256xf32>
    %c0_200 = arith.constant 0 : index
    %c0_201 = arith.constant 0 : index
    %136 = vector.load %arg13[%c0_200, %c0_201] : memref<1x256xf32, #tpu.memory_space<vmem>>, vector<1x256xf32>
    %137 = vector.broadcast %136 : vector<1x256xf32> to vector<8x256xf32>
    %138 = arith.addf %135, %137 : vector<8x256xf32>
    %cst_202 = arith.constant 1.000000e-01 : f32
    %139 = vector.broadcast %cst_202 : f32 to vector<8x256xf32>
    %140 = arith.mulf %139, %138 : vector<8x256xf32>
    %141 = arith.maximumf %138, %140 : vector<8x256xf32>
    %142 = vector.shape_cast %141 : vector<8x256xf32> to vector<4x2x256xf32>
    %143 = vector.extract_strided_slice %142 {offsets = [0, 0, 0], sizes = [4, 1, 256], strides = [1, 1, 1]} : vector<4x2x256xf32> to vector<4x1x256xf32>
    %144 = vector.shape_cast %143 : vector<4x1x256xf32> to vector<4x256xf32>
    %145 = vector.extract_strided_slice %142 {offsets = [0, 1, 0], sizes = [4, 1, 256], strides = [1, 1, 1]} : vector<4x2x256xf32> to vector<4x1x256xf32>
    %146 = vector.shape_cast %145 : vector<4x1x256xf32> to vector<4x256xf32>
    %147 = arith.maximumf %144, %146 : vector<4x256xf32>
    %148 = vector.shape_cast %147 : vector<4x256xf32> to vector<2x2x1x256xf32>
    %149 = vector.extract_strided_slice %148 {offsets = [0, 0, 0, 0], sizes = [2, 1, 1, 256], strides = [1, 1, 1, 1]} : vector<2x2x1x256xf32> to vector<2x1x1x256xf32>
    %150 = vector.shape_cast %149 : vector<2x1x1x256xf32> to vector<2x1x256xf32>
    %151 = vector.extract_strided_slice %148 {offsets = [0, 1, 0, 0], sizes = [2, 1, 1, 256], strides = [1, 1, 1, 1]} : vector<2x2x1x256xf32> to vector<2x1x1x256xf32>
    %152 = vector.shape_cast %151 : vector<2x1x1x256xf32> to vector<2x1x256xf32>
    %153 = arith.maximumf %150, %152 : vector<2x1x256xf32>
    %154 = vector.shape_cast %153 : vector<2x1x256xf32> to vector<2x1x1x256xf32>
    %155 = vector.shape_cast %154 : vector<2x1x1x256xf32> to vector<2x1x256xf32>
    %cst_203 = arith.constant dense<0.000000e+00> : vector<2x256xf32>
    %156 = vector.multi_reduction <add>, %155, %cst_203 [1] : vector<2x1x256xf32> to vector<2x256xf32>
    %cst_204 = arith.constant 1.000000e+00 : f32
    %157 = vector.broadcast %cst_204 : f32 to vector<2x256xf32>
    %158 = arith.mulf %156, %157 : vector<2x256xf32>
    %c0_205 = arith.constant 0 : index
    %c0_206 = arith.constant 0 : index
    %159 = vector.load %arg14[%c0_205, %c0_206] : memref<1x256xf32, #tpu.memory_space<vmem>>, vector<1x256xf32>
    %160 = vector.broadcast %159 : vector<1x256xf32> to vector<2x256xf32>
    %161 = arith.mulf %158, %160 : vector<2x256xf32>
    %cst_207 = arith.constant dense<0.000000e+00> : vector<2xf32>
    %162 = vector.multi_reduction <add>, %161, %cst_207 [1] : vector<2x256xf32> to vector<2xf32>
    %163 = vector.shape_cast %162 : vector<2xf32> to vector<2x1xf32>
    %c0_208 = arith.constant 0 : index
    %c0_209 = arith.constant 0 : index
    %164 = vector.load %arg15[%c0_208, %c0_209] : memref<1x1xf32, #tpu.memory_space<vmem>>, vector<1x1xf32>
    %165 = vector.broadcast %164 : vector<1x1xf32> to vector<2x1xf32>
    %166 = arith.addf %163, %165 : vector<2x1xf32>
    %167 = vector.shape_cast %166 : vector<2x1xf32> to vector<1x2x1xf32>
    %c0_210 = arith.constant 0 : index
    %c0_211 = arith.constant 0 : index
    %c0_212 = arith.constant 0 : index
    %168 = vector.load %arg16[%c0_210, %c0_211, %c0_212] : memref<1x2x1xf32, #tpu.memory_space<vmem>>, vector<1x2x1xf32>
    tpu.vector_store %arg16[%c0_210, %c0_211, %c0_212], %167 {strides = array<i32>} : memref<1x2x1xf32, #tpu.memory_space<vmem>>, vector<1x2x1xf32>,
    return
  }
  func.func @transform_0(%arg0: i32) -> (i32, i32, i32, i32) {
    %c0_i32 = arith.constant 0 : i32
    %c0_i32_0 = arith.constant 0 : i32
    %c0_i32_1 = arith.constant 0 : i32
    %c0_i32_2 = arith.constant 0 : i32
    return %arg0, %c0_i32, %c0_i32_0, %c0_i32_1 : i32, i32, i32, i32
  }
  func.func @transform_1(%arg0: i32) -> (i32, i32) {
    %c0_i32 = arith.constant 0 : i32
    %c0_i32_0 = arith.constant 0 : i32
    %c0_i32_1 = arith.constant 0 : i32
    return %c0_i32, %c0_i32_0 : i32, i32
  }
  func.func @transform_2(%arg0: i32) -> (i32, i32) {
    %c0_i32 = arith.constant 0 : i32
    %c0_i32_0 = arith.constant 0 : i32
    %c0_i32_1 = arith.constant 0 : i32
    return %c0_i32, %c0_i32_0 : i32, i32
  }
  func.func @transform_3(%arg0: i32) -> (i32, i32) {
    %c0_i32 = arith.constant 0 : i32
    %c0_i32_0 = arith.constant 0 : i32
    %c0_i32_1 = arith.constant 0 : i32
    return %c0_i32, %c0_i32_0 : i32, i32
  }
  func.func @transform_4(%arg0: i32) -> (i32, i32) {
    %c0_i32 = arith.constant 0 : i32
    %c0_i32_0 = arith.constant 0 : i32
    %c0_i32_1 = arith.constant 0 : i32
    return %c0_i32, %c0_i32_0 : i32, i32
  }
  func.func @transform_5(%arg0: i32) -> (i32, i32) {
    %c0_i32 = arith.constant 0 : i32
    %c0_i32_0 = arith.constant 0 : i32
    %c0_i32_1 = arith.constant 0 : i32
    return %c0_i32, %c0_i32_0 : i32, i32
  }
  func.func @transform_6(%arg0: i32) -> (i32, i32) {
    %c0_i32 = arith.constant 0 : i32
    %c0_i32_0 = arith.constant 0 : i32
    %c0_i32_1 = arith.constant 0 : i32
    return %c0_i32, %c0_i32_0 : i32, i32
  }
  func.func @transform_7(%arg0: i32) -> (i32, i32) {
    %c0_i32 = arith.constant 0 : i32
    %c0_i32_0 = arith.constant 0 : i32
    %c0_i32_1 = arith.constant 0 : i32
    return %c0_i32, %c0_i32_0 : i32, i32
  }
  func.func @transform_8(%arg0: i32) -> (i32, i32) {
    %c0_i32 = arith.constant 0 : i32
    %c0_i32_0 = arith.constant 0 : i32
    %c0_i32_1 = arith.constant 0 : i32
    return %c0_i32, %c0_i32_0 : i32, i32
  }
  func.func @transform_9(%arg0: i32) -> (i32, i32) {
    %c0_i32 = arith.constant 0 : i32
    %c0_i32_0 = arith.constant 0 : i32
    %c0_i32_1 = arith.constant 0 : i32
    return %c0_i32, %c0_i32_0 : i32, i32
  }
  func.func @transform_10(%arg0: i32) -> (i32, i32) {
    %c0_i32 = arith.constant 0 : i32
    %c0_i32_0 = arith.constant 0 : i32
    %c0_i32_1 = arith.constant 0 : i32
    return %c0_i32, %c0_i32_0 : i32, i32
  }
  func.func @transform_11(%arg0: i32) -> (i32, i32) {
    %c0_i32 = arith.constant 0 : i32
    %c0_i32_0 = arith.constant 0 : i32
    %c0_i32_1 = arith.constant 0 : i32
    return %c0_i32, %c0_i32_0 : i32, i32
  }
  func.func @transform_12(%arg0: i32) -> (i32, i32) {
    %c0_i32 = arith.constant 0 : i32
    %c0_i32_0 = arith.constant 0 : i32
    %c0_i32_1 = arith.constant 0 : i32
    return %c0_i32, %c0_i32_0 : i32, i32
  }
  func.func @transform_13(%arg0: i32) -> (i32, i32) {
    %c0_i32 = arith.constant 0 : i32
    %c0_i32_0 = arith.constant 0 : i32
    %c0_i32_1 = arith.constant 0 : i32
    return %c0_i32, %c0_i32_0 : i32, i32
  }
  func.func @transform_14(%arg0: i32) -> (i32, i32) {
    %c0_i32 = arith.constant 0 : i32
    %c0_i32_0 = arith.constant 0 : i32
    %c0_i32_1 = arith.constant 0 : i32
    return %c0_i32, %c0_i32_0 : i32, i32
  }
  func.func @transform_15(%arg0: i32) -> (i32, i32, i32) {
    %c0_i32 = arith.constant 0 : i32
    %c0_i32_0 = arith.constant 0 : i32
    %c0_i32_1 = arith.constant 0 : i32
    return %arg0, %c0_i32, %c0_i32_0 : i32, i32, i32
  }
}

</mosaic_0001>

<bundles_post_ra>
// kernel: binary_improved_cnn_forward.1
= control target key start
LH: loop header
LB: loop body
LE: loop exit
PB: predicated region body
PF: predicated region fallthrough
CT: control target
= control target key end

     0   :  { %vm389_vm0 = vcmask 1044480   ;;  %vm390_vm1 = vcmask 1045504   ;;  %vm292_vm2 = vcmask 220160   ;;  %v10417_v1 = vmov 65535   ;;  %s10420_s25 = smov 64   ;;  %s10421_s26 = smov 32   ;;  %s12978_s1 = inlined_call_operand.vmem [shape: bf16[27,32], index: 1, kind: input, shape index: {}]   ;;  %s12979_s0 = inlined_call_operand.vmem [shape: bf16[2,16,16,27], index: 0, kind: input, shape index: {}]   ;;  %s12980_s2 = inlined_call_operand.vmem [shape: f32[1,32], index: 2, kind: input, shape index: {}]   ;;  %s12981_s3 = inlined_call_operand.vmem [shape: f32[1,32], index: 3, kind: input, shape index: {}]   ;;  %s12982_s4 = inlined_call_operand.vmem [shape: bf16[288,64], index: 4, kind: input, shape index: {}]   ;;  %s12983_s5 = inlined_call_operand.vmem [shape: f32[1,64], index: 5, kind: input, shape index: {}]   ;;  %s12984_s6 = inlined_call_operand.vmem [shape: f32[1,64], index: 6, kind: input, shape index: {}]   ;;  %s12985_s7 = inlined_call_operand.vmem [shape: bf16[576,128], index: 7, kind: input, shape index: {}]   ;;  %s12986_s10 = inlined_call_operand.vmem [shape: bf16[1152,256], index: 10, kind: input, shape index: {}]   ;;  %s12987_s8 = inlined_call_operand.vmem [shape: f32[1,128], index: 8, kind: input, shape index: {}]   ;;  %s12988_s9 = inlined_call_operand.vmem [shape: f32[1,128], index: 9, kind: input, shape index: {}]   ;;  %s12989_s14 = inlined_call_operand.<no memory space> [shape: f32[1,1], index: 14, kind: input, shape index: {}]   ;;  %s12990_s11 = inlined_call_operand.vmem [shape: f32[1,256], index: 11, kind: input, shape index: {}]   ;;  %s12991_s12 = inlined_call_operand.vmem [shape: f32[1,256], index: 12, kind: input, shape index: {}]   ;;  %s12992_s13 = inlined_call_operand.vmem [shape: f32[1,256], index: 13, kind: input, shape index: {}]   ;;  %s12993_s15 = inlined_call_operand.vmem [shape: f32[1,2,1], index: 15, kind: output, shape index: {}]  }
   0x1   :  { %v10103_v0 = vld [vmem:[%s12978_s1] sm:$0xff]   ;;  %v391_v2 = vsel %vm389_vm0, 4294967295, %v10417_v1  ;;  %v10104_v3 = vld [vmem:[%s12978_s1 + $0x8] sm:$0x3f]   ;;  %v10107_v8 = vld [vmem:[%s12979_s0 + $0x10] sm:$0xff]   ;;  %vm3515_vm3 = vcmask 261120   ;;  %v1023_v41 = vlaneseq }
   0x2   :  { %9740 = vmatprep.subr.bf16.mxu1 %v10103_v0  ;;  %v392_v4 = vsel %vm390_vm1, %v391_v2, 0  ;;  %v10105_v5 = vld [vmem:[%s12979_s0] sm:$0xff]   ;;  %v10106_v7 = vld [vmem:[%s12979_s0 + $0x8] sm:$0xff]   ;;  %v10108_v9 = vld [vmem:[%s12979_s0 + $0x18] sm:$0xff]   ;;  %vm3517_vm4 = vcmask 254976   ;;  %v12994_v38 = vmov 0.0  }
   0x3   :  { %9741 = vmatpush3.bf16.msra.mxu1 %v10103_v0  ;;  %v394_v6 = vand.u32 %v10104_v3, %v392_v4  ;;  %9744 = vmatprep.mubr.msk.bf16.mxu1 %vm292_vm2, %v10105_v5  ;;  %v10109_v10 = vld [vmem:[%s12979_s0 + $0x20] sm:$0xff]   ;;  %v10110_v11 = vld [vmem:[%s12979_s0 + $0x28] sm:$0xff]   ;;  %v10111_v12 = vld [vmem:[%s12979_s0 + $0x30] sm:$0xff]   ;;  %3516 = vst.msk [vmem:[#allocation2] sm:$0xff] %vm3515_vm3, %v12994_v38  ;;  %vm3526_vm5 = vcmask 253952   ;;  %v10761_v47 = vshrl.u32 %v1023_v41, 7 }
   0x4   :  { %v10112_v13 = vld [vmem:[%s12979_s0 + $0x38] sm:$0xff]   ;;  %v10113_v14 = vld [vmem:[%s12979_s0 + $0x40] sm:$0xff]   ;;  %v10114_v15 = vld [vmem:[%s12979_s0 + $0x48] sm:$0xff]   ;;  %3518 = vst.msk [vmem:[#allocation2 + $0x8] sm:$0x3] %vm3517_vm4, %v12994_v38  ;;  %vm4207_vm6 = vcmask 1041409  }
   0x5   :  { %9742 = vmatprep.subr.bf16.mxu1 %v394_v6  ;;  %v10115_v16 = vld [vmem:[%s12979_s0 + $0x50] sm:$0xff]   ;;  %v10116_v17 = vld [vmem:[%s12979_s0 + $0x58] sm:$0xff]   ;;  %v10117_v18 = vld [vmem:[%s12979_s0 + $0x60] sm:$0xff]   ;;  %3519 = vst.msk [vmem:[#allocation2 + $0xa0] sm:$0xff] %vm3515_vm3, %v12994_v38  ;;  %v10419_v39 = vmov 1983009808  }
   0x6   :  { %v10118_v19 = vld [vmem:[%s12979_s0 + $0x68] sm:$0xff]   ;;  %v10119_v20 = vld [vmem:[%s12979_s0 + $0x70] sm:$0xff]   ;;  %v10120_v21 = vld [vmem:[%s12979_s0 + $0x78] sm:$0xff]   ;;  %3520 = vst.msk [vmem:[#allocation2 + $0xa8] sm:$0x3] %vm3517_vm4, %v12994_v38  ;;  %v1021_v40 = vunpack.c.l.s4 %v10419_v39  ;;  %v10774_v0 = vsub.s32 0, %v10761_v47 }
   0x7   :  { %9743 = vmatpush3.bf16.msra.mxu1 %v394_v6  ;;  %v10121_v22 = vld [vmem:[%s12979_s0 + $0x80] sm:$0xff]   ;;  %v10122_v23 = vld [vmem:[%s12979_s0 + $0x88] sm:$0xff]   ;;  %v10123_v24 = vld [vmem:[%s12979_s0 + $0x90] sm:$0xff]   ;;  %3522 = vst.msk [vmem:[#allocation2 + $0x90] sm:$0xff] %vm3515_vm3, %v12994_v38  ;;  %vm4209_vm7 = vcmask 1042434   ;;  %vm4211_vm8 = vcmask 1043459  }
   0x8   :  { %v10124_v25 = vld [vmem:[%s12979_s0 + $0x98] sm:$0xff]   ;;  %v10125_v26 = vld [vmem:[%s12979_s0 + $0xa0] sm:$0xff]   ;;  %v10126_v27 = vld [vmem:[%s12979_s0 + $0xa8] sm:$0xff]   ;;  %3523 = vst.msk [vmem:[#allocation2 + $0x98] sm:$0x3] %vm3517_vm4, %v12994_v38  ;;  %v1022_v46 = vunpack.c.0.s8 %v1021_v40  ;;  %vm4213_vm9 = vcmask 1044484  }
   0x9   :  { %v10127_v28 = vld [vmem:[%s12979_s0 + $0xb0] sm:$0xff]   ;;  %v10128_v29 = vld [vmem:[%s12979_s0 + $0xb8] sm:$0xff]   ;;  %v10129_v30 = vld [vmem:[%s12979_s0 + $0xc0] sm:$0xff]   ;;  %3524 = vst.msk [vmem:[#allocation2 + $0x130] sm:$0xff] %vm3515_vm3, %v12994_v38  ;;  %vm4215_vm10 = vcmask 1045509   ;;  %vm4217_vm11 = vcmask 1046534  }
   0xa   :  { %9745 = vmatmul.mubr.msk.bf16.vlgmr.msra.gmra.mrb[0].mxu1 %vm292_vm2, %v10106_v7  ;;  %v10130_v31 = vld [vmem:[%s12979_s0 + $0xc8] sm:$0xff]   ;;  %v10131_v32 = vld [vmem:[%s12979_s0 + $0xd0] sm:$0xff]   ;;  %v10132_v33 = vld [vmem:[%s12979_s0 + $0xd8] sm:$0xff]   ;;  %3525 = vst.msk [vmem:[#allocation2 + $0x138] sm:$0x3] %vm3517_vm4, %v12994_v38  ;;  %v10769_v57 = vsub.s32 %v1022_v46, %v10761_v47  ;;  %vm4219_vm12 = vcmask 1047559  }
   0xb   :  { %9748 = vmatprep.mubr.msk.bf16.mxu1 %vm292_vm2, %v10107_v8  ;;  %v10133_v34 = vld [vmem:[%s12979_s0 + $0xe0] sm:$0xff]   ;;  %v10134_v35 = vld [vmem:[%s12979_s0 + $0xe8] sm:$0xff]   ;;  %v10135_v36 = vld [vmem:[%s12979_s0 + $0xf0] sm:$0xff]   ;;  %7293 = vst [vmem:[#allocation4] sm:$0xf] %v12994_v38  ;;  %s10422_s30 = smov 96  }
   0xc   :  { %v10136_v37 = vld [vmem:[%s12979_s0 + $0xf8] sm:$0xff]   ;;  %7294 = vst [vmem:[#allocation4 + $0x10] sm:$0xf] %v12994_v38  ;;  %7296 = vst [vmem:[#allocation4 + $0xc] sm:$0xf] %v12994_v38  ;;  %vm4904_vm13 = vcmask 523264  }
   0xd   :  { %7297 = vst [vmem:[#allocation4 + $0x1c] sm:$0xf] %v12994_v38  ;;  %7299 = vst [vmem:[#allocation4 + $0x4] sm:$0x1] %v12994_v38  ;;  %v10753_v42 = vld [vmem:[%s12980_s2] ss:$0 sm:$0xff] }
   0xe   :  { %7300 = vst [vmem:[#allocation4 + $0x8] sm:$0x1] %v12994_v38  ;;  %7303 = vst [vmem:[#allocation4 + $0x14] sm:$0x1] %v12994_v38  ;;  %v10758_v44 = vld [vmem:[%s12981_s3] ss:$0 sm:$0xff] }
   0xf   :  { %7304 = vst [vmem:[#allocation4 + $0x18] sm:$0x1] %v12994_v38  ;;  %7307 = vst [vmem:[#allocation4 + $0x7] sm:$0x1] %v12994_v38  ;;  %vm4921_vm14 = vcmask 785408   ;;  %vm6090_vm15 = vcmask 521216  }
  0x10   :  { %7308 = vst [vmem:[#allocation4 + $0xb] sm:$0x1] %v12994_v38  ;;  %7311 = vst [vmem:[#allocation4 + $0x17] sm:$0x1] %v12994_v38  ;;  %vm6096_vm0 = vcmask 516096   ;;  %vm6314_vm1 = vcmask 519168  }
  0x11   :  { %7312 = vst [vmem:[#allocation4 + $0x1b] sm:$0x1] %v12994_v38  ;;  %3527 = vst.msk [vmem:[#allocation2] sm:$0x1] %vm3526_vm5, %v12994_v38 }
  0x12   :  { %9749 = vmatmul.mubr.msk.bf16.gmra.mrb[4].mxu1 %vm292_vm2, %v10108_v9  ;;  %3547 = vst.msk [vmem:[#allocation2 + $0x9] sm:$0x1] %vm3526_vm5, %v12994_v38  ;;  %3548 = vst.msk [vmem:[#allocation2 + $0x19] sm:$0x1] %vm3526_vm5, %v12994_v38 }
  0x13   :  { %9752 = vmatprep.mubr.msk.bf16.mxu1 %vm292_vm2, %v10109_v10  ;;  %3528 = vst.msk [vmem:[#allocation2 + $0x10] sm:$0x1] %vm3526_vm5, %v12994_v38  ;;  %3529 = vst.msk [vmem:[#allocation2 + $0x20] sm:$0x1] %vm3526_vm5, %v12994_v38 }
  0x14   :  { %3530 = vst.msk [vmem:[#allocation2 + $0x30] sm:$0x1] %vm3526_vm5, %v12994_v38  ;;  %3531 = vst.msk [vmem:[#allocation2 + $0x40] sm:$0x1] %vm3526_vm5, %v12994_v38 }
  0x15   :  { %3532 = vst.msk [vmem:[#allocation2 + $0x50] sm:$0x1] %vm3526_vm5, %v12994_v38  ;;  %3533 = vst.msk [vmem:[#allocation2 + $0x60] sm:$0x1] %vm3526_vm5, %v12994_v38 }
  0x16   :  { %3534 = vst.msk [vmem:[#allocation2 + $0x70] sm:$0x1] %vm3526_vm5, %v12994_v38  ;;  %3535 = vst.msk [vmem:[#allocation2 + $0x80] sm:$0x1] %vm3526_vm5, %v12994_v38 }
  0x17   :  { %3538 = vst.msk [vmem:[#allocation2 + $0xb0] sm:$0x1] %vm3526_vm5, %v12994_v38  ;;  %3539 = vst.msk [vmem:[#allocation2 + $0xc0] sm:$0x1] %vm3526_vm5, %v12994_v38 }
  0x18   :  { %3540 = vst.msk [vmem:[#allocation2 + $0xd0] sm:$0x1] %vm3526_vm5, %v12994_v38  ;;  %3541 = vst.msk [vmem:[#allocation2 + $0xe0] sm:$0x1] %vm3526_vm5, %v12994_v38 }
  0x19   :  { %3542 = vst.msk [vmem:[#allocation2 + $0xf0] sm:$0x1] %vm3526_vm5, %v12994_v38  ;;  %3543 = vst.msk [vmem:[#allocation2 + $0x100] sm:$0x1] %vm3526_vm5, %v12994_v38 }
  0x1a   :  { %9753 = vmatmul.mubr.msk.bf16.gmra.mrb[8].mxu1 %vm292_vm2, %v10110_v11  ;;  %3544 = vst.msk [vmem:[#allocation2 + $0x110] sm:$0x1] %vm3526_vm5, %v12994_v38  ;;  %3545 = vst.msk [vmem:[#allocation2 + $0x120] sm:$0x1] %vm3526_vm5, %v12994_v38 }
  0x1b   :  { %9756 = vmatprep.mubr.msk.bf16.mxu1 %vm292_vm2, %v10111_v12  ;;  %3549 = vst.msk [vmem:[#allocation2 + $0x29] sm:$0x1] %vm3526_vm5, %v12994_v38  ;;  %3550 = vst.msk [vmem:[#allocation2 + $0x39] sm:$0x1] %vm3526_vm5, %v12994_v38 }
  0x1c   :  { %3551 = vst.msk [vmem:[#allocation2 + $0x49] sm:$0x1] %vm3526_vm5, %v12994_v38  ;;  %3552 = vst.msk [vmem:[#allocation2 + $0x59] sm:$0x1] %vm3526_vm5, %v12994_v38 }
  0x1d   :  { %3553 = vst.msk [vmem:[#allocation2 + $0x69] sm:$0x1] %vm3526_vm5, %v12994_v38  ;;  %3554 = vst.msk [vmem:[#allocation2 + $0x79] sm:$0x1] %vm3526_vm5, %v12994_v38 }
  0x1e   :  { %3555 = vst.msk [vmem:[#allocation2 + $0x89] sm:$0x1] %vm3526_vm5, %v12994_v38  ;;  %3558 = vst.msk [vmem:[#allocation2 + $0xb9] sm:$0x1] %vm3526_vm5, %v12994_v38 }
  0x1f   :  { %3559 = vst.msk [vmem:[#allocation2 + $0xc9] sm:$0x1] %vm3526_vm5, %v12994_v38  ;;  %3560 = vst.msk [vmem:[#allocation2 + $0xd9] sm:$0x1] %vm3526_vm5, %v12994_v38 }
  0x20   :  { %3561 = vst.msk [vmem:[#allocation2 + $0xe9] sm:$0x1] %vm3526_vm5, %v12994_v38  ;;  %3562 = vst.msk [vmem:[#allocation2 + $0xf9] sm:$0x1] %vm3526_vm5, %v12994_v38 }
  0x21   :  { %3563 = vst.msk [vmem:[#allocation2 + $0x109] sm:$0x1] %vm3526_vm5, %v12994_v38  ;;  %3564 = vst.msk [vmem:[#allocation2 + $0x119] sm:$0x1] %vm3526_vm5, %v12994_v38 }
  0x22   :  { %9757 = vmatmul.mubr.msk.bf16.gmra.mrb[12].mxu1 %vm292_vm2, %v10112_v13  ;;  %3565 = vst.msk [vmem:[#allocation2 + $0x129] sm:$0x1] %vm3526_vm5, %v12994_v38  ;;  %3536 = vst.msk [vmem:[#allocation2 + $0x90] sm:$0x1] %vm3526_vm5, %v12994_v38 }
  0x23   :  { %9760 = vmatprep.mubr.msk.bf16.mxu1 %vm292_vm2, %v10113_v14  ;;  %3537 = vst.msk [vmem:[#allocation2 + $0xa0] sm:$0x1] %vm3526_vm5, %v12994_v38  ;;  %3546 = vst.msk [vmem:[#allocation2 + $0x130] sm:$0x1] %vm3526_vm5, %v12994_v38 }
  0x24   :  { %3556 = vst.msk [vmem:[#allocation2 + $0x99] sm:$0x1] %vm3526_vm5, %v12994_v38  ;;  %3557 = vst.msk [vmem:[#allocation2 + $0xa9] sm:$0x1] %vm3526_vm5, %v12994_v38 }
  0x25   :  { %3566 = vst.msk [vmem:[#allocation2 + $0x139] sm:$0x1] %vm3526_vm5, %v12994_v38  ;;  %7298 = vst [vmem:[#allocation4] sm:$0x1] %v12994_v38 }
  0x26   :  { %7301 = vst [vmem:[#allocation4 + $0xc] sm:$0x1] %v12994_v38  ;;  %7302 = vst [vmem:[#allocation4 + $0x10] sm:$0x1] %v12994_v38 }
  0x27   :  { %7305 = vst [vmem:[#allocation4 + $0x1c] sm:$0x1] %v12994_v38  ;;  %7306 = vst [vmem:[#allocation4 + $0x3] sm:$0x1] %v12994_v38 }
  0x28   :  { %7309 = vst [vmem:[#allocation4 + $0xf] sm:$0x1] %v12994_v38  ;;  %7310 = vst [vmem:[#allocation4 + $0x13] sm:$0x1] %v12994_v38 }
  0x29   :  { %7313 = vst [vmem:[#allocation4 + $0x1f] sm:$0x1] %v12994_v38 }
  0x2a   :  { %9761 = vmatmul.mubr.msk.bf16.gmra.mrb[16].mxu1 %vm292_vm2, %v10114_v15 }
  0x2b   :  { %9764 = vmatprep.mubr.msk.bf16.mxu1 %vm292_vm2, %v10115_v16 }
  0x32   :  { %9765 = vmatmul.mubr.msk.bf16.gmra.mrb[20].mxu1 %vm292_vm2, %v10116_v17 }
  0x33   :  { %9768 = vmatprep.mubr.msk.bf16.mxu1 %vm292_vm2, %v10117_v18 }
  0x3a   :  { %9769 = vmatmul.mubr.msk.bf16.gmra.mrb[24].mxu1 %vm292_vm2, %v10118_v19 }
  0x3b   :  { %9772 = vmatprep.mubr.msk.bf16.mxu1 %vm292_vm2, %v10119_v20 }
  0x42   :  { %9773 = vmatmul.mubr.msk.bf16.gmra.mrb[28].mxu1 %vm292_vm2, %v10120_v21 }
  0x43   :  { %9776 = vmatprep.mubr.msk.bf16.mxu1 %vm292_vm2, %v10121_v22 }
  0x4a   :  { %9777 = vmatmul.mubr.msk.bf16.gmra.mrb[32].mxu1 %vm292_vm2, %v10122_v23 }
  0x4b   :  { %9780 = vmatprep.mubr.msk.bf16.mxu1 %vm292_vm2, %v10123_v24 }
  0x52   :  { %9781 = vmatmul.mubr.msk.bf16.gmra.mrb[36].mxu1 %vm292_vm2, %v10124_v25 }
  0x53   :  { %9784 = vmatprep.mubr.msk.bf16.mxu1 %vm292_vm2, %v10125_v26 }
  0x5a   :  { %9785 = vmatmul.mubr.msk.bf16.gmra.mrb[40].mxu1 %vm292_vm2, %v10126_v27 }
  0x5b   :  { %9788 = vmatprep.mubr.msk.bf16.mxu1 %vm292_vm2, %v10127_v28 }
  0x62   :  { %9789 = vmatmul.mubr.msk.bf16.gmra.mrb[44].mxu1 %vm292_vm2, %v10128_v29 }
  0x63   :  { %9792 = vmatprep.mubr.msk.bf16.mxu1 %vm292_vm2, %v10129_v30 }
  0x6a   :  { %9793 = vmatmul.mubr.msk.bf16.gmra.mrb[48].mxu1 %vm292_vm2, %v10130_v31 }
  0x6b   :  { %9796 = vmatprep.mubr.msk.bf16.mxu1 %vm292_vm2, %v10131_v32 }
  0x72   :  { %9797 = vmatmul.mubr.msk.bf16.gmra.mrb[52].mxu1 %vm292_vm2, %v10132_v33 }
  0x73   :  { %9800 = vmatprep.mubr.msk.bf16.mxu1 %vm292_vm2, %v10133_v34 }
  0x7a   :  { %9801 = vmatmul.mubr.msk.bf16.gmra.mrb[56].mxu1 %vm292_vm2, %v10134_v35 }
  0x7b   :  { %9804 = vmatprep.mubr.msk.bf16.mxu1 %vm292_vm2, %v10135_v36 }
  0x82   :  { %9805 = vmatmul.mubr.msk.bf16.gmra.mrb[60].mxu1 %vm292_vm2, %v10136_v37  ;;  %vm8901_vm2 = vcmask 1041408  }
  0xdd   :  { %v9746_v43 = vpop.f32.mrb[0].mxu1 }
  0xde   :  { %v694_v45 = vmul.f32 %v9746_v43, %v10753_v42  ;;  %v430_v48 = vpop.f32.mrb[1].mxu1 }
  0xdf   :  { %v692_v49 = vmul.f32 %v10753_v42, %v430_v48  ;;  %v9747_v50 = vpop.f32.mrb[2].mxu1 }
  0xe0   :  { %v765_v51 = vadd.f32 %v10758_v44, %v694_v45  ;;  %v695_v52 = vmul.f32 %v9747_v50, %v10753_v42  ;;  %v433_v53 = vpop.f32.mrb[3].mxu1 }
  0xe1   :  { %v763_v54 = vadd.f32 %v10758_v44, %v692_v49  ;;  %v693_v55 = vmul.f32 %v10753_v42, %v433_v53 }
  0xe2   :  { %v829_v56 = vmul.f32 0.1, %v765_v51  ;;  %v766_v58 = vadd.f32 %v10758_v44, %v695_v52 }
  0xe3   :  { %v827_v59 = vmul.f32 0.1, %v763_v54  ;;  %v764_v60 = vadd.f32 %v10758_v44, %v693_v55 }
  0xe4   :  { %v893_v61 = vmax.f32 %v765_v51, %v829_v56  ;;  %v830_v62 = vmul.f32 0.1, %v766_v58 }
  0xe5   :  { %v891_v63 = vmax.f32 %v763_v54, %v827_v59  ;;  %v828_v1 = vmul.f32 0.1, %v764_v60  ;;  %v9750_v2 = vpop.f32.mrb[4].mxu1 }
  0xe6   :  { %v1053_v3 = vcombine.high %v893_v61, %v893_v61  ;;  %v1060_v4 = vrot.slane %v893_v61, %v10769_v57  ;;  %v894_v5 = vmax.f32 %v766_v58, %v830_v62  ;;  %v10778_v6 = vmul.f32 %v9750_v2, %v10753_v42  ;;  %v446_v7 = vpop.f32.mrb[5].mxu1 }
  0xe7   :  { %v1019_v8 = vcombine.high %v891_v63, %v891_v63  ;;  %v1026_v9 = vrot.slane %v891_v63, %v10769_v57  ;;  %v892_v10 = vmax.f32 %v764_v60, %v828_v1  ;;  %v10782_v11 = vmul.f32 %v10753_v42, %v446_v7  ;;  %v10784_v12 = vpop.f32.mrb[6].mxu1 }
  0xe8   :  { %v1067_v13 = vrot.slane %v1053_v3, %v10769_v57  ;;  %v1068_v14 = vcombine.high %v1060_v4, %v1060_v4  ;;  %v8997_v15 = vrot.slane %v1060_v4, 9  ;;  %v1070_v16 = vcombine.high %v894_v5, %v894_v5  ;;  %v10787_v17 = vpop.f32.mrb[7].mxu1 }
  0xe9   :  { %v1033_v18 = vrot.slane %v1019_v8, %v10769_v57  ;;  %v1034_v19 = vcombine.high %v1026_v9, %v1026_v9  ;;  %v8989_v20 = vrot.slane %v1026_v9, 9  ;;  %v1077_v21 = vrot.slane %v894_v5, %v10769_v57 }
  0xea   :  { %v1069_v22 = vcombine.high %v1067_v13, %v1067_v13  ;;  %v8998_v23 = vrot.slane %v1068_v14, 9  ;;  %v8999_v24 = vrot.slane %v1067_v13, 9  ;;  %v3139_v25 = vmax.f32 %v1060_v4, %v8997_v15 }
  0xeb   :  { %v1035_v26 = vcombine.high %v1033_v18, %v1033_v18  ;;  %v8990_v27 = vrot.slane %v1034_v19, 9  ;;  %v8991_v28 = vrot.slane %v1033_v18, 9  ;;  %v3131_v29 = vmax.f32 %v1026_v9, %v8989_v20 }
  0xec   :  { %v9000_v30 = vrot.slane %v1069_v22, 9  ;;  %v3140_v31 = vmax.f32 %v1068_v14, %v8998_v23  ;;  %v3141_v32 = vmax.f32 %v1067_v13, %v8999_v24  ;;  %v1084_v33 = vrot.slane %v1070_v16, %v10769_v57 }
  0xed   :  { %v8992_v34 = vrot.slane %v1035_v26, 9  ;;  %v3132_v35 = vmax.f32 %v1034_v19, %v8990_v27  ;;  %v3133_v36 = vmax.f32 %v1033_v18, %v8991_v28  ;;  %v3387_v37 = vmax.f32 %v3131_v29, %v3139_v25  ;;  %v10792_v39 = vpop.f32.mrb[8].mxu1 }
  0xee   :  { %v3142_v40 = vmax.f32 %v1069_v22, %v9000_v30  ;;  %v1085_v41 = vcombine.high %v1077_v21, %v1077_v21  ;;  %v1086_v43 = vcombine.high %v1084_v33, %v1084_v33  ;;  %v9001_v45 = vrot.slane %v1077_v21, 9  ;;  %v10794_v46 = vpop.f32.mrb[9].mxu1 }
  0xef   :  { %v3134_v48 = vmax.f32 %v1035_v26, %v8992_v34  ;;  %v3388_v49 = vmax.f32 %v3132_v35, %v3140_v31  ;;  %v3389_v50 = vmax.f32 %v3133_v36, %v3141_v32  ;;  %v3698_v51 = vrot.slane %v3387_v37, %v10774_v0  ;;  %v10797_v52 = vpop.f32.mrb[10].mxu1 }
  0xf0   :  { %v9002_v53 = vrot.slane %v1085_v41, 9  ;;  %v9003_v54 = vrot.slane %v1084_v33, 9  ;;  %v9004_v55 = vrot.slane %v1086_v43, 9  ;;  %v3143_v56 = vmax.f32 %v1077_v21, %v9001_v45  ;;  %v10799_v58 = vpop.f32.mrb[11].mxu1 }
  0xf1   :  { %v3390_v59 = vmax.f32 %v3134_v48, %v3142_v40  ;;  %v3702_v60 = vrot.slane %v3388_v49, %v10774_v0  ;;  %v3706_v61 = vrot.slane %v3389_v50, %v10774_v0  ;;  %v1036_v62 = vcombine.high %v892_v10, %v892_v10 }
  0xf2   :  { %v3144_v63 = vmax.f32 %v1085_v41, %v9002_v53  ;;  %v3145_v1 = vmax.f32 %v1084_v33, %v9003_v54  ;;  %v3146_v2 = vmax.f32 %v1086_v43, %v9004_v55  ;;  %v1043_v3 = vrot.slane %v892_v10, %v10769_v57 }
  0xf3   :  { %v3710_v4 = vrot.slane %v3390_v59, %v10774_v0  ;;  %v4208_v5 = vsel %vm4207_vm6, %v3702_v60, %v3698_v51  ;;  %v1050_v7 = vrot.slane %v1036_v62, %v10769_v57  ;;  %v769_v8 = vadd.f32 %v10758_v44, %v10778_v6 }
  0xf4   :  { %v4210_v9 = vsel %vm4209_vm7, %v3706_v61, %v4208_v5  ;;  %v1051_v13 = vcombine.high %v1043_v3, %v1043_v3  ;;  %v8993_v14 = vrot.slane %v1043_v3, 9  ;;  %v767_v15 = vadd.f32 %v10758_v44, %v10782_v11 }
  0xf5   :  { %v1052_v16 = vcombine.high %v1050_v7, %v1050_v7  ;;  %v8995_v10 = vrot.slane %v1050_v7, 9  ;;  %v4212_v18 = vsel %vm4211_vm8, %v3710_v4, %v4210_v9  ;;  %v833_v19 = vmul.f32 0.1, %v769_v8  ;;  %v10813_v20 = vpop.f32.mrb[12].mxu1 }
  0xf6   :  { %v8994_v21 = vrot.slane %v1051_v13, 9  ;;  %v3135_v22 = vmax.f32 %v1043_v3, %v8993_v14  ;;  %v831_v23 = vmul.f32 0.1, %v767_v15  ;;  %v699_v6 = vmul.f32 %v10784_v12, %v10753_v42  ;;  %v10817_v24 = vpop.f32.mrb[13].mxu1 }
  0xf7   :  { %v8996_v25 = vrot.slane %v1052_v16, 9  ;;  %v3137_v26 = vmax.f32 %v1050_v7, %v8995_v10  ;;  %v897_v27 = vmax.f32 %v769_v8, %v833_v19  ;;  %v697_v11 = vmul.f32 %v10753_v42, %v10787_v17  ;;  %v10821_v28 = vpop.f32.mrb[14].mxu1 }
  0xf8   :  { %v3136_v29 = vmax.f32 %v1051_v13, %v8994_v21  ;;  %v3391_v30 = vmax.f32 %v3135_v22, %v3143_v56  ;;  %v895_v31 = vmax.f32 %v767_v15, %v831_v23  ;;  %v770_v32 = vadd.f32 %v10758_v44, %v699_v6  ;;  %v10824_v33 = vpop.f32.mrb[15].mxu1 }
  0xf9   :  { %v3138_v34 = vmax.f32 %v1052_v16, %v8996_v25  ;;  %v3393_v35 = vmax.f32 %v3137_v26, %v3145_v1  ;;  %v1121_v12 = vcombine.high %v897_v27, %v897_v27  ;;  %v1128_v36 = vrot.slane %v897_v27, %v10769_v57 }
  0xfa   :  { %v3392_v37 = vmax.f32 %v3136_v29, %v3144_v63  ;;  %v3714_v40 = vrot.slane %v3391_v30, %v10774_v0  ;;  %v1087_v41 = vcombine.high %v895_v31, %v895_v31  ;;  %v1094_v17 = vrot.slane %v895_v31, %v10769_v57 }
  0xfb   :  { %v3394_v43 = vmax.f32 %v3138_v34, %v3146_v2  ;;  %v3722_v45 = vrot.slane %v3393_v35, %v10774_v0  ;;  %v1135_v48 = vrot.slane %v1121_v12, %v10769_v57  ;;  %v1136_v49 = vcombine.high %v1128_v36, %v1128_v36 }
  0xfc   :  { %v3718_v50 = vrot.slane %v3392_v37, %v10774_v0  ;;  %v4214_v51 = vsel %vm4213_vm9, %v3714_v40, %v4212_v18  ;;  %v9013_v53 = vrot.slane %v1128_v36, 9  ;;  %v1101_v54 = vrot.slane %v1087_v41, %v10769_v57 }
  0xfd   :  { %v3726_v55 = vrot.slane %v3394_v43, %v10774_v0  ;;  %v1137_v56 = vcombine.high %v1135_v48, %v1135_v48  ;;  %v9014_v59 = vrot.slane %v1136_v49, 9  ;;  %v9015_v60 = vrot.slane %v1135_v48, 9  ;;  %v10835_v61 = vpop.f32.mrb[16].mxu1 }
  0xfe   :  { %v4216_v62 = vsel %vm4215_vm10, %v3718_v50, %v4214_v51  ;;  %v3155_v63 = vmax.f32 %v1128_v36, %v9013_v53  ;;  %v1102_v1 = vcombine.high %v1094_v17, %v1094_v17  ;;  %v1103_v2 = vcombine.high %v1101_v54, %v1101_v54  ;;  %v10838_v3 = vpop.f32.mrb[17].mxu1 }
  0xff   :  { %v4218_v4 = vsel %vm4217_vm11, %v3722_v45, %v4216_v62  ;;  %v9016_v5 = vrot.slane %v1137_v56, 9  ;;  %v3156_v7 = vmax.f32 %v1136_v49, %v9014_v59  ;;  %v3157_v8 = vmax.f32 %v1135_v48, %v9015_v60  ;;  %v10841_v9 = vpop.f32.mrb[18].mxu1 }
 0x100   :  { %v4220_v13 = vsel %vm4219_vm12, %v3726_v55, %v4218_v4  ;;  %v9005_v14 = vrot.slane %v1094_v17, 9  ;;  %v9006_v15 = vrot.slane %v1102_v1, 9  ;;  %v9007_v16 = vrot.slane %v1101_v54, 9  ;;  %v10844_v10 = vpop.f32.mrb[19].mxu1 }
 0x101   :  { %4343 = vst.msk [vmem:[#allocation2 + $0x11] sm:$0xff] %vm3515_vm3, %v4220_v13  ;;  %v3158_v18 = vmax.f32 %v1137_v56, %v9016_v5  ;;  %v9008_v19 = vrot.slane %v1103_v2, 9  ;;  %v834_v21 = vmul.f32 0.1, %v770_v32  ;;  %v768_v22 = vadd.f32 %v10758_v44, %v697_v11 }
 0x102   :  { %v3147_v23 = vmax.f32 %v1094_v17, %v9005_v14  ;;  %v3148_v6 = vmax.f32 %v1102_v1, %v9006_v15  ;;  %v3149_v25 = vmax.f32 %v1101_v54, %v9007_v16  ;;  %v702_v26 = vmul.f32 %v10792_v39, %v10753_v42 }
 0x103   :  { %v3150_v27 = vmax.f32 %v1103_v2, %v9008_v19  ;;  %v898_v29 = vmax.f32 %v770_v32, %v834_v21  ;;  %v832_v30 = vmul.f32 0.1, %v768_v22  ;;  %v700_v31 = vmul.f32 %v10753_v42, %v10794_v46 }
 0x104   :  { %v3395_v34 = vmax.f32 %v3147_v23, %v3155_v63  ;;  %v3396_v35 = vmax.f32 %v3148_v6, %v3156_v7  ;;  %v3397_v12 = vmax.f32 %v3149_v25, %v3157_v8  ;;  %v773_v36 = vadd.f32 %v10758_v44, %v702_v26 }
 0x105   :  { %v3398_v37 = vmax.f32 %v3150_v27, %v3158_v18  ;;  %v1138_v40 = vcombine.high %v898_v29, %v898_v29  ;;  %v1145_v11 = vrot.slane %v898_v29, %v10769_v57  ;;  %v896_v41 = vmax.f32 %v768_v22, %v832_v30  ;;  %v10854_v17 = vpop.f32.mrb[20].mxu1 }
 0x106   :  { %v3730_v39 = vrot.slane %v3395_v34, %v10774_v0  ;;  %v3734_v32 = vrot.slane %v3396_v35, %v10774_v0  ;;  %v3738_v43 = vrot.slane %v3397_v12, %v10774_v0  ;;  %v837_v45 = vmul.f32 0.1, %v773_v36  ;;  %v10859_v46 = vpop.f32.mrb[21].mxu1 }
 0x107   :  { %v3742_v48 = vrot.slane %v3398_v37, %v10774_v0  ;;  %v1152_v49 = vrot.slane %v1138_v40, %v10769_v57  ;;  %v1153_v50 = vcombine.high %v1145_v11, %v1145_v11  ;;  %v9017_v51 = vrot.slane %v1145_v11, 9  ;;  %v10863_v53 = vpop.f32.mrb[22].mxu1 }
 0x108   :  { %v4221_v54 = vsel %vm4207_vm6, %v3734_v32, %v3730_v39  ;;  %v1104_v55 = vcombine.high %v896_v41, %v896_v41  ;;  %v1111_v56 = vrot.slane %v896_v41, %v10769_v57  ;;  %v901_v59 = vmax.f32 %v773_v36, %v837_v45  ;;  %v10867_v60 = vpop.f32.mrb[23].mxu1 }
 0x109   :  { %v4222_v62 = vsel %vm4209_vm7, %v3738_v43, %v4221_v54  ;;  %v1154_v63 = vcombine.high %v1152_v49, %v1152_v49  ;;  %v9018_v1 = vrot.slane %v1153_v50, 9  ;;  %v9019_v2 = vrot.slane %v1152_v49, 9 }
 0x10a   :  { %v3159_v4 = vmax.f32 %v1145_v11, %v9017_v51  ;;  %v1118_v5 = vrot.slane %v1104_v55, %v10769_v57  ;;  %v1119_v7 = vcombine.high %v1111_v56, %v1111_v56  ;;  %v9009_v8 = vrot.slane %v1111_v56, 9 }
 0x10b   :  { %v9020_v13 = vrot.slane %v1154_v63, 9  ;;  %v3160_v14 = vmax.f32 %v1153_v50, %v9018_v1  ;;  %v3161_v15 = vmax.f32 %v1152_v49, %v9019_v2  ;;  %v4223_v16 = vsel %vm4211_vm8, %v3742_v48, %v4222_v62 }
 0x10c   :  { %v1120_v18 = vcombine.high %v1118_v5, %v1118_v5  ;;  %v9010_v19 = vrot.slane %v1119_v7, 9  ;;  %v9011_v21 = vrot.slane %v1118_v5, 9  ;;  %v3151_v22 = vmax.f32 %v1111_v56, %v9009_v8 }
 0x10d   :  { %v3162_v23 = vmax.f32 %v1154_v63, %v9020_v13  ;;  %v1189_v6 = vcombine.high %v901_v59, %v901_v59  ;;  %v1196_v25 = vrot.slane %v901_v59, %v10769_v57  ;;  %v771_v26 = vadd.f32 %v10758_v44, %v700_v31  ;;  %v10874_v27 = vpop.f32.mrb[24].mxu1 }
 0x10e   :  { %v9012_v29 = vrot.slane %v1120_v18, 9  ;;  %v3152_v30 = vmax.f32 %v1119_v7, %v9010_v19  ;;  %v3153_v34 = vmax.f32 %v1118_v5, %v9011_v21  ;;  %v3399_v35 = vmax.f32 %v3151_v22, %v3159_v4  ;;  %v10876_v12 = vpop.f32.mrb[25].mxu1 }
 0x10f   :  { %v1203_v36 = vrot.slane %v1189_v6, %v10769_v57  ;;  %v1204_v37 = vcombine.high %v1196_v25, %v1196_v25  ;;  %v9029_v40 = vrot.slane %v1196_v25, 9  ;;  %v835_v11 = vmul.f32 0.1, %v771_v26  ;;  %v10879_v41 = vpop.f32.mrb[26].mxu1 }
 0x110   :  { %v3154_v39 = vmax.f32 %v1120_v18, %v9012_v29  ;;  %v3400_v32 = vmax.f32 %v3152_v30, %v3160_v14  ;;  %v3401_v43 = vmax.f32 %v3153_v34, %v3161_v15  ;;  %v3746_v31 = vrot.slane %v3399_v35, %v10774_v0  ;;  %v10882_v45 = vpop.f32.mrb[27].mxu1 }
 0x111   :  { %v1205_v48 = vcombine.high %v1203_v36, %v1203_v36  ;;  %v9030_v49 = vrot.slane %v1204_v37, 9  ;;  %v9031_v50 = vrot.slane %v1203_v36, 9  ;;  %v3171_v51 = vmax.f32 %v1196_v25, %v9029_v40 }
 0x112   :  { %v3402_v54 = vmax.f32 %v3154_v39, %v3162_v23  ;;  %v3750_v55 = vrot.slane %v3400_v32, %v10774_v0  ;;  %v3754_v56 = vrot.slane %v3401_v43, %v10774_v0  ;;  %v4224_v59 = vsel %vm4213_vm9, %v3746_v31, %v4223_v16 }
 0x113   :  { %v9032_v62 = vrot.slane %v1205_v48, 9  ;;  %v3172_v63 = vmax.f32 %v1204_v37, %v9030_v49  ;;  %v3173_v1 = vmax.f32 %v1203_v36, %v9031_v50  ;;  %v899_v2 = vmax.f32 %v771_v26, %v835_v11 }
 0x114   :  { %v3758_v4 = vrot.slane %v3402_v54, %v10774_v0  ;;  %v4225_v5 = vsel %vm4215_vm10, %v3750_v55, %v4224_v59  ;;  %v703_v7 = vmul.f32 %v10797_v52, %v10753_v42  ;;  %v701_v8 = vmul.f32 %v10753_v42, %v10799_v58 }
 0x115   :  { %v4226_v13 = vsel %vm4217_vm11, %v3754_v56, %v4225_v5  ;;  %v3174_v14 = vmax.f32 %v1205_v48, %v9032_v62  ;;  %v1155_v15 = vcombine.high %v899_v2, %v899_v2  ;;  %v1162_v16 = vrot.slane %v899_v2, %v10769_v57  ;;  %v10895_v18 = vpop.f32.mrb[28].mxu1 }
 0x116   :  { %v4227_v19 = vsel %vm4219_vm12, %v3758_v4, %v4226_v13  ;;  %v774_v21 = vadd.f32 %v10758_v44, %v703_v7  ;;  %v772_v22 = vadd.f32 %v10758_v44, %v701_v8  ;;  %v706_v52 = vmul.f32 %v10813_v20, %v10753_v42  ;;  %v10902_v23 = vpop.f32.mrb[29].mxu1 }
 0x117   :  { %4344 = vst.msk [vmem:[#allocation2 + $0x21] sm:$0xff] %vm3515_vm3, %v4227_v19  ;;  %v1169_v58 = vrot.slane %v1155_v15, %v10769_v57  ;;  %v1170_v6 = vcombine.high %v1162_v16, %v1162_v16  ;;  %v9021_v25 = vrot.slane %v1162_v16, 9  ;;  %v704_v26 = vmul.f32 %v10753_v42, %v10817_v24  ;;  %v10908_v29 = vpop.f32.mrb[30].mxu1 }
 0x118   :  { %v838_v30 = vmul.f32 0.1, %v774_v21  ;;  %v836_v34 = vmul.f32 0.1, %v772_v22  ;;  %v777_v35 = vadd.f32 %v10758_v44, %v706_v52  ;;  %v707_v20 = vmul.f32 %v10821_v28, %v10753_v42  ;;  %v10913_v36 = vpop.f32.mrb[31].mxu1 }
 0x119   :  { %v1171_v37 = vcombine.high %v1169_v58, %v1169_v58  ;;  %v9022_v40 = vrot.slane %v1170_v6, 9  ;;  %v9023_v11 = vrot.slane %v1169_v58, 9  ;;  %v3163_v39 = vmax.f32 %v1162_v16, %v9021_v25 }
 0x11a   :  { %v902_v32 = vmax.f32 %v774_v21, %v838_v30  ;;  %v900_v43 = vmax.f32 %v772_v22, %v836_v34  ;;  %v841_v31 = vmul.f32 0.1, %v777_v35  ;;  %v775_v24 = vadd.f32 %v10758_v44, %v704_v26 }
 0x11b   :  { %v9024_v48 = vrot.slane %v1171_v37, 9  ;;  %v3164_v49 = vmax.f32 %v1170_v6, %v9022_v40  ;;  %v3165_v50 = vmax.f32 %v1169_v58, %v9023_v11  ;;  %v3403_v54 = vmax.f32 %v3163_v39, %v3171_v51 }
 0x11c   :  { %v1206_v55 = vcombine.high %v902_v32, %v902_v32  ;;  %v1213_v56 = vrot.slane %v902_v32, %v10769_v57  ;;  %v1172_v59 = vcombine.high %v900_v43, %v900_v43  ;;  %v1179_v28 = vrot.slane %v900_v43, %v10769_v57 }
 0x11d   :  { %v3166_v62 = vmax.f32 %v1171_v37, %v9024_v48  ;;  %v3404_v2 = vmax.f32 %v3164_v49, %v3172_v63  ;;  %v3405_v4 = vmax.f32 %v3165_v50, %v3173_v1  ;;  %v3762_v5 = vrot.slane %v3403_v54, %v10774_v0  ;;  %v10919_v7 = vpop.f32.mrb[32].mxu1 }
 0x11e   :  { %v1220_v8 = vrot.slane %v1206_v55, %v10769_v57  ;;  %v1221_v13 = vcombine.high %v1213_v56, %v1213_v56  ;;  %v9033_v15 = vrot.slane %v1213_v56, 9  ;;  %v1186_v16 = vrot.slane %v1172_v59, %v10769_v57  ;;  %v10923_v51 = vpop.f32.mrb[33].mxu1 }
 0x11f   :  { %v3406_v19 = vmax.f32 %v3166_v62, %v3174_v14  ;;  %v3766_v21 = vrot.slane %v3404_v2, %v10774_v0  ;;  %v3770_v22 = vrot.slane %v3405_v4, %v10774_v0  ;;  %v1187_v52 = vcombine.high %v1179_v28, %v1179_v28  ;;  %v10927_v63 = vpop.f32.mrb[34].mxu1 }
 0x120   :  { %v1222_v1 = vcombine.high %v1220_v8, %v1220_v8  ;;  %v9034_v58 = vrot.slane %v1221_v13, 9  ;;  %v9035_v6 = vrot.slane %v1220_v8, 9  ;;  %v3175_v25 = vmax.f32 %v1213_v56, %v9033_v15  ;;  %v10929_v26 = vpop.f32.mrb[35].mxu1 }
 0x121   :  { %v3774_v30 = vrot.slane %v3406_v19, %v10774_v0  ;;  %v4228_v34 = vsel %vm4207_vm6, %v3766_v21, %v3762_v5  ;;  %v1188_v37 = vcombine.high %v1186_v16, %v1186_v16  ;;  %v9025_v40 = vrot.slane %v1179_v28, 9 }
 0x122   :  { %v4229_v14 = vsel %vm4209_vm7, %v3770_v22, %v4228_v34  ;;  %v9036_v11 = vrot.slane %v1222_v1, 9  ;;  %v3176_v39 = vmax.f32 %v1221_v13, %v9034_v58  ;;  %v3177_v32 = vmax.f32 %v1220_v8, %v9035_v6 }
 0x123   :  { %v9026_v43 = vrot.slane %v1187_v52, 9  ;;  %v9027_v48 = vrot.slane %v1186_v16, 9  ;;  %v9028_v49 = vrot.slane %v1188_v37, 9  ;;  %v3167_v50 = vmax.f32 %v1179_v28, %v9025_v40 }
 0x124   :  { %v3178_v54 = vmax.f32 %v1222_v1, %v9036_v11  ;;  %v4230_v55 = vsel %vm4211_vm8, %v3774_v30, %v4229_v14  ;;  %v905_v56 = vmax.f32 %v777_v35, %v841_v31  ;;  %v839_v59 = vmul.f32 0.1, %v775_v24 }
 0x125   :  { %v3168_v62 = vmax.f32 %v1187_v52, %v9026_v43  ;;  %v3169_v2 = vmax.f32 %v1186_v16, %v9027_v48  ;;  %v3170_v4 = vmax.f32 %v1188_v37, %v9028_v49  ;;  %v3407_v5 = vmax.f32 %v3167_v50, %v3175_v25 }
 0x126   :  { %v1257_v15 = vcombine.high %v905_v56, %v905_v56  ;;  %v1264_v19 = vrot.slane %v905_v56, %v10769_v57  ;;  %v903_v21 = vmax.f32 %v775_v24, %v839_v59  ;;  %v778_v13 = vadd.f32 %v10758_v44, %v707_v20 }
 0x127   :  { %v3408_v8 = vmax.f32 %v3168_v62, %v3176_v39  ;;  %v3409_v22 = vmax.f32 %v3169_v2, %v3177_v32  ;;  %v3410_v58 = vmax.f32 %v3170_v4, %v3178_v54  ;;  %v3778_v28 = vrot.slane %v3407_v5, %v10774_v0 }
 0x128   :  { %v1271_v1 = vrot.slane %v1257_v15, %v10769_v57  ;;  %v1272_v6 = vcombine.high %v1264_v19, %v1264_v19  ;;  %v9045_v35 = vrot.slane %v1264_v19, 9  ;;  %v1223_v31 = vcombine.high %v903_v21, %v903_v21 }
 0x129   :  { %v3782_v16 = vrot.slane %v3408_v8, %v10774_v0  ;;  %v3786_v52 = vrot.slane %v3409_v22, %v10774_v0  ;;  %v3790_v25 = vrot.slane %v3410_v58, %v10774_v0  ;;  %v4231_v24 = vsel %vm4213_vm9, %v3778_v28, %v4230_v55 }
 0x12a   :  { %v1273_v30 = vcombine.high %v1271_v1, %v1271_v1  ;;  %v9046_v20 = vrot.slane %v1272_v6, 9  ;;  %v9047_v34 = vrot.slane %v1271_v1, 9  ;;  %v3187_v37 = vmax.f32 %v1264_v19, %v9045_v35 }
 0x12b   :  { %v4232_v40 = vsel %vm4215_vm10, %v3782_v16, %v4231_v24  ;;  %v1230_v14 = vrot.slane %v903_v21, %v10769_v57  ;;  %v1237_v11 = vrot.slane %v1223_v31, %v10769_v57  ;;  %v842_v39 = vmul.f32 0.1, %v778_v13 }
 0x12c   :  { %v4233_v32 = vsel %vm4217_vm11, %v3786_v52, %v4232_v40  ;;  %v9048_v43 = vrot.slane %v1273_v30, 9  ;;  %v3188_v48 = vmax.f32 %v1272_v6, %v9046_v20  ;;  %v3189_v49 = vmax.f32 %v1271_v1, %v9047_v34  ;;  %v10955_v1 = vpop.f32.mrb[36].mxu1 }
 0x12d   :  { %v4234_v50 = vsel %vm4219_vm12, %v3790_v25, %v4233_v32  ;;  %v1238_v54 = vcombine.high %v1230_v14, %v1230_v14  ;;  %v1239_v55 = vcombine.high %v1237_v11, %v1237_v11  ;;  %v9037_v56 = vrot.slane %v1230_v14, 9 }
 0x12e   :  { %4345 = vst.msk [vmem:[#allocation2 + $0x31] sm:$0xff] %vm3515_vm3, %v4234_v50  ;;  %v3190_v59 = vmax.f32 %v1273_v30, %v9048_v43  ;;  %v9039_v62 = vrot.slane %v1237_v11, 9  ;;  %v906_v2 = vmax.f32 %v778_v13, %v842_v39  ;;  %v705_v4 = vmul.f32 %v10753_v42, %v10824_v33  ;;  %v10958_v33 = vpop.f32.mrb[37].mxu1 }
 0x12f   :  { %v9038_v5 = vrot.slane %v1238_v54, 9  ;;  %v9040_v15 = vrot.slane %v1239_v55, 9  ;;  %v3179_v19 = vmax.f32 %v1230_v14, %v9037_v56  ;;  %v710_v21 = vmul.f32 %v10835_v61, %v10753_v42  ;;  %v10961_v24 = vpop.f32.mrb[38].mxu1 }
 0x130   :  { %v3181_v8 = vmax.f32 %v1237_v11, %v9039_v62  ;;  %v1274_v22 = vcombine.high %v906_v2, %v906_v2  ;;  %v1281_v58 = vrot.slane %v906_v2, %v10769_v57  ;;  %v776_v28 = vadd.f32 %v10758_v44, %v705_v4 }
 0x131   :  { %v3180_v6 = vmax.f32 %v1238_v54, %v9038_v5  ;;  %v3182_v35 = vmax.f32 %v1239_v55, %v9040_v15  ;;  %v3411_v13 = vmax.f32 %v3179_v19, %v3187_v37  ;;  %v781_v31 = vadd.f32 %v10758_v44, %v710_v21  ;;  %v10967_v54 = vpop.f32.mrb[39].mxu1 }
 0x132   :  { %v3413_v16 = vmax.f32 %v3181_v8, %v3189_v49  ;;  %v1288_v52 = vrot.slane %v1274_v22, %v10769_v57  ;;  %v1289_v25 = vcombine.high %v1281_v58, %v1281_v58  ;;  %v9049_v61 = vrot.slane %v1281_v58, 9 }
 0x133   :  { %v3412_v30 = vmax.f32 %v3180_v6, %v3188_v48  ;;  %v3414_v20 = vmax.f32 %v3182_v35, %v3190_v59  ;;  %v3794_v34 = vrot.slane %v3411_v13, %v10774_v0  ;;  %v840_v40 = vmul.f32 0.1, %v776_v28 }
 0x134   :  { %v3802_v14 = vrot.slane %v3413_v16, %v10774_v0  ;;  %v1290_v11 = vcombine.high %v1288_v52, %v1288_v52  ;;  %v9050_v37 = vrot.slane %v1289_v25, 9  ;;  %v9051_v39 = vrot.slane %v1288_v52, 9 }
 0x135   :  { %v3798_v32 = vrot.slane %v3412_v30, %v10774_v0  ;;  %v3806_v43 = vrot.slane %v3414_v20, %v10774_v0  ;;  %v3191_v49 = vmax.f32 %v1281_v58, %v9049_v61  ;;  %v904_v50 = vmax.f32 %v776_v28, %v840_v40 }
 0x136   :  { %v9052_v55 = vrot.slane %v1290_v11, 9  ;;  %v3192_v56 = vmax.f32 %v1289_v25, %v9050_v37  ;;  %v3193_v48 = vmax.f32 %v1288_v52, %v9051_v39  ;;  %v845_v59 = vmul.f32 0.1, %v781_v31 }
 0x137   :  { %v4235_v62 = vsel %vm4207_vm6, %v3798_v32, %v3794_v34  ;;  %v1240_v2 = vcombine.high %v904_v50, %v904_v50  ;;  %v1247_v4 = vrot.slane %v904_v50, %v10769_v57  ;;  %v708_v5 = vmul.f32 %v10753_v42, %v10838_v3 }
 0x138   :  { %v4236_v15 = vsel %vm4209_vm7, %v3802_v14, %v4235_v62  ;;  %v3194_v19 = vmax.f32 %v1290_v11, %v9052_v55  ;;  %v909_v21 = vmax.f32 %v781_v31, %v845_v59  ;;  %v711_v8 = vmul.f32 %v10841_v9, %v10753_v42 }
 0x139   :  { %v1254_v22 = vrot.slane %v1240_v2, %v10769_v57  ;;  %v1255_v58 = vcombine.high %v1247_v4, %v1247_v4  ;;  %v9041_v28 = vrot.slane %v1247_v4, 9  ;;  %v4237_v6 = vsel %vm4211_vm8, %v3806_v43, %v4236_v15 }
 0x13a   :  { %v1325_v35 = vcombine.high %v909_v21, %v909_v21  ;;  %v1332_v13 = vrot.slane %v909_v21, %v10769_v57  ;;  %v779_v16 = vadd.f32 %v10758_v44, %v708_v5  ;;  %v782_v3 = vadd.f32 %v10758_v44, %v711_v8  ;;  %v4391_v8 = vld [vmem:[#allocation2 + $0x2] sm:$0xff] }
 0x13b   :  { %v1256_v52 = vcombine.high %v1254_v22, %v1254_v22  ;;  %v9042_v25 = vrot.slane %v1255_v58, 9  ;;  %v9043_v61 = vrot.slane %v1254_v22, 9  ;;  %v3183_v31 = vmax.f32 %v1247_v4, %v9041_v28  ;;  %v10983_v28 = vld [vmem:[#allocation2 + $0x12] sm:$0xff] }
 0x13c   :  { %v1339_v30 = vrot.slane %v1325_v35, %v10769_v57  ;;  %v1340_v9 = vcombine.high %v1332_v13, %v1332_v13  ;;  %v9061_v20 = vrot.slane %v1332_v13, 9  ;;  %v843_v34 = vmul.f32 0.1, %v779_v16 }
 0x13d   :  { %v9044_v40 = vrot.slane %v1256_v52, 9  ;;  %v3184_v14 = vmax.f32 %v1255_v58, %v9042_v25  ;;  %v3185_v11 = vmax.f32 %v1254_v22, %v9043_v61  ;;  %v3415_v37 = vmax.f32 %v3183_v31, %v3191_v49  ;;  %v4375_v25 = vld [vmem:[#allocation2 + $0x1] sm:$0xff]  ;;  %v4376_v61 = vld [vmem:[#allocation2 + $0x11] sm:$0xff] }
 0x13e   :  { %v1341_v39 = vcombine.high %v1339_v30, %v1339_v30  ;;  %v9062_v32 = vrot.slane %v1340_v9, 9  ;;  %v9063_v43 = vrot.slane %v1339_v30, 9  ;;  %v3203_v50 = vmax.f32 %v1332_v13, %v9061_v20 }
 0x13f   :  { %v3186_v55 = vmax.f32 %v1256_v52, %v9044_v40  ;;  %v3416_v59 = vmax.f32 %v3184_v14, %v3192_v56  ;;  %v3417_v62 = vmax.f32 %v3185_v11, %v3193_v48  ;;  %v3810_v2 = vrot.slane %v3415_v37, %v10774_v0 }
 0x140   :  { %v9064_v5 = vrot.slane %v1341_v39, 9  ;;  %v3204_v4 = vmax.f32 %v1340_v9, %v9062_v32  ;;  %v3205_v15 = vmax.f32 %v1339_v30, %v9063_v43  ;;  %v907_v21 = vmax.f32 %v779_v16, %v843_v34 }
 0x141   :  { %v3418_v35 = vmax.f32 %v3186_v55, %v3194_v19  ;;  %v3814_v22 = vrot.slane %v3416_v59, %v10774_v0  ;;  %v3818_v49 = vrot.slane %v3417_v62, %v10774_v0  ;;  %v4238_v58 = vsel %vm4213_vm9, %v3810_v2, %v4237_v6  ;;  %v11000_v55 = vpop.f32.mrb[40].mxu1 }
 0x142   :  { %v3206_v13 = vmax.f32 %v1341_v39, %v9064_v5  ;;  %v1291_v52 = vcombine.high %v907_v21, %v907_v21  ;;  %v1298_v56 = vrot.slane %v907_v21, %v10769_v57  ;;  %v846_v48 = vmul.f32 0.1, %v782_v3  ;;  %v11006_v5 = vpop.f32.mrb[41].mxu1 }
 0x143   :  { %v3822_v31 = vrot.slane %v3418_v35, %v10774_v0  ;;  %v4239_v16 = vsel %vm4215_vm10, %v3814_v22, %v4238_v58  ;;  %v709_v19 = vmul.f32 %v10753_v42, %v10844_v10  ;;  %v9868_v30 = vpack.i.bf16 %v10983_v28, %v4391_v8 }
 0x144   :  { %v4240_v9 = vsel %vm4217_vm11, %v3818_v49, %v4239_v16  ;;  %v1305_v6 = vrot.slane %v1291_v52, %v10769_v57  ;;  %v1306_v20 = vcombine.high %v1298_v56, %v1298_v56  ;;  %v9053_v34 = vrot.slane %v1298_v56, 9  ;;  %v11008_v49 = vpop.f32.mrb[42].mxu1 }
 0x145   :  { %v4241_v40 = vsel %vm4219_vm12, %v3822_v31, %v4240_v9  ;;  %v910_v14 = vmax.f32 %v782_v3, %v846_v48  ;;  %v780_v11 = vadd.f32 %v10758_v44, %v709_v19  ;;  %9869 = vrot.lane.b32.xlu1 %v9868_v30, %s10420_s25  ;;  %v9863_v37 = vpack.i.bf16 %v4376_v61, %v4375_v25  ;;  %v11012_v9 = vpop.f32.mrb[43].mxu1 }
 0x146   :  { %4346 = vst.msk [vmem:[#allocation2 + $0x41] sm:$0xff] %vm3515_vm3, %v4241_v40  ;;  %v1307_v10 = vcombine.high %v1305_v6, %v1305_v6  ;;  %v9054_v39 = vrot.slane %v1306_v20, 9  ;;  %v9055_v32 = vrot.slane %v1305_v6, 9  ;;  %v3195_v43 = vmax.f32 %v1298_v56, %v9053_v34 }
 0x147   :  { %v1342_v59 = vcombine.high %v910_v14, %v910_v14  ;;  %v1349_v62 = vrot.slane %v910_v14, %v10769_v57  ;;  %v844_v2 = vmul.f32 0.1, %v780_v11  ;;  %9864 = vrot.lane.b32.xlu0 %v9863_v37, %s10421_s26  ;;  %v714_v3 = vmul.f32 %v10854_v17, %v10753_v42 }
 0x148   :  { %v9056_v21 = vrot.slane %v1307_v10, 9  ;;  %v3196_v8 = vmax.f32 %v1306_v20, %v9054_v39  ;;  %v3197_v35 = vmax.f32 %v1305_v6, %v9055_v32  ;;  %v3419_v22 = vmax.f32 %v3195_v43, %v3203_v50 }
 0x149   :  { %v1356_v58 = vrot.slane %v1342_v59, %v10769_v57  ;;  %v1357_v52 = vcombine.high %v1349_v62, %v1349_v62  ;;  %v9065_v56 = vrot.slane %v1349_v62, 9  ;;  %v908_v48 = vmax.f32 %v780_v11, %v844_v2 }
 0x14a   :  { %v3198_v25 = vmax.f32 %v1307_v10, %v9056_v21  ;;  %v3420_v61 = vmax.f32 %v3196_v8, %v3204_v4  ;;  %v3421_v31 = vmax.f32 %v3197_v35, %v3205_v15  ;;  %v3826_v16 = vrot.slane %v3419_v22, %v10774_v0 }
 0x14b   :  { %v1358_v19 = vcombine.high %v1356_v58, %v1356_v58  ;;  %v9066_v42 = vrot.slane %v1357_v52, 9  ;;  %v9067_v17 = vrot.slane %v1356_v58, 9  ;;  %v3207_v30 = vmax.f32 %v1349_v62, %v9065_v56 }
 0x14c   :  { %v3422_v6 = vmax.f32 %v3198_v25, %v3206_v13  ;;  %v3830_v50 = vrot.slane %v3420_v61, %v10774_v0  ;;  %v3834_v20 = vrot.slane %v3421_v31, %v10774_v0  ;;  %v1308_v34 = vcombine.high %v908_v48, %v908_v48 }
 0x14d   :  { %v9068_v40 = vrot.slane %v1358_v19, 9  ;;  %v3208_v14 = vmax.f32 %v1357_v52, %v9066_v42  ;;  %v3209_v11 = vmax.f32 %v1356_v58, %v9067_v17  ;;  %v1315_v4 = vrot.slane %v908_v48, %v10769_v57  ;;  %v11026_v58 = vld [vmem:[%s12980_s2] ss:$0 sm:$0xff] }
 0x14e   :  { %v3838_v15 = vrot.slane %v3422_v6, %v10774_v0  ;;  %v4242_v37 = vsel %vm4207_vm6, %v3830_v50, %v3826_v16  ;;  %v1322_v10 = vrot.slane %v1308_v34, %v10769_v57  ;;  %v785_v39 = vadd.f32 %v10758_v44, %v714_v3  ;;  %v11037_v16 = vld [vmem:[%s12981_s3] ss:$0 sm:$0xff] }
 0x14f   :  { %v4243_v13 = vsel %vm4209_vm7, %v3834_v20, %v4242_v37  ;;  %v3210_v32 = vmax.f32 %v1358_v19, %v9068_v40  ;;  %v1323_v43 = vcombine.high %v1315_v4, %v1315_v4  ;;  %v9057_v59 = vrot.slane %v1315_v4, 9 }
 0x150   :  { %v1324_v62 = vcombine.high %v1322_v10, %v1322_v10  ;;  %v9059_v2 = vrot.slane %v1322_v10, 9  ;;  %v4244_v21 = vsel %vm4211_vm8, %v3838_v15, %v4243_v13  ;;  %v849_v8 = vmul.f32 0.1, %v785_v39 }
 0x151   :  { %v9058_v35 = vrot.slane %v1323_v43, 9  ;;  %v3199_v22 = vmax.f32 %v1315_v4, %v9057_v59  ;;  %v712_v44 = vmul.f32 %v11026_v58, %v10859_v46  ;;  %v715_v3 = vmul.f32 %v11026_v58, %v10863_v53 }
 0x152   :  { %v9060_v52 = vrot.slane %v1324_v62, 9  ;;  %v3201_v56 = vmax.f32 %v1322_v10, %v9059_v2  ;;  %v913_v48 = vmax.f32 %v785_v39, %v849_v8  ;;  %v713_v25 = vmul.f32 %v11026_v58, %v10867_v60 }
 0x153   :  { %v3200_v61 = vmax.f32 %v1323_v43, %v9058_v35  ;;  %v3423_v31 = vmax.f32 %v3199_v22, %v3207_v30  ;;  %v783_v19 = vadd.f32 %v11037_v16, %v712_v44  ;;  %v786_v46 = vadd.f32 %v11037_v16, %v715_v3  ;;  %v11050_v35 = vld [vmem:[#allocation2 + $0x22] sm:$0xff] }
 0x154   :  { %v3202_v42 = vmax.f32 %v1324_v62, %v9060_v52  ;;  %v3425_v17 = vmax.f32 %v3201_v56, %v3209_v11  ;;  %v1393_v53 = vcombine.high %v913_v48, %v913_v48  ;;  %v1400_v6 = vrot.slane %v913_v48, %v10769_v57 }
 0x155   :  { %v3424_v50 = vmax.f32 %v3200_v61, %v3208_v14  ;;  %v3842_v20 = vrot.slane %v3423_v31, %v10774_v0  ;;  %v847_v60 = vmul.f32 0.1, %v783_v19  ;;  %v850_v34 = vmul.f32 0.1, %v786_v46  ;;  %v11055_v31 = vld [vmem:[#allocation2 + $0x20] sm:$0xff] }
 0x156   :  { %v3426_v30 = vmax.f32 %v3202_v42, %v3210_v32  ;;  %v3850_v40 = vrot.slane %v3425_v17, %v10774_v0  ;;  %v1407_v4 = vrot.slane %v1393_v53, %v10769_v57  ;;  %v1408_v15 = vcombine.high %v1400_v6, %v1400_v6 }
 0x157   :  { %v3846_v37 = vrot.slane %v3424_v50, %v10774_v0  ;;  %v4245_v10 = vsel %vm4213_vm9, %v3842_v20, %v4244_v21  ;;  %v9077_v39 = vrot.slane %v1400_v6, 9  ;;  %v911_v11 = vmax.f32 %v783_v19, %v847_v60 }
 0x158   :  { %v3854_v13 = vrot.slane %v3426_v30, %v10774_v0  ;;  %v1409_v43 = vcombine.high %v1407_v4, %v1407_v4  ;;  %v9078_v14 = vrot.slane %v1408_v15, 9  ;;  %v9079_v59 = vrot.slane %v1407_v4, 9  ;;  %v4407_v30 = vld [vmem:[#allocation2 + $0x10] sm:$0xff] }
 0x159   :  { %v4246_v62 = vsel %vm4215_vm10, %v3846_v37, %v4245_v10  ;;  %v3219_v2 = vmax.f32 %v1400_v6, %v9077_v39  ;;  %v1359_v32 = vcombine.high %v911_v11, %v911_v11  ;;  %v1366_v8 = vrot.slane %v911_v11, %v10769_v57 }
 0x15a   :  { %v4247_v22 = vsel %vm4217_vm11, %v3850_v40, %v4246_v62  ;;  %v9080_v44 = vrot.slane %v1409_v43, 9  ;;  %v3220_v3 = vmax.f32 %v1408_v15, %v9078_v14  ;;  %v3221_v21 = vmax.f32 %v1407_v4, %v9079_v59  ;;  %v11061_v40 = vpop.f32.mrb[44].mxu1 }
 0x15b   :  { %v4248_v52 = vsel %vm4219_vm12, %v3854_v13, %v4247_v22  ;;  %v1373_v56 = vrot.slane %v1359_v32, %v10769_v57  ;;  %v1374_v48 = vcombine.high %v1366_v8, %v1366_v8  ;;  %v9069_v61 = vrot.slane %v1366_v8, 9 }
 0x15c   :  { %4347 = vst.msk [vmem:[#allocation2 + $0x51] sm:$0xff] %vm3515_vm3, %v4248_v52  ;;  %v3222_v19 = vmax.f32 %v1409_v43, %v9080_v44  ;;  %v914_v42 = vmax.f32 %v786_v46, %v850_v34  ;;  %v784_v17 = vadd.f32 %v11037_v16, %v713_v25  ;;  %v9873_v53 = vpack.i.bf16 %v11050_v35, %v10983_v28  ;;  %v11066_v34 = vpop.f32.mrb[45].mxu1 }
 0x15d   :  { %v1375_v6 = vcombine.high %v1373_v56, %v1373_v56  ;;  %v9070_v50 = vrot.slane %v1374_v48, 9  ;;  %v9071_v20 = vrot.slane %v1373_v56, 9  ;;  %v3211_v60 = vmax.f32 %v1366_v8, %v9069_v61  ;;  %v11068_v11 = vpop.f32.mrb[46].mxu1 }
 0x15e   :  { %v1410_v4 = vcombine.high %v914_v42, %v914_v42  ;;  %v1417_v15 = vrot.slane %v914_v42, %v10769_v57  ;;  %v848_v37 = vmul.f32 0.1, %v784_v17  ;;  %9874 = vrot.lane.b32.xlu0 %v9873_v53, %s10421_s26  ;;  %v9878_v46 = vpack.i.bf16 %v11055_v31, %v4407_v30 }
 0x15f   :  { %v9072_v25 = vrot.slane %v1375_v6, 9  ;;  %v3212_v10 = vmax.f32 %v1374_v48, %v9070_v50  ;;  %v3213_v28 = vmax.f32 %v1373_v56, %v9071_v20  ;;  %v3427_v39 = vmax.f32 %v3211_v60, %v3219_v2 }
 0x160   :  { %v1424_v13 = vrot.slane %v1410_v4, %v10769_v57  ;;  %v1425_v43 = vcombine.high %v1417_v15, %v1417_v15  ;;  %v9081_v14 = vrot.slane %v1417_v15, 9  ;;  %v912_v59 = vmax.f32 %v784_v17, %v848_v37  ;;  %9879 = vrot.lane.b32.xlu1 %v9878_v46, %s10422_s30 }
 0x161   :  { %v3214_v62 = vmax.f32 %v1375_v6, %v9072_v25  ;;  %v3428_v32 = vmax.f32 %v3212_v10, %v3220_v3  ;;  %v3429_v8 = vmax.f32 %v3213_v28, %v3221_v21  ;;  %v3858_v22 = vrot.slane %v3427_v39, %v10774_v0  ;;  %v11076_v6 = vpop.f32.mrb[47].mxu1 }
 0x162   :  { %v1426_v44 = vcombine.high %v1424_v13, %v1424_v13  ;;  %v9082_v52 = vrot.slane %v1425_v43, 9  ;;  %v9083_v48 = vrot.slane %v1424_v13, 9  ;;  %v3223_v56 = vmax.f32 %v1417_v15, %v9081_v14 }
 0x163   :  { %v3430_v2 = vmax.f32 %v3214_v62, %v3222_v19  ;;  %v3862_v61 = vrot.slane %v3428_v32, %v10774_v0  ;;  %v3866_v42 = vrot.slane %v3429_v8, %v10774_v0  ;;  %v1376_v53 = vcombine.high %v912_v59, %v912_v59 }
 0x164   :  { %v9084_v50 = vrot.slane %v1426_v44, 9  ;;  %v3224_v17 = vmax.f32 %v1425_v43, %v9082_v52  ;;  %v3225_v20 = vmax.f32 %v1424_v13, %v9083_v48  ;;  %v1383_v60 = vrot.slane %v912_v59, %v10769_v57 }
 0x165   :  { %v3870_v3 = vrot.slane %v3430_v2, %v10774_v0  ;;  %v4249_v21 = vsel %vm4207_vm6, %v3862_v61, %v3858_v22  ;;  %v1390_v30 = vrot.slane %v1376_v53, %v10769_v57  ;;  %v718_v19 = vmul.f32 %v11026_v58, %v10874_v27 }
 0x166   :  { %v4250_v4 = vsel %vm4209_vm7, %v3866_v42, %v4249_v21  ;;  %v3226_v15 = vmax.f32 %v1426_v44, %v9084_v50  ;;  %v1391_v37 = vcombine.high %v1383_v60, %v1383_v60  ;;  %v9073_v46 = vrot.slane %v1383_v60, 9 }
 0x167   :  { %v1392_v25 = vcombine.high %v1390_v30, %v1390_v30  ;;  %v9075_v10 = vrot.slane %v1390_v30, 9  ;;  %v4251_v28 = vsel %vm4211_vm8, %v3870_v3, %v4250_v4  ;;  %v789_v39 = vadd.f32 %v11037_v16, %v718_v19 }
 0x168   :  { %v9074_v13 = vrot.slane %v1391_v37, 9  ;;  %v3215_v43 = vmax.f32 %v1383_v60, %v9073_v46  ;;  %v716_v14 = vmul.f32 %v11026_v58, %v10876_v12  ;;  %v719_v59 = vmul.f32 %v11026_v58, %v10879_v41 }
 0x169   :  { %v9076_v27 = vrot.slane %v1392_v25, 9  ;;  %v3217_v62 = vmax.f32 %v1390_v30, %v9075_v10  ;;  %v853_v32 = vmul.f32 0.1, %v789_v39  ;;  %v717_v8 = vmul.f32 %v11026_v58, %v10882_v45 }
 0x16a   :  { %v3216_v22 = vmax.f32 %v1391_v37, %v9074_v13  ;;  %v3431_v44 = vmax.f32 %v3215_v43, %v3223_v56  ;;  %v787_v52 = vadd.f32 %v11037_v16, %v716_v14  ;;  %v790_v48 = vadd.f32 %v11037_v16, %v719_v59 }
 0x16b   :  { %v3218_v2 = vmax.f32 %v1392_v25, %v9076_v27  ;;  %v3433_v61 = vmax.f32 %v3217_v62, %v3225_v20  ;;  %v917_v42 = vmax.f32 %v789_v39, %v853_v32  ;;  %v11095_v12 = vadd.f32 %v11037_v16, %v717_v8 }
 0x16c   :  { %v3432_v53 = vmax.f32 %v3216_v22, %v3224_v17  ;;  %v3874_v41 = vrot.slane %v3431_v44, %v10774_v0  ;;  %v851_v50 = vmul.f32 0.1, %v787_v52  ;;  %v854_v60 = vmul.f32 0.1, %v790_v48 }
 0x16d   :  { %v3434_v3 = vmax.f32 %v3218_v2, %v3226_v15  ;;  %v3882_v45 = vrot.slane %v3433_v61, %v10774_v0  ;;  %v1461_v21 = vcombine.high %v917_v42, %v917_v42  ;;  %v1468_v56 = vrot.slane %v917_v42, %v10769_v57 }
 0x16e   :  { %v3878_v30 = vrot.slane %v3432_v53, %v10774_v0  ;;  %v4252_v19 = vsel %vm4213_vm9, %v3874_v41, %v4251_v28  ;;  %v915_v20 = vmax.f32 %v787_v52, %v851_v50  ;;  %v918_v4 = vmax.f32 %v790_v48, %v854_v60 }
 0x16f   :  { %v3886_v37 = vrot.slane %v3434_v3, %v10774_v0  ;;  %v1475_v17 = vrot.slane %v1461_v21, %v10769_v57  ;;  %v1476_v46 = vcombine.high %v1468_v56, %v1468_v56  ;;  %v9093_v25 = vrot.slane %v1468_v56, 9 }
 0x170   :  { %v4253_v10 = vsel %vm4215_vm10, %v3878_v30, %v4252_v19  ;;  %v1427_v15 = vcombine.high %v915_v20, %v915_v20  ;;  %v1434_v39 = vrot.slane %v915_v20, %v10769_v57  ;;  %v1478_v13 = vcombine.high %v918_v4, %v918_v4  ;;  %v11113_v19 = vpop.f32.mrb[48].mxu1 }
 0x171   :  { %v4254_v43 = vsel %vm4217_vm11, %v3882_v45, %v4253_v10  ;;  %v1477_v14 = vcombine.high %v1475_v17, %v1475_v17  ;;  %v9094_v59 = vrot.slane %v1476_v46, 9  ;;  %v9095_v27 = vrot.slane %v1475_v17, 9 }
 0x172   :  { %v4255_v28 = vsel %vm4219_vm12, %v3886_v37, %v4254_v43  ;;  %v3235_v62 = vmax.f32 %v1468_v56, %v9093_v25  ;;  %v1441_v32 = vrot.slane %v1427_v15, %v10769_v57  ;;  %v1442_v8 = vcombine.high %v1434_v39, %v1434_v39  ;;  %v11115_v25 = vpop.f32.mrb[49].mxu1  ;;  %v4473_v43 = vld [vmem:[#allocation2 + $0x31] sm:$0xff] }
 0x173   :  { %4348 = vst.msk [vmem:[#allocation2 + $0x61] sm:$0xff] %vm3515_vm3, %v4255_v28  ;;  %v9096_v22 = vrot.slane %v1477_v14, 9  ;;  %v3236_v44 = vmax.f32 %v1476_v46, %v9094_v59  ;;  %v3237_v52 = vmax.f32 %v1475_v17, %v9095_v27  ;;  %v9085_v48 = vrot.slane %v1434_v39, 9 }
 0x174   :  { %v1443_v2 = vcombine.high %v1441_v32, %v1441_v32  ;;  %v9086_v61 = vrot.slane %v1442_v8, 9  ;;  %v9087_v42 = vrot.slane %v1441_v32, 9  ;;  %v1485_v53 = vrot.slane %v918_v4, %v10769_v57 }
 0x175   :  { %v3238_v41 = vmax.f32 %v1477_v14, %v9096_v22  ;;  %v3227_v50 = vmax.f32 %v1434_v39, %v9085_v48  ;;  %v1492_v60 = vrot.slane %v1478_v13, %v10769_v57  ;;  %v852_v3 = vmul.f32 0.1, %v11095_v12  ;;  %v11117_v13 = vld [vmem:[#allocation2 + $0x30] sm:$0xff]  ;;  %v11119_v14 = vpop.f32.mrb[50].mxu1 }
 0x176   :  { %v9088_v45 = vrot.slane %v1443_v2, 9  ;;  %v3228_v21 = vmax.f32 %v1442_v8, %v9086_v61  ;;  %v3229_v56 = vmax.f32 %v1441_v32, %v9087_v42  ;;  %v1493_v30 = vcombine.high %v1485_v53, %v1485_v53 }
 0x177   :  { %v3435_v20 = vmax.f32 %v3227_v50, %v3235_v62  ;;  %v1494_v37 = vcombine.high %v1492_v60, %v1492_v60  ;;  %v9097_v17 = vrot.slane %v1485_v53, 9  ;;  %v9099_v46 = vrot.slane %v1492_v60, 9  ;;  %v11127_v50 = vpop.f32.mrb[51].mxu1 }
 0x178   :  { %v3230_v10 = vmax.f32 %v1443_v2, %v9088_v45  ;;  %v3436_v4 = vmax.f32 %v3228_v21, %v3236_v44  ;;  %v3437_v15 = vmax.f32 %v3229_v56, %v3237_v52  ;;  %v9098_v39 = vrot.slane %v1493_v30, 9  ;;  %v4472_v2 = vld [vmem:[#allocation2 + $0x21] sm:$0xff] }
 0x179   :  { %v3890_v59 = vrot.slane %v3435_v20, %v10774_v0  ;;  %v9100_v27 = vrot.slane %v1494_v37, 9  ;;  %v3239_v28 = vmax.f32 %v1485_v53, %v9097_v17  ;;  %v3241_v32 = vmax.f32 %v1492_v60, %v9099_v46 }
 0x17a   :  { %v3438_v62 = vmax.f32 %v3230_v10, %v3238_v41  ;;  %v3894_v8 = vrot.slane %v3436_v4, %v10774_v0  ;;  %v3898_v22 = vrot.slane %v3437_v15, %v10774_v0  ;;  %v3240_v48 = vmax.f32 %v1493_v30, %v9098_v39 }
 0x17b   :  { %v3242_v44 = vmax.f32 %v1494_v37, %v9100_v27  ;;  %v916_v52 = vmax.f32 %v11095_v12, %v852_v3  ;;  %v9888_v61 = vpack.i.bf16 %v4473_v43, %v4472_v2  ;;  %v9883_v42 = vpack.i.bf16 %v11117_v13, %v11055_v31  ;;  %v11139_v31 = vld [vmem:[#allocation2 + $0x32] sm:$0xff] }
 0x17c   :  { %v3902_v45 = vrot.slane %v3438_v62, %v10774_v0  ;;  %v4256_v53 = vsel %vm4207_vm6, %v3894_v8, %v3890_v59  ;;  %v722_v41 = vmul.f32 %v11026_v58, %v10895_v18  ;;  %v720_v60 = vmul.f32 %v11026_v58, %v10902_v23 }
 0x17d   :  { %v4257_v21 = vsel %vm4209_vm7, %v3898_v22, %v4256_v53  ;;  %v1444_v56 = vcombine.high %v916_v52, %v916_v52  ;;  %v1451_v12 = vrot.slane %v916_v52, %v10769_v57  ;;  %9889 = vrot.lane.b32.xlu0 %v9888_v61, %s10422_s30  ;;  %9884 = vrot.lane.b32.xlu1 %v9883_v42, %s10420_s25 }
 0x17e   :  { %v4258_v3 = vsel %vm4211_vm8, %v3902_v45, %v4257_v21  ;;  %v793_v30 = vadd.f32 %v11037_v16, %v722_v41  ;;  %v791_v18 = vadd.f32 %v11037_v16, %v720_v60  ;;  %v723_v23 = vmul.f32 %v11026_v58, %v10908_v29 }
 0x17f   :  { %v1458_v20 = vrot.slane %v1444_v56, %v10769_v57  ;;  %v1459_v37 = vcombine.high %v1451_v12, %v1451_v12  ;;  %v9089_v17 = vrot.slane %v1451_v12, 9  ;;  %v721_v46 = vmul.f32 %v11026_v58, %v10913_v36 }
 0x180   :  { %v857_v10 = vmul.f32 0.1, %v793_v30  ;;  %v855_v4 = vmul.f32 0.1, %v791_v18  ;;  %v794_v15 = vadd.f32 %v11037_v16, %v723_v23  ;;  %v9898_v39 = vpack.i.bf16 %v11139_v31, %v11050_v35 }
 0x181   :  { %v1460_v43 = vcombine.high %v1458_v20, %v1458_v20  ;;  %v9090_v59 = vrot.slane %v1459_v37, 9  ;;  %v9091_v27 = vrot.slane %v1458_v20, 9  ;;  %v3231_v62 = vmax.f32 %v1451_v12, %v9089_v17  ;;  %9894 = vrot.lane.b32.xlu1 %v9888_v61, %s10421_s26 }
 0x182   :  { %v921_v29 = vmax.f32 %v793_v30, %v857_v10  ;;  %v919_v8 = vmax.f32 %v791_v18, %v855_v4  ;;  %v858_v22 = vmul.f32 0.1, %v794_v15  ;;  %v792_v2 = vadd.f32 %v11037_v16, %v721_v46 }
 0x183   :  { %v9092_v52 = vrot.slane %v1460_v43, 9  ;;  %v3232_v36 = vmax.f32 %v1459_v37, %v9090_v59  ;;  %v3233_v42 = vmax.f32 %v1458_v20, %v9091_v27  ;;  %v3439_v45 = vmax.f32 %v3231_v62, %v3239_v28 }
 0x184   :  { %v1529_v53 = vcombine.high %v921_v29, %v921_v29  ;;  %v1536_v41 = vrot.slane %v921_v29, %v10769_v57  ;;  %v1495_v60 = vcombine.high %v919_v8, %v919_v8  ;;  %v1502_v35 = vrot.slane %v919_v8, %v10769_v57 }
 0x185   :  { %v3234_v21 = vmax.f32 %v1460_v43, %v9092_v52  ;;  %v3440_v56 = vmax.f32 %v3232_v36, %v3240_v48  ;;  %v3441_v12 = vmax.f32 %v3233_v42, %v3241_v32  ;;  %v3906_v61 = vrot.slane %v3439_v45, %v10774_v0  ;;  %9899 = vrot.lane.b32.xlu1 %v9898_v39, %s10420_s25  ;;  %v11166_v52 = vld [vmem:[#allocation2 + $0x42] sm:$0xff] }
 0x186   :  { %v1543_v30 = vrot.slane %v1529_v53, %v10769_v57  ;;  %v1544_v18 = vcombine.high %v1536_v41, %v1536_v41  ;;  %v9109_v23 = vrot.slane %v1536_v41, 9  ;;  %v1509_v20 = vrot.slane %v1495_v60, %v10769_v57  ;;  %v11169_v53 = vpop.f32.mrb[52].mxu1 }
 0x187   :  { %v3442_v28 = vmax.f32 %v3234_v21, %v3242_v44  ;;  %v3910_v37 = vrot.slane %v3440_v56, %v10774_v0  ;;  %v3914_v17 = vrot.slane %v3441_v12, %v10774_v0  ;;  %v4259_v46 = vsel %vm4213_vm9, %v3906_v61, %v4258_v3  ;;  %v11172_v12 = vpop.f32.mrb[53].mxu1 }
 0x188   :  { %v1545_v10 = vcombine.high %v1543_v30, %v1543_v30  ;;  %v9110_v48 = vrot.slane %v1544_v18, 9  ;;  %v9111_v32 = vrot.slane %v1543_v30, 9  ;;  %v3251_v4 = vmax.f32 %v1536_v41, %v9109_v23 }
 0x189   :  { %v3918_v43 = vrot.slane %v3442_v28, %v10774_v0  ;;  %v4260_v39 = vsel %vm4215_vm10, %v3910_v37, %v4259_v46  ;;  %v1510_v59 = vcombine.high %v1502_v35, %v1502_v35  ;;  %v1511_v27 = vcombine.high %v1509_v20, %v1509_v20  ;;  %v11176_v28 = vpop.f32.mrb[54].mxu1 }
 0x18a   :  { %v4261_v62 = vsel %vm4217_vm11, %v3914_v17, %v4260_v39  ;;  %v9112_v29 = vrot.slane %v1545_v10, 9  ;;  %v3252_v44 = vmax.f32 %v1544_v18, %v9110_v48  ;;  %v3253_v8 = vmax.f32 %v1543_v30, %v9111_v32 }
 0x18b   :  { %v4262_v36 = vsel %vm4219_vm12, %v3918_v43, %v4261_v62  ;;  %v9101_v3 = vrot.slane %v1502_v35, 9  ;;  %v9102_v42 = vrot.slane %v1510_v59, 9  ;;  %v9103_v45 = vrot.slane %v1509_v20, 9 }
 0x18c   :  { %4349 = vst.msk [vmem:[#allocation2 + $0x71] sm:$0xff] %vm3515_vm3, %v4262_v36  ;;  %v3254_v41 = vmax.f32 %v1545_v10, %v9112_v29  ;;  %v9104_v60 = vrot.slane %v1511_v27, 9  ;;  %v922_v21 = vmax.f32 %v794_v15, %v858_v22  ;;  %v856_v56 = vmul.f32 0.1, %v792_v2 }
 0x18d   :  { %v3243_v61 = vmax.f32 %v1502_v35, %v9101_v3  ;;  %v3244_v18 = vmax.f32 %v1510_v59, %v9102_v42  ;;  %v3245_v30 = vmax.f32 %v1509_v20, %v9103_v45  ;;  %v9903_v23 = vpack.i.bf16 %v11166_v52, %v11139_v31 }
 0x18e   :  { %v3246_v37 = vmax.f32 %v1511_v27, %v9104_v60  ;;  %v1546_v17 = vcombine.high %v922_v21, %v922_v21  ;;  %v1553_v46 = vrot.slane %v922_v21, %v10769_v57  ;;  %v920_v48 = vmax.f32 %v792_v2, %v856_v56 }
 0x18f   :  { %v3443_v32 = vmax.f32 %v3243_v61, %v3251_v4  ;;  %v3444_v10 = vmax.f32 %v3244_v18, %v3252_v44  ;;  %v3445_v43 = vmax.f32 %v3245_v30, %v3253_v8  ;;  %9904 = vrot.lane.b32.xlu0 %v9903_v23, %s10421_s26  ;;  %v726_v15 = vmul.f32 %v11026_v58, %v10919_v7  ;;  %v11187_v8 = vpop.f32.mrb[55].mxu1  ;;  %v11193_v23 = vld [vmem:[#allocation2 + $0x40] sm:$0xff] }
 0x190   :  { %v3446_v22 = vmax.f32 %v3246_v37, %v3254_v41  ;;  %v1560_v35 = vrot.slane %v1546_v17, %v10769_v57  ;;  %v1561_v20 = vcombine.high %v1553_v46, %v1553_v46  ;;  %v9113_v31 = vrot.slane %v1553_v46, 9 }
 0x191   :  { %v3922_v39 = vrot.slane %v3443_v32, %v10774_v0  ;;  %v3926_v59 = vrot.slane %v3444_v10, %v10774_v0  ;;  %v3930_v27 = vrot.slane %v3445_v43, %v10774_v0  ;;  %v1512_v2 = vcombine.high %v920_v48, %v920_v48 }
 0x192   :  { %v3934_v4 = vrot.slane %v3446_v22, %v10774_v0  ;;  %v1562_v62 = vcombine.high %v1560_v35, %v1560_v35  ;;  %v9114_v29 = vrot.slane %v1561_v20, 9  ;;  %v9115_v44 = vrot.slane %v1560_v35, 9 }
 0x193   :  { %v4263_v7 = vsel %vm4207_vm6, %v3926_v59, %v3922_v39  ;;  %v3255_v36 = vmax.f32 %v1553_v46, %v9113_v31  ;;  %v1519_v3 = vrot.slane %v920_v48, %v10769_v57  ;;  %v1526_v42 = vrot.slane %v1512_v2, %v10769_v57 }
 0x194   :  { %v4264_v45 = vsel %vm4209_vm7, %v3930_v27, %v4263_v7  ;;  %v9116_v41 = vrot.slane %v1562_v62, 9  ;;  %v3256_v60 = vmax.f32 %v1561_v20, %v9114_v29  ;;  %v3257_v21 = vmax.f32 %v1560_v35, %v9115_v44 }
 0x195   :  { %v1527_v56 = vcombine.high %v1519_v3, %v1519_v3  ;;  %v1528_v61 = vcombine.high %v1526_v42, %v1526_v42  ;;  %v9105_v18 = vrot.slane %v1519_v3, 9  ;;  %v9107_v30 = vrot.slane %v1526_v42, 9 }
 0x196   :  { %v3258_v37 = vmax.f32 %v1562_v62, %v9116_v41  ;;  %v4265_v17 = vsel %vm4211_vm8, %v3934_v4, %v4264_v45  ;;  %v797_v46 = vadd.f32 %v11037_v16, %v726_v15  ;;  %v724_v48 = vmul.f32 %v11026_v58, %v10923_v51  ;;  %v10137_v51 = vld [vmem:[%s12982_s4 + $0x40] sm:$0xff]  }
 0x197   :  { %v9106_v32 = vrot.slane %v1527_v56, 9  ;;  %v9108_v10 = vrot.slane %v1528_v61, 9  ;;  %v3247_v43 = vmax.f32 %v1519_v3, %v9105_v18  ;;  %v3249_v22 = vmax.f32 %v1526_v42, %v9107_v30  ;;  %9604 = vmatprep.subr.bf16.mxu1 %v10137_v51  ;;  %v10138_v3 = vld [vmem:[%s12982_s4] sm:$0xff]  }
 0x198   :  { %v861_v20 = vmul.f32 0.1, %v797_v46  ;;  %v795_v35 = vadd.f32 %v11037_v16, %v724_v48  ;;  %v727_v31 = vmul.f32 %v11026_v58, %v10927_v63  ;;  %v9908_v39 = vpack.i.bf16 %v11193_v23, %v11117_v13  ;;  %9605 = vmatpush3.bf16.msra.mxu1 %v10138_v3 }
 0x199   :  { %v3248_v59 = vmax.f32 %v1527_v56, %v9106_v32  ;;  %v3250_v27 = vmax.f32 %v1528_v61, %v9108_v10  ;;  %v3447_v2 = vmax.f32 %v3247_v43, %v3255_v36  ;;  %v3449_v15 = vmax.f32 %v3249_v22, %v3257_v21 }
 0x19a   :  { %v925_v4 = vmax.f32 %v797_v46, %v861_v20  ;;  %v859_v62 = vmul.f32 0.1, %v795_v35  ;;  %v798_v29 = vadd.f32 %v11037_v16, %v727_v31  ;;  %9909 = vrot.lane.b32.xlu1 %v9908_v39, %s10422_s30  ;;  %v725_v63 = vmul.f32 %v11026_v58, %v10929_v26 }
 0x19b   :  { %v3448_v44 = vmax.f32 %v3248_v59, %v3256_v60  ;;  %v3450_v7 = vmax.f32 %v3250_v27, %v3258_v37  ;;  %v3938_v13 = vrot.slane %v3447_v2, %v10774_v0  ;;  %v3946_v36 = vrot.slane %v3449_v15, %v10774_v0 }
 0x19c   :  { %v1597_v42 = vcombine.high %v925_v4, %v925_v4  ;;  %v1604_v45 = vrot.slane %v925_v4, %v10769_v57  ;;  %v923_v41 = vmax.f32 %v795_v35, %v859_v62  ;;  %v862_v21 = vmul.f32 0.1, %v798_v29 }
 0x19d   :  { %v3942_v56 = vrot.slane %v3448_v44, %v10774_v0  ;;  %v3950_v26 = vrot.slane %v3450_v7, %v10774_v0  ;;  %v4266_v60 = vsel %vm4213_vm9, %v3938_v13, %v4265_v17  ;;  %v796_v61 = vadd.f32 %v11037_v16, %v725_v63  ;;  %v11228_v7 = vpop.f32.mrb[56].mxu1 }
 0x19e   :  { %v1611_v18 = vrot.slane %v1597_v42, %v10769_v57  ;;  %v1612_v30 = vcombine.high %v1604_v45, %v1604_v45  ;;  %v9125_v37 = vrot.slane %v1604_v45, 9  ;;  %v1563_v46 = vcombine.high %v923_v41, %v923_v41 }
 0x19f   :  { %v4267_v48 = vsel %vm4215_vm10, %v3942_v56, %v4266_v60  ;;  %v1570_v32 = vrot.slane %v923_v41, %v10769_v57  ;;  %v926_v10 = vmax.f32 %v798_v29, %v862_v21  ;;  %v860_v43 = vmul.f32 0.1, %v796_v61 }
 0x1a0   :  { %v4268_v22 = vsel %vm4217_vm11, %v3946_v36, %v4267_v48  ;;  %v1613_v20 = vcombine.high %v1611_v18, %v1611_v18  ;;  %v9126_v35 = vrot.slane %v1612_v30, 9  ;;  %v9127_v31 = vrot.slane %v1611_v18, 9  ;;  %v11236_v48 = vld [vmem:[#allocation2 + $0x50] sm:$0xff] }
 0x1a1   :  { %v4269_v17 = vsel %vm4219_vm12, %v3950_v26, %v4268_v22  ;;  %v3267_v39 = vmax.f32 %v1604_v45, %v9125_v37  ;;  %v1577_v59 = vrot.slane %v1563_v46, %v10769_v57  ;;  %v1578_v27 = vcombine.high %v1570_v32, %v1570_v32  ;;  %v11231_v45 = vpop.f32.mrb[57].mxu1 }
 0x1a2   :  { %4350 = vst.msk [vmem:[#allocation2 + $0x81] sm:$0xff] %vm3515_vm3, %v4269_v17  ;;  %v9128_v2 = vrot.slane %v1613_v20, 9  ;;  %v3268_v15 = vmax.f32 %v1612_v30, %v9126_v35  ;;  %v3269_v51 = vmax.f32 %v1611_v18, %v9127_v31  ;;  %v9117_v4 = vrot.slane %v1570_v32, 9  ;;  %v11234_v60 = vpop.f32.mrb[58].mxu1 }
 0x1a3   :  { %v1579_v62 = vcombine.high %v1577_v59, %v1577_v59  ;;  %v9118_v29 = vrot.slane %v1578_v27, 9  ;;  %v9119_v63 = vrot.slane %v1577_v59, 9  ;;  %v1614_v44 = vcombine.high %v926_v10, %v926_v10 }
 0x1a4   :  { %v3270_v13 = vmax.f32 %v1613_v20, %v9128_v2  ;;  %v3259_v36 = vmax.f32 %v1570_v32, %v9117_v4  ;;  %v1621_v3 = vrot.slane %v926_v10, %v10769_v57  ;;  %v924_v42 = vmax.f32 %v796_v61, %v860_v43 }
 0x1a5   :  { %v9120_v41 = vrot.slane %v1579_v62, 9  ;;  %v3260_v21 = vmax.f32 %v1578_v27, %v9118_v29  ;;  %v3261_v56 = vmax.f32 %v1577_v59, %v9119_v63  ;;  %v1628_v26 = vrot.slane %v1614_v44, %v10769_v57 }
 0x1a6   :  { %v3451_v18 = vmax.f32 %v3259_v36, %v3267_v39  ;;  %v1629_v30 = vcombine.high %v1621_v3, %v1621_v3  ;;  %v9129_v37 = vrot.slane %v1621_v3, 9  ;;  %v1580_v46 = vcombine.high %v924_v42, %v924_v42  ;;  %v11247_v36 = vpop.f32.mrb[59].mxu1 }
 0x1a7   :  { %v3262_v22 = vmax.f32 %v1579_v62, %v9120_v41  ;;  %v3452_v32 = vmax.f32 %v3260_v21, %v3268_v15  ;;  %v3453_v20 = vmax.f32 %v3261_v56, %v3269_v51  ;;  %v1630_v10 = vcombine.high %v1628_v26, %v1628_v26  ;;  %v4380_v15 = vld [vmem:[#allocation2 + $0x51] sm:$0xff] }
 0x1a8   :  { %v3954_v61 = vrot.slane %v3451_v18, %v10774_v0  ;;  %v9130_v43 = vrot.slane %v1629_v30, 9  ;;  %v9131_v35 = vrot.slane %v1628_v26, 9  ;;  %v3271_v31 = vmax.f32 %v1621_v3, %v9129_v37 }
 0x1a9   :  { %v3454_v17 = vmax.f32 %v3262_v22, %v3270_v13  ;;  %v3958_v59 = vrot.slane %v3452_v32, %v10774_v0  ;;  %v3962_v27 = vrot.slane %v3453_v20, %v10774_v0  ;;  %v9132_v39 = vrot.slane %v1630_v10, 9 }
 0x1aa   :  { %v3272_v2 = vmax.f32 %v1629_v30, %v9130_v43  ;;  %v3273_v4 = vmax.f32 %v1628_v26, %v9131_v35  ;;  %v1587_v29 = vrot.slane %v924_v42, %v10769_v57  ;;  %v1594_v62 = vrot.slane %v1580_v46, %v10769_v57  ;;  %v4379_v26 = vld [vmem:[#allocation2 + $0x41] sm:$0xff]  ;;  %v4396_v42 = vld [vmem:[#allocation2 + $0x52] sm:$0xff] }
 0x1ab   :  { %v3966_v51 = vrot.slane %v3454_v17, %v10774_v0  ;;  %v4270_v63 = vsel %vm4207_vm6, %v3958_v59, %v3954_v61  ;;  %v3274_v44 = vmax.f32 %v1630_v10, %v9132_v39  ;;  %v9913_v13 = vpack.i.bf16 %v11236_v48, %v11193_v23 }
 0x1ac   :  { %v4271_v3 = vsel %vm4209_vm7, %v3962_v27, %v4270_v63  ;;  %v1595_v41 = vcombine.high %v1587_v29, %v1587_v29  ;;  %v1596_v21 = vcombine.high %v1594_v62, %v1594_v62  ;;  %v9121_v56 = vrot.slane %v1587_v29, 9 }
 0x1ad   :  { %v9123_v18 = vrot.slane %v1594_v62, 9  ;;  %v4272_v30 = vsel %vm4211_vm8, %v3966_v51, %v4271_v3  ;;  %9914 = vrot.lane.b32.xlu0 %v9913_v13, %s10420_s25  ;;  %v9923_v37 = vpack.i.bf16 %v4380_v15, %v4379_v26  ;;  %v730_v46 = vmul.f32 %v11026_v58, %v10955_v1  ;;  %v11270_v3 = vld [vmem:[#allocation2 + $0x62] sm:$0xff] }
 0x1ae   :  { %v9122_v22 = vrot.slane %v1595_v41, 9  ;;  %v9124_v23 = vrot.slane %v1596_v21, 9  ;;  %v3263_v32 = vmax.f32 %v1587_v29, %v9121_v56  ;;  %v728_v20 = vmul.f32 %v11026_v58, %v10958_v33 }
 0x1af   :  { %v3265_v10 = vmax.f32 %v1594_v62, %v9123_v18  ;;  %9924 = vrot.lane.b32.xlu1 %v9923_v37, %s10421_s26  ;;  %v801_v61 = vadd.f32 %v11037_v16, %v730_v46  ;;  %v731_v43 = vmul.f32 %v11026_v58, %v10961_v24  ;;  %v9928_v35 = vpack.i.bf16 %v4396_v42, %v11166_v52 }
 0x1b0   :  { %v3264_v17 = vmax.f32 %v1595_v41, %v9122_v22  ;;  %v3266_v59 = vmax.f32 %v1596_v21, %v9124_v23  ;;  %v3455_v27 = vmax.f32 %v3263_v32, %v3271_v31  ;;  %v799_v1 = vadd.f32 %v11037_v16, %v728_v20 }
 0x1b1   :  { %v3457_v39 = vmax.f32 %v3265_v10, %v3273_v4  ;;  %v865_v29 = vmul.f32 0.1, %v801_v61  ;;  %v802_v15 = vadd.f32 %v11037_v16, %v731_v43  ;;  %9919 = vrot.lane.b32.xlu0 %v9923_v37, %s10422_s30  ;;  %v729_v33 = vmul.f32 %v11026_v58, %v10967_v54 }
 0x1b2   :  { %v3456_v62 = vmax.f32 %v3264_v17, %v3272_v2  ;;  %v3458_v51 = vmax.f32 %v3266_v59, %v3274_v44  ;;  %v3970_v24 = vrot.slane %v3455_v27, %v10774_v0  ;;  %v863_v63 = vmul.f32 0.1, %v799_v1 }
 0x1b3   :  { %v3978_v52 = vrot.slane %v3457_v39, %v10774_v0  ;;  %v929_v13 = vmax.f32 %v801_v61, %v865_v29  ;;  %v866_v31 = vmul.f32 0.1, %v802_v15  ;;  %9929 = vrot.lane.b32.xlu1 %v9928_v35, %s10420_s25  ;;  %v800_v4 = vadd.f32 %v11037_v16, %v729_v33 }
 0x1b4   :  { %v3974_v41 = vrot.slane %v3456_v62, %v10774_v0  ;;  %v3982_v21 = vrot.slane %v3458_v51, %v10774_v0  ;;  %v4273_v54 = vsel %vm4213_vm9, %v3970_v24, %v4272_v30  ;;  %v927_v58 = vmax.f32 %v799_v1, %v863_v63 }
 0x1b5   :  { %v1665_v2 = vcombine.high %v929_v13, %v929_v13  ;;  %v1672_v44 = vrot.slane %v929_v13, %v10769_v57  ;;  %v930_v56 = vmax.f32 %v802_v15, %v866_v31  ;;  %v864_v26 = vmul.f32 0.1, %v800_v4 }
 0x1b6   :  { %v4274_v18 = vsel %vm4215_vm10, %v3974_v41, %v4273_v54  ;;  %v1631_v37 = vcombine.high %v927_v58, %v927_v58  ;;  %v1638_v46 = vrot.slane %v927_v58, %v10769_v57  ;;  %v9933_v16 = vpack.i.bf16 %v11270_v3, %v4396_v42  ;;  %v11287_v58 = vpop.f32.mrb[60].mxu1 }
 0x1b7   :  { %v4275_v22 = vsel %vm4217_vm11, %v3978_v52, %v4274_v18  ;;  %v1679_v23 = vrot.slane %v1665_v2, %v10769_v57  ;;  %v1680_v32 = vcombine.high %v1672_v44, %v1672_v44  ;;  %v9141_v20 = vrot.slane %v1672_v44, 9 }
 0x1b8   :  { %v4276_v30 = vsel %vm4219_vm12, %v3982_v21, %v4275_v22  ;;  %v1645_v10 = vrot.slane %v1631_v37, %v10769_v57  ;;  %v1646_v61 = vcombine.high %v1638_v46, %v1638_v46  ;;  %v9133_v43 = vrot.slane %v1638_v46, 9  ;;  %9934 = vrot.lane.b32.xlu0 %v9933_v16, %s10421_s26 }
 0x1b9   :  { %4351 = vst.msk [vmem:[#allocation2 + $0xb1] sm:$0xff] %vm3515_vm3, %v4276_v30  ;;  %v1681_v35 = vcombine.high %v1679_v23, %v1679_v23  ;;  %v9142_v17 = vrot.slane %v1680_v32, 9  ;;  %v9143_v59 = vrot.slane %v1679_v23, 9  ;;  %v3283_v42 = vmax.f32 %v1672_v44, %v9141_v20 }
 0x1ba   :  { %v1647_v27 = vcombine.high %v1645_v10, %v1645_v10  ;;  %v9134_v1 = vrot.slane %v1646_v61, 9  ;;  %v9135_v39 = vrot.slane %v1645_v10, 9  ;;  %v3275_v29 = vmax.f32 %v1638_v46, %v9133_v43  ;;  %v11290_v46 = vpop.f32.mrb[61].mxu1 }
 0x1bb   :  { %v9144_v15 = vrot.slane %v1681_v35, 9  ;;  %v3284_v33 = vmax.f32 %v1680_v32, %v9142_v17  ;;  %v3285_v62 = vmax.f32 %v1679_v23, %v9143_v59  ;;  %v1682_v51 = vcombine.high %v930_v56, %v930_v56  ;;  %v11292_v20 = vpop.f32.mrb[62].mxu1 }
 0x1bc   :  { %v9136_v24 = vrot.slane %v1647_v27, 9  ;;  %v3276_v63 = vmax.f32 %v1646_v61, %v9134_v1  ;;  %v3277_v52 = vmax.f32 %v1645_v10, %v9135_v39  ;;  %v3459_v13 = vmax.f32 %v3275_v29, %v3283_v42  ;;  %v11296_v10 = vld [vmem:[#allocation2 + $0x60] sm:$0xff] }
 0x1bd   :  { %v3286_v31 = vmax.f32 %v1681_v35, %v9144_v15  ;;  %v1689_v41 = vrot.slane %v930_v56, %v10769_v57  ;;  %v1696_v21 = vrot.slane %v1682_v51, %v10769_v57  ;;  %v928_v54 = vmax.f32 %v800_v4, %v864_v26 }
 0x1be   :  { %v3278_v2 = vmax.f32 %v1647_v27, %v9136_v24  ;;  %v3460_v44 = vmax.f32 %v3276_v63, %v3284_v33  ;;  %v3461_v18 = vmax.f32 %v3277_v52, %v3285_v62  ;;  %v3986_v37 = vrot.slane %v3459_v13, %v10774_v0  ;;  %v11305_v52 = vpop.f32.mrb[63].mxu1 }
 0x1bf   :  { %v1697_v16 = vcombine.high %v1689_v41, %v1689_v41  ;;  %v1698_v22 = vcombine.high %v1696_v21, %v1696_v21  ;;  %v9145_v23 = vrot.slane %v1689_v41, 9  ;;  %v9147_v32 = vrot.slane %v1696_v21, 9 }
 0x1c0   :  { %v3462_v30 = vmax.f32 %v3278_v2, %v3286_v31  ;;  %v3990_v56 = vrot.slane %v3460_v44, %v10774_v0  ;;  %v3994_v4 = vrot.slane %v3461_v18, %v10774_v0  ;;  %v1648_v26 = vcombine.high %v928_v54, %v928_v54  ;;  %v11312_v31 = vld [vmem:[%s12980_s2] ss:$0 sm:$0xff] }
 0x1c1   :  { %v9146_v61 = vrot.slane %v1697_v16, 9  ;;  %v9148_v43 = vrot.slane %v1698_v22, 9  ;;  %v3287_v35 = vmax.f32 %v1689_v41, %v9145_v23  ;;  %v3289_v17 = vmax.f32 %v1696_v21, %v9147_v32 }
 0x1c2   :  { %v3998_v59 = vrot.slane %v3462_v30, %v10774_v0  ;;  %v4277_v42 = vsel %vm4207_vm6, %v3990_v56, %v3986_v37  ;;  %v1655_v27 = vrot.slane %v928_v54, %v10769_v57  ;;  %v1662_v1 = vrot.slane %v1648_v26, %v10769_v57  ;;  %v10139_v54 = vld [vmem:[%s12982_s4 + $0x48] sm:$0xff]  }
 0x1c3   :  { %v4278_v39 = vsel %vm4209_vm7, %v3994_v4, %v4277_v42  ;;  %v3288_v29 = vmax.f32 %v1697_v16, %v9146_v61  ;;  %v3290_v15 = vmax.f32 %v1698_v22, %v9148_v43  ;;  %v9938_v33 = vpack.i.bf16 %v11296_v10, %v11236_v48  ;;  %v11326_v16 = vld [vmem:[%s12981_s3] ss:$0 sm:$0xff]  ;;  %9606 = vmatprep.subr.bf16.mxu1 %v10139_v54  ;;  %v11333_v4 = vld [vmem:[#allocation2 + $0x70] sm:$0xff] }
 0x1c4   :  { %v1663_v62 = vcombine.high %v1655_v27, %v1655_v27  ;;  %v1664_v51 = vcombine.high %v1662_v1, %v1662_v1  ;;  %v9137_v24 = vrot.slane %v1655_v27, 9  ;;  %v9139_v63 = vrot.slane %v1662_v1, 9 }
 0x1c5   :  { %v4279_v13 = vsel %vm4211_vm8, %v3998_v59, %v4278_v39  ;;  %9939 = vrot.lane.b32.xlu1 %v9938_v33, %s10422_s30  ;;  %v734_v41 = vmul.f32 %v11312_v31, %v11000_v55  ;;  %v732_v48 = vmul.f32 %v11312_v31, %v11006_v5  ;;  %v735_v21 = vmul.f32 %v11312_v31, %v11008_v49 }
 0x1c6   :  { %v9138_v2 = vrot.slane %v1663_v62, 9  ;;  %v9140_v44 = vrot.slane %v1664_v51, 9  ;;  %v3279_v18 = vmax.f32 %v1655_v27, %v9137_v24  ;;  %v3281_v37 = vmax.f32 %v1662_v1, %v9139_v63 }
 0x1c7   :  { %v805_v55 = vadd.f32 %v11326_v16, %v734_v41  ;;  %v803_v5 = vadd.f32 %v11326_v16, %v732_v48  ;;  %v806_v22 = vadd.f32 %v11326_v16, %v735_v21  ;;  %v733_v49 = vmul.f32 %v11312_v31, %v11012_v9  ;;  %v10140_v9 = vld [vmem:[%s12982_s4 + $0x8] sm:$0xff]  }
 0x1c8   :  { %v3280_v23 = vmax.f32 %v1663_v62, %v9138_v2  ;;  %v3282_v32 = vmax.f32 %v1664_v51, %v9140_v44  ;;  %v3463_v30 = vmax.f32 %v3279_v18, %v3287_v35  ;;  %v3465_v56 = vmax.f32 %v3281_v37, %v3289_v17  ;;  %9607 = vmatpush3.bf16.msra.mxu1 %v10140_v9 }
 0x1c9   :  { %v869_v26 = vmul.f32 0.1, %v805_v55  ;;  %v867_v61 = vmul.f32 0.1, %v803_v5  ;;  %v870_v43 = vmul.f32 0.1, %v806_v22  ;;  %v804_v59 = vadd.f32 %v11326_v16, %v733_v49 }
 0x1ca   :  { %v3464_v42 = vmax.f32 %v3280_v23, %v3288_v29  ;;  %v3466_v27 = vmax.f32 %v3282_v32, %v3290_v15  ;;  %v4002_v1 = vrot.slane %v3463_v30, %v10774_v0  ;;  %v4010_v39 = vrot.slane %v3465_v56, %v10774_v0 }
 0x1cb   :  { %v933_v33 = vmax.f32 %v805_v55, %v869_v26  ;;  %v931_v35 = vmax.f32 %v803_v5, %v867_v61  ;;  %v934_v17 = vmax.f32 %v806_v22, %v870_v43  ;;  %v868_v62 = vmul.f32 0.1, %v804_v59 }
 0x1cc   :  { %v4006_v51 = vrot.slane %v3464_v42, %v10774_v0  ;;  %v4014_v24 = vrot.slane %v3466_v27, %v10774_v0  ;;  %v4280_v63 = vsel %vm4213_vm9, %v4002_v1, %v4279_v13  ;;  %v9943_v29 = vpack.i.bf16 %v11333_v4, %v11296_v10 }
 0x1cd   :  { %v1733_v15 = vcombine.high %v933_v33, %v933_v33  ;;  %v1740_v41 = vrot.slane %v933_v33, %v10769_v57  ;;  %v1699_v48 = vcombine.high %v931_v35, %v931_v35  ;;  %v1706_v21 = vrot.slane %v931_v35, %v10769_v57 }
 0x1ce   :  { %v4281_v54 = vsel %vm4215_vm10, %v4006_v51, %v4280_v63  ;;  %v1750_v2 = vcombine.high %v934_v17, %v934_v17  ;;  %v1757_v44 = vrot.slane %v934_v17, %v10769_v57  ;;  %v932_v18 = vmax.f32 %v804_v59, %v868_v62  ;;  %9944 = vrot.lane.b32.xlu0 %v9943_v29, %s10420_s25 }
 0x1cf   :  { %v4282_v13 = vsel %vm4217_vm11, %v4010_v39, %v4281_v54  ;;  %v1747_v37 = vrot.slane %v1733_v15, %v10769_v57  ;;  %v1748_v10 = vcombine.high %v1740_v41, %v1740_v41  ;;  %v9157_v55 = vrot.slane %v1740_v41, 9 }
 0x1d0   :  { %v4283_v5 = vsel %vm4219_vm12, %v4014_v24, %v4282_v13  ;;  %v1713_v22 = vrot.slane %v1699_v48, %v10769_v57  ;;  %v1714_v49 = vcombine.high %v1706_v21, %v1706_v21  ;;  %v9149_v23 = vrot.slane %v1706_v21, 9 }
 0x1d1   :  { %4352 = vst.msk [vmem:[#allocation2 + $0xc1] sm:$0xff] %vm3515_vm3, %v4283_v5  ;;  %v1749_v32 = vcombine.high %v1747_v37, %v1747_v37  ;;  %v9158_v30 = vrot.slane %v1748_v10, 9  ;;  %v9159_v56 = vrot.slane %v1747_v37, 9  ;;  %v3299_v26 = vmax.f32 %v1740_v41, %v9157_v55 }
 0x1d2   :  { %v1715_v61 = vcombine.high %v1713_v22, %v1713_v22  ;;  %v9150_v43 = vrot.slane %v1714_v49, 9  ;;  %v9151_v59 = vrot.slane %v1713_v22, 9  ;;  %v3291_v42 = vmax.f32 %v1706_v21, %v9149_v23 }
 0x1d3   :  { %v9160_v27 = vrot.slane %v1749_v32, 9  ;;  %v3300_v1 = vmax.f32 %v1748_v10, %v9158_v30  ;;  %v3301_v39 = vmax.f32 %v1747_v37, %v9159_v56  ;;  %v1764_v9 = vrot.slane %v1750_v2, %v10769_v57  ;;  %v4382_v37 = vld [vmem:[#allocation2 + $0x71] sm:$0xff] }
 0x1d4   :  { %v9152_v33 = vrot.slane %v1715_v61, 9  ;;  %v3292_v35 = vmax.f32 %v1714_v49, %v9150_v43  ;;  %v3293_v17 = vmax.f32 %v1713_v22, %v9151_v59  ;;  %v3467_v62 = vmax.f32 %v3291_v42, %v3299_v26  ;;  %v4381_v26 = vld [vmem:[#allocation2 + $0x61] sm:$0xff] }
 0x1d5   :  { %v3302_v51 = vmax.f32 %v1749_v32, %v9160_v27  ;;  %v1765_v24 = vcombine.high %v1757_v44, %v1757_v44  ;;  %v1766_v63 = vcombine.high %v1764_v9, %v1764_v9  ;;  %v9161_v29 = vrot.slane %v1757_v44, 9 }
 0x1d6   :  { %v3294_v15 = vmax.f32 %v1715_v61, %v9152_v33  ;;  %v3468_v48 = vmax.f32 %v3292_v35, %v3300_v1  ;;  %v3469_v41 = vmax.f32 %v3293_v17, %v3301_v39  ;;  %v4018_v54 = vrot.slane %v3467_v62, %v10774_v0  ;;  %v11367_v33 = vld [vmem:[#allocation2 + $0x72] sm:$0xff] }
 0x1d7   :  { %v9162_v13 = vrot.slane %v1765_v24, 9  ;;  %v9163_v21 = vrot.slane %v1764_v9, 9  ;;  %v9164_v55 = vrot.slane %v1766_v63, 9  ;;  %v3303_v10 = vmax.f32 %v1757_v44, %v9161_v29 }
 0x1d8   :  { %v3470_v5 = vmax.f32 %v3294_v15, %v3302_v51  ;;  %v4022_v2 = vrot.slane %v3468_v48, %v10774_v0  ;;  %v4026_v22 = vrot.slane %v3469_v41, %v10774_v0  ;;  %v1716_v49 = vcombine.high %v932_v18, %v932_v18 }
 0x1d9   :  { %v3304_v23 = vmax.f32 %v1765_v24, %v9162_v13  ;;  %v3305_v32 = vmax.f32 %v1764_v9, %v9163_v21  ;;  %v3306_v30 = vmax.f32 %v1766_v63, %v9164_v55  ;;  %v1723_v56 = vrot.slane %v932_v18, %v10769_v57 }
 0x1da   :  { %v4030_v61 = vrot.slane %v3470_v5, %v10774_v0  ;;  %v4284_v43 = vsel %vm4207_vm6, %v4022_v2, %v4018_v54  ;;  %v1730_v59 = vrot.slane %v1716_v49, %v10769_v57  ;;  %v9953_v44 = vpack.i.bf16 %v4382_v37, %v4381_v26 }
 0x1db   :  { %v4285_v42 = vsel %vm4209_vm7, %v4026_v22, %v4284_v43  ;;  %v1731_v27 = vcombine.high %v1723_v56, %v1723_v56  ;;  %v9153_v1 = vrot.slane %v1723_v56, 9  ;;  %v738_v39 = vmul.f32 %v11312_v31, %v11061_v40 }
 0x1dc   :  { %v1732_v9 = vcombine.high %v1730_v59, %v1730_v59  ;;  %v9155_v35 = vrot.slane %v1730_v59, 9  ;;  %v4286_v18 = vsel %vm4211_vm8, %v4030_v61, %v4285_v42  ;;  %9954 = vrot.lane.b32.xlu1 %v9953_v44, %s10421_s26  ;;  %v736_v17 = vmul.f32 %v11312_v31, %v11066_v34  ;;  %9949 = vrot.lane.b32.xlu0 %v9953_v44, %s10422_s30 }
 0x1dd   :  { %v9154_v62 = vrot.slane %v1731_v27, 9  ;;  %v3295_v51 = vmax.f32 %v1723_v56, %v9153_v1  ;;  %v809_v24 = vadd.f32 %v11326_v16, %v738_v39  ;;  %v739_v40 = vmul.f32 %v11312_v31, %v11068_v11 }
 0x1de   :  { %v9156_v63 = vrot.slane %v1732_v9, 9  ;;  %v3297_v29 = vmax.f32 %v1730_v59, %v9155_v35  ;;  %v807_v15 = vadd.f32 %v11326_v16, %v736_v17  ;;  %v9958_v48 = vpack.i.bf16 %v11367_v33, %v11270_v3  ;;  %v10141_v3 = vld [vmem:[%s12982_s4 + $0x50] sm:$0xff]  }
 0x1df   :  { %v3296_v41 = vmax.f32 %v1731_v27, %v9154_v62  ;;  %v3471_v54 = vmax.f32 %v3295_v51, %v3303_v10  ;;  %v873_v13 = vmul.f32 0.1, %v809_v24  ;;  %v810_v34 = vadd.f32 %v11326_v16, %v739_v40  ;;  %v10142_v10 = vld [vmem:[%s12982_s4 + $0x10] sm:$0xff]   ;;  %9608 = vmatprep.subr.bf16.mxu1 %v10141_v3 }
 0x1e0   :  { %v3298_v21 = vmax.f32 %v1732_v9, %v9156_v63  ;;  %v3473_v55 = vmax.f32 %v3297_v29, %v3305_v32  ;;  %v871_v37 = vmul.f32 0.1, %v807_v15  ;;  %9959 = vrot.lane.b32.xlu1 %v9958_v48, %s10420_s25  ;;  %v737_v11 = vmul.f32 %v11312_v31, %v11076_v6  ;;  %v10143_v32 = vld [vmem:[%s12982_s4 + $0x58] sm:$0xff]   ;;  %9609 = vmatpush3.bf16.msra.mxu1 %v10142_v10 }
 0x1e1   :  { %v3472_v5 = vmax.f32 %v3296_v41, %v3304_v23  ;;  %v4034_v2 = vrot.slane %v3471_v54, %v10774_v0  ;;  %v937_v22 = vmax.f32 %v809_v24, %v873_v13  ;;  %v874_v49 = vmul.f32 0.1, %v810_v34  ;;  %9610 = vmatprep.subr.bf16.mxu1 %v10143_v32 }
 0x1e2   :  { %v3474_v56 = vmax.f32 %v3298_v21, %v3306_v30  ;;  %v4042_v6 = vrot.slane %v3473_v55, %v10774_v0  ;;  %v935_v23 = vmax.f32 %v807_v15, %v871_v37  ;;  %v808_v26 = vadd.f32 %v11326_v16, %v737_v11  ;;  %v10144_v30 = vld [vmem:[%s12982_s4 + $0x18] sm:$0xff]  }
 0x1e3   :  { %v4038_v61 = vrot.slane %v3472_v5, %v10774_v0  ;;  %v4287_v43 = vsel %vm4213_vm9, %v4034_v2, %v4286_v18  ;;  %v1801_v59 = vcombine.high %v937_v22, %v937_v22  ;;  %v1808_v44 = vrot.slane %v937_v22, %v10769_v57 }
 0x1e4   :  { %v4046_v42 = vrot.slane %v3474_v56, %v10774_v0  ;;  %v1767_v27 = vcombine.high %v935_v23, %v935_v23  ;;  %v1774_v1 = vrot.slane %v935_v23, %v10769_v57  ;;  %v938_v39 = vmax.f32 %v810_v34, %v874_v49  ;;  %9611 = vmatpush3.bf16.msra.mxu1 %v10144_v30  ;;  %v10146_v23 = vld [vmem:[%s12982_s4 + $0x20] sm:$0xff]  }
 0x1e5   :  { %v4288_v9 = vsel %vm4215_vm10, %v4038_v61, %v4287_v43  ;;  %v1815_v35 = vrot.slane %v1801_v59, %v10769_v57  ;;  %v1816_v18 = vcombine.high %v1808_v44, %v1808_v44  ;;  %v9173_v17 = vrot.slane %v1808_v44, 9 }
 0x1e6   :  { %v4289_v62 = vsel %vm4217_vm11, %v4042_v6, %v4288_v9  ;;  %v1781_v51 = vrot.slane %v1767_v27, %v10769_v57  ;;  %v1782_v24 = vcombine.high %v1774_v1, %v1774_v1  ;;  %v9165_v40 = vrot.slane %v1774_v1, 9  ;;  %v10145_v6 = vld [vmem:[%s12982_s4 + $0x60] sm:$0xff]  }
 0x1e7   :  { %v4290_v63 = vsel %vm4219_vm12, %v4046_v42, %v4289_v62  ;;  %v1817_v29 = vcombine.high %v1815_v35, %v1815_v35  ;;  %v9174_v15 = vrot.slane %v1816_v18, 9  ;;  %v9175_v48 = vrot.slane %v1815_v35, 9  ;;  %9612 = vmatprep.subr.bf16.mxu1 %v10145_v6  ;;  %v10150_v6 = vld [vmem:[%s12982_s4 + $0x30] sm:$0xff]  }
 0x1e8   :  { %4353 = vst.msk [vmem:[#allocation2 + $0xd1] sm:$0xff] %vm3515_vm3, %v4290_v63  ;;  %v3315_v41 = vmax.f32 %v1808_v44, %v9173_v17  ;;  %v1783_v54 = vcombine.high %v1781_v51, %v1781_v51  ;;  %v9166_v13 = vrot.slane %v1782_v24, 9  ;;  %v9167_v34 = vrot.slane %v1781_v51, 9  ;;  %9613 = vmatpush3.bf16.msra.mxu1 %v10146_v23 }
 0x1e9   :  { %v9176_v21 = vrot.slane %v1817_v29, 9  ;;  %v3316_v55 = vmax.f32 %v1816_v18, %v9174_v15  ;;  %v3317_v37 = vmax.f32 %v1815_v35, %v9175_v48  ;;  %v3307_v11 = vmax.f32 %v1774_v1, %v9165_v40  ;;  %v4446_v40 = vld [vmem:[#allocation2 + $0x82] sm:$0xff] }
 0x1ea   :  { %v9168_v5 = vrot.slane %v1783_v54, 9  ;;  %v3308_v2 = vmax.f32 %v1782_v24, %v9166_v13  ;;  %v3309_v22 = vmax.f32 %v1781_v51, %v9167_v34  ;;  %v1818_v49 = vcombine.high %v938_v39, %v938_v39  ;;  %v4414_v48 = vld [vmem:[#allocation2 + $0x80] sm:$0xff] }
 0x1eb   :  { %v3318_v3 = vmax.f32 %v1817_v29, %v9176_v21  ;;  %v3475_v10 = vmax.f32 %v3307_v11, %v3315_v41  ;;  %v1825_v32 = vrot.slane %v938_v39, %v10769_v57  ;;  %v872_v56 = vmul.f32 0.1, %v808_v26  ;;  %v10147_v41 = vld [vmem:[%s12982_s4 + $0x68] sm:$0xff]  }
 0x1ec   :  { %v3310_v61 = vmax.f32 %v1783_v54, %v9168_v5  ;;  %v3476_v43 = vmax.f32 %v3308_v2, %v3316_v55  ;;  %v3477_v59 = vmax.f32 %v3309_v22, %v3317_v37  ;;  %v1832_v44 = vrot.slane %v1818_v49, %v10769_v57  ;;  %v10148_v54 = vld [vmem:[%s12982_s4 + $0x28] sm:$0xff]   ;;  %v4463_v22 = vld [vmem:[#allocation2 + $0x90] sm:$0xff]  ;;  %9614 = vmatprep.subr.bf16.mxu1 %v10147_v41 }
 0x1ed   :  { %v4050_v42 = vrot.slane %v3475_v10, %v10774_v0  ;;  %v1833_v27 = vcombine.high %v1825_v32, %v1825_v32  ;;  %v9177_v1 = vrot.slane %v1825_v32, 9  ;;  %v936_v30 = vmax.f32 %v808_v26, %v872_v56  ;;  %9615 = vmatpush3.bf16.msra.mxu1 %v10148_v54  ;;  %v10149_v56 = vld [vmem:[%s12982_s4 + $0x70] sm:$0xff]  }
 0x1ee   :  { %v3478_v39 = vmax.f32 %v3310_v61, %v3318_v3  ;;  %v4054_v9 = vrot.slane %v3476_v43, %v10774_v0  ;;  %v4058_v35 = vrot.slane %v3477_v59, %v10774_v0  ;;  %v1834_v18 = vcombine.high %v1832_v44, %v1832_v44  ;;  %9616 = vmatprep.subr.bf16.mxu1 %v10149_v56 }
 0x1ef   :  { %v9178_v17 = vrot.slane %v1833_v27, 9  ;;  %v9179_v62 = vrot.slane %v1832_v44, 9  ;;  %v3319_v51 = vmax.f32 %v1825_v32, %v9177_v1  ;;  %v1784_v24 = vcombine.high %v936_v30, %v936_v30 }
 0x1f0   :  { %v4062_v63 = vrot.slane %v3478_v39, %v10774_v0  ;;  %v4291_v29 = vsel %vm4207_vm6, %v4054_v9, %v4050_v42  ;;  %v9180_v15 = vrot.slane %v1834_v18, 9  ;;  %v1791_v26 = vrot.slane %v936_v30, %v10769_v57 }
 0x1f1   :  { %v4292_v13 = vsel %vm4209_vm7, %v4058_v35, %v4291_v29  ;;  %v3320_v34 = vmax.f32 %v1833_v27, %v9178_v17  ;;  %v3321_v21 = vmax.f32 %v1832_v44, %v9179_v62  ;;  %v1798_v55 = vrot.slane %v1784_v24, %v10769_v57  ;;  %9617 = vmatpush3.bf16.msra.mxu1 %v10150_v6 }
 0x1f2   :  { %v3322_v37 = vmax.f32 %v1834_v18, %v9180_v15  ;;  %v1799_v11 = vcombine.high %v1791_v26, %v1791_v26  ;;  %v9169_v5 = vrot.slane %v1791_v26, 9  ;;  %v4293_v2 = vsel %vm4211_vm8, %v4062_v63, %v4292_v13  ;;  %v4479_v63 = vld [vmem:[#allocation2 + $0x91] sm:$0xff] }
 0x1f3   :  { %v1800_v49 = vcombine.high %v1798_v55, %v1798_v55  ;;  %v9171_v3 = vrot.slane %v1798_v55, 9  ;;  %v9963_v10 = vpack.i.bf16 %v4446_v40, %v11367_v33  ;;  %v9978_v32 = vpack.i.bf16 %v4414_v48, %v11333_v4  ;;  %v10151_v4 = vld [vmem:[%s12982_s4 + $0x78] sm:$0xff]   ;;  %v4478_v40 = vld [vmem:[#allocation2 + $0x81] sm:$0xff] }
 0x1f4   :  { %v9170_v23 = vrot.slane %v1799_v11, 9  ;;  %v3311_v61 = vmax.f32 %v1791_v26, %v9169_v5  ;;  %v742_v43 = vmul.f32 %v11312_v31, %v11113_v19  ;;  %v740_v59 = vmul.f32 %v11312_v31, %v11115_v25  ;;  %9618 = vmatprep.subr.bf16.mxu1 %v10151_v4 }
 0x1f5   :  { %v9172_v33 = vrot.slane %v1800_v49, 9  ;;  %v3313_v44 = vmax.f32 %v1798_v55, %v9171_v3  ;;  %9964 = vrot.lane.b32.xlu0 %v9963_v10, %s10421_s26  ;;  %9979 = vrot.lane.b32.xlu1 %v9978_v32, %s10422_s30  ;;  %v743_v42 = vmul.f32 %v11312_v31, %v11119_v14  ;;  %v9968_v27 = vpack.i.bf16 %v4463_v22, %v4414_v48  ;;  %v10152_v14 = vld [vmem:[%s12982_s4 + $0x38] sm:$0xff]  }
 0x1f6   :  { %v3312_v1 = vmax.f32 %v1799_v11, %v9170_v23  ;;  %v3479_v30 = vmax.f32 %v3311_v61, %v3319_v51  ;;  %v813_v19 = vadd.f32 %v11326_v16, %v742_v43  ;;  %v811_v25 = vadd.f32 %v11326_v16, %v740_v59  ;;  %9619 = vmatpush3.bf16.msra.mxu1 %v10152_v14 }
 0x1f7   :  { %v3314_v39 = vmax.f32 %v1800_v49, %v9172_v33  ;;  %v3481_v9 = vmax.f32 %v3313_v44, %v3321_v21  ;;  %v814_v35 = vadd.f32 %v11326_v16, %v743_v42  ;;  %v741_v18 = vmul.f32 %v11312_v31, %v11127_v50 }
 0x1f8   :  { %v3480_v17 = vmax.f32 %v3312_v1, %v3320_v34  ;;  %v4066_v62 = vrot.slane %v3479_v30, %v10774_v0  ;;  %v877_v51 = vmul.f32 0.1, %v813_v19  ;;  %v875_v24 = vmul.f32 0.1, %v811_v25 }
 0x1f9   :  { %v3482_v29 = vmax.f32 %v3314_v39, %v3322_v37  ;;  %v4074_v15 = vrot.slane %v3481_v9, %v10774_v0  ;;  %v878_v26 = vmul.f32 0.1, %v814_v35  ;;  %9969 = vrot.lane.b32.xlu0 %v9968_v27, %s10420_s25  ;;  %v812_v50 = vadd.f32 %v11326_v16, %v741_v18 }
 0x1fa   :  { %v4070_v48 = vrot.slane %v3480_v17, %v10774_v0  ;;  %v4294_v41 = vsel %vm4213_vm9, %v4066_v62, %v4293_v2  ;;  %v941_v54 = vmax.f32 %v813_v19, %v877_v51  ;;  %v939_v13 = vmax.f32 %v811_v25, %v875_v24 }
 0x1fb   :  { %v4078_v34 = vrot.slane %v3482_v29, %v10774_v0  ;;  %v942_v21 = vmax.f32 %v814_v35, %v878_v26  ;;  %v876_v55 = vmul.f32 0.1, %v812_v50  ;;  %v9973_v11 = vpack.i.bf16 %v4479_v63, %v4478_v40 }
 0x1fc   :  { %v4295_v37 = vsel %vm4215_vm10, %v4070_v48, %v4294_v41  ;;  %v1869_v5 = vcombine.high %v941_v54, %v941_v54  ;;  %v1876_v22 = vrot.slane %v941_v54, %v10769_v57  ;;  %v1835_v49 = vcombine.high %v939_v13, %v939_v13 }
 0x1fd   :  { %v4296_v3 = vsel %vm4217_vm11, %v4074_v15, %v4295_v37  ;;  %v1842_v10 = vrot.slane %v939_v13, %v10769_v57  ;;  %v1886_v32 = vcombine.high %v942_v21, %v942_v21  ;;  %v1893_v2 = vrot.slane %v942_v21, %v10769_v57  ;;  %9974 = vrot.lane.b32.xlu0 %v9973_v11, %s10422_s30  ;;  %v4383_v13 = vld [vmem:[#allocation2 + $0xa1] sm:$0xff] }
 0x1fe   :  { %v4297_v56 = vsel %vm4219_vm12, %v4078_v34, %v4296_v3  ;;  %v1883_v6 = vrot.slane %v1869_v5, %v10769_v57  ;;  %v1884_v23 = vcombine.high %v1876_v22, %v1876_v22  ;;  %v9189_v61 = vrot.slane %v1876_v22, 9  ;;  %v4384_v34 = vld [vmem:[#allocation2 + $0xb1] sm:$0xff] }
 0x1ff   :  { %4354 = vst.msk [vmem:[#allocation2 + $0xe1] sm:$0xff] %vm3515_vm3, %v4297_v56  ;;  %v1849_v43 = vrot.slane %v1835_v49, %v10769_v57  ;;  %v1850_v59 = vcombine.high %v1842_v10, %v1842_v10  ;;  %v9181_v4 = vrot.slane %v1842_v10, 9  ;;  %v1900_v33 = vrot.slane %v1886_v32, %v10769_v57 }
 0x200   :  { %v1885_v44 = vcombine.high %v1883_v6, %v1883_v6  ;;  %v9190_v42 = vrot.slane %v1884_v23, 9  ;;  %v9191_v27 = vrot.slane %v1883_v6, 9  ;;  %v3331_v1 = vmax.f32 %v1876_v22, %v9189_v61 }
 0x201   :  { %v1851_v30 = vcombine.high %v1849_v43, %v1849_v43  ;;  %v9182_v19 = vrot.slane %v1850_v59, 9  ;;  %v9183_v25 = vrot.slane %v1849_v43, 9  ;;  %v3323_v39 = vmax.f32 %v1842_v10, %v9181_v4  ;;  %v4399_v4 = vld [vmem:[#allocation2 + $0xa2] sm:$0xff] }
 0x202   :  { %v9192_v9 = vrot.slane %v1885_v44, 9  ;;  %v3332_v35 = vmax.f32 %v1884_v23, %v9190_v42  ;;  %v3333_v18 = vmax.f32 %v1883_v6, %v9191_v27  ;;  %v1901_v14 = vcombine.high %v1893_v2, %v1893_v2 }
 0x203   :  { %v9184_v17 = vrot.slane %v1851_v30, 9  ;;  %v3324_v62 = vmax.f32 %v1850_v59, %v9182_v19  ;;  %v3325_v51 = vmax.f32 %v1849_v43, %v9183_v25  ;;  %v3483_v24 = vmax.f32 %v3323_v39, %v3331_v1 }
 0x204   :  { %v3334_v40 = vmax.f32 %v1885_v44, %v9192_v9  ;;  %v1902_v63 = vcombine.high %v1900_v33, %v1900_v33  ;;  %v9193_v29 = vrot.slane %v1893_v2, 9  ;;  %v9194_v15 = vrot.slane %v1901_v14, 9  ;;  %v11486_v44 = vld [vmem:[#allocation2 + $0xb2] sm:$0xff] }
 0x205   :  { %v3326_v26 = vmax.f32 %v1851_v30, %v9184_v17  ;;  %v3484_v48 = vmax.f32 %v3324_v62, %v3332_v35  ;;  %v3485_v41 = vmax.f32 %v3325_v51, %v3333_v18  ;;  %v4082_v54 = vrot.slane %v3483_v24, %v10774_v0 }
 0x206   :  { %v9195_v21 = vrot.slane %v1900_v33, 9  ;;  %v9196_v11 = vrot.slane %v1902_v63, 9  ;;  %v3335_v37 = vmax.f32 %v1893_v2, %v9193_v29  ;;  %v3336_v5 = vmax.f32 %v1901_v14, %v9194_v15 }
 0x207   :  { %v3486_v22 = vmax.f32 %v3326_v26, %v3334_v40  ;;  %v4086_v49 = vrot.slane %v3484_v48, %v10774_v0  ;;  %v4090_v3 = vrot.slane %v3485_v41, %v10774_v0  ;;  %v940_v10 = vmax.f32 %v812_v50, %v876_v55 }
 0x208   :  { %v3337_v32 = vmax.f32 %v1900_v33, %v9195_v21  ;;  %v3338_v56 = vmax.f32 %v1902_v63, %v9196_v11  ;;  %v9983_v6 = vpack.i.bf16 %v4384_v34, %v4383_v13  ;;  %v746_v23 = vmul.f32 %v11312_v31, %v11169_v53 }
 0x209   :  { %v4094_v61 = vrot.slane %v3486_v22, %v10774_v0  ;;  %v4298_v43 = vsel %vm4207_vm6, %v4086_v49, %v4082_v54  ;;  %v1852_v59 = vcombine.high %v940_v10, %v940_v10  ;;  %v1859_v2 = vrot.slane %v940_v10, %v10769_v57 }
 0x20a   :  { %v4299_v42 = vsel %vm4209_vm7, %v4090_v3, %v4298_v43  ;;  %9984 = vrot.lane.b32.xlu1 %v9983_v6, %s10421_s26  ;;  %v817_v50 = vadd.f32 %v11326_v16, %v746_v23  ;;  %v744_v55 = vmul.f32 %v11312_v31, %v11172_v12  ;;  %v747_v53 = vmul.f32 %v11312_v31, %v11176_v28 }
 0x20b   :  { %v1866_v33 = vrot.slane %v1852_v59, %v10769_v57  ;;  %v1867_v27 = vcombine.high %v1859_v2, %v1859_v2  ;;  %v9185_v1 = vrot.slane %v1859_v2, 9  ;;  %v4300_v30 = vsel %vm4211_vm8, %v4094_v61, %v4299_v42 }
 0x20c   :  { %v881_v19 = vmul.f32 0.1, %v817_v50  ;;  %v815_v25 = vadd.f32 %v11326_v16, %v744_v55  ;;  %v818_v39 = vadd.f32 %v11326_v16, %v747_v53  ;;  %v9988_v9 = vpack.i.bf16 %v11486_v44, %v4399_v4  ;;  %v11517_v53 = vld [vmem:[%s12982_s4 + $0x80] sm:$0xff]  }
 0x20d   :  { %v1868_v35 = vcombine.high %v1866_v33, %v1866_v33  ;;  %v9186_v18 = vrot.slane %v1867_v27, 9  ;;  %v9187_v14 = vrot.slane %v1866_v33, 9  ;;  %v3327_v12 = vmax.f32 %v1859_v2, %v9185_v1  ;;  %9808 = vmatprep.subr.bf16.mxu1 %v11517_v53 }
 0x20e   :  { %v945_v17 = vmax.f32 %v817_v50, %v881_v19  ;;  %v879_v62 = vmul.f32 0.1, %v815_v25  ;;  %v882_v28 = vmul.f32 0.1, %v818_v39  ;;  %9989 = vrot.lane.b32.xlu1 %v9988_v9, %s10420_s25  ;;  %v745_v51 = vmul.f32 %v11312_v31, %v11187_v8 }
 0x20f   :  { %v9188_v24 = vrot.slane %v1868_v35, 9  ;;  %v3328_v40 = vmax.f32 %v1867_v27, %v9186_v18  ;;  %v3329_v63 = vmax.f32 %v1866_v33, %v9187_v14  ;;  %v3487_v29 = vmax.f32 %v3327_v12, %v3335_v37 }
 0x210   :  { %v1937_v15 = vcombine.high %v945_v17, %v945_v17  ;;  %v1944_v26 = vrot.slane %v945_v17, %v10769_v57  ;;  %v943_v48 = vmax.f32 %v815_v25, %v879_v62  ;;  %v946_v41 = vmax.f32 %v818_v39, %v882_v28 }
 0x211   :  { %v3330_v54 = vmax.f32 %v1868_v35, %v9188_v24  ;;  %v3488_v13 = vmax.f32 %v3328_v40, %v3336_v5  ;;  %v3489_v34 = vmax.f32 %v3329_v63, %v3337_v32  ;;  %v4098_v21 = vrot.slane %v3487_v29, %v10774_v0 }
 0x212   :  { %v1951_v11 = vrot.slane %v1937_v15, %v10769_v57  ;;  %v1952_v22 = vcombine.high %v1944_v26, %v1944_v26  ;;  %v9205_v49 = vrot.slane %v1944_v26, 9  ;;  %v1903_v3 = vcombine.high %v943_v48, %v943_v48 }
 0x213   :  { %v3490_v8 = vmax.f32 %v3330_v54, %v3338_v56  ;;  %v4102_v10 = vrot.slane %v3488_v13, %v10774_v0  ;;  %v4106_v37 = vrot.slane %v3489_v34, %v10774_v0  ;;  %v4301_v6 = vsel %vm4213_vm9, %v4098_v21, %v4300_v30  ;;  %v11525_v13 = vld [vmem:[#allocation2 + $0xc2] sm:$0xff] }
 0x214   :  { %v1953_v23 = vcombine.high %v1951_v11, %v1951_v11  ;;  %v9206_v61 = vrot.slane %v1952_v22, 9  ;;  %v9207_v43 = vrot.slane %v1951_v11, 9  ;;  %v3347_v59 = vmax.f32 %v1944_v26, %v9205_v49 }
 0x215   :  { %v4110_v5 = vrot.slane %v3490_v8, %v10774_v0  ;;  %v4302_v32 = vsel %vm4215_vm10, %v4102_v10, %v4301_v6  ;;  %v1910_v2 = vrot.slane %v943_v48, %v10769_v57  ;;  %v1917_v4 = vrot.slane %v1903_v3, %v10769_v57 }
 0x216   :  { %v4303_v56 = vsel %vm4217_vm11, %v4106_v37, %v4302_v32  ;;  %v9208_v42 = vrot.slane %v1953_v23, 9  ;;  %v3348_v50 = vmax.f32 %v1952_v22, %v9206_v61  ;;  %v3349_v55 = vmax.f32 %v1951_v11, %v9207_v43  ;;  %v11528_v22 = vld [vmem:[#allocation2 + $0xc0] sm:$0xff]  ;;  %v11535_v43 = vld [vmem:[#allocation2 + $0xb0] sm:$0xff] }
 0x217   :  { %v4304_v33 = vsel %vm4219_vm12, %v4110_v5, %v4303_v56  ;;  %v1918_v27 = vcombine.high %v1910_v2, %v1910_v2  ;;  %v1919_v1 = vcombine.high %v1917_v4, %v1917_v4  ;;  %v9197_v30 = vrot.slane %v1910_v2, 9 }
 0x218   :  { %4355 = vst.msk [vmem:[#allocation2 + $0xf1] sm:$0xff] %vm3515_vm3, %v4304_v33  ;;  %v3350_v19 = vmax.f32 %v1953_v23, %v9208_v42  ;;  %v9199_v25 = vrot.slane %v1917_v4, 9  ;;  %v1954_v39 = vcombine.high %v946_v41, %v946_v41  ;;  %v1961_v9 = vrot.slane %v946_v41, %v10769_v57 }
 0x219   :  { %v9198_v35 = vrot.slane %v1918_v27, 9  ;;  %v9200_v18 = vrot.slane %v1919_v1, 9  ;;  %v3339_v14 = vmax.f32 %v1910_v2, %v9197_v30  ;;  %v816_v12 = vadd.f32 %v11326_v16, %v745_v51 }
 0x21a   :  { %v3341_v17 = vmax.f32 %v1917_v4, %v9199_v25  ;;  %v1968_v62 = vrot.slane %v1954_v39, %v10769_v57  ;;  %v1969_v28 = vcombine.high %v1961_v9, %v1961_v9  ;;  %v9209_v24 = vrot.slane %v1961_v9, 9 }
 0x21b   :  { %v3340_v40 = vmax.f32 %v1918_v27, %v9198_v35  ;;  %v3342_v63 = vmax.f32 %v1919_v1, %v9200_v18  ;;  %v3491_v29 = vmax.f32 %v3339_v14, %v3347_v59  ;;  %v880_v15 = vmul.f32 0.1, %v816_v12 }
 0x21c   :  { %v3493_v26 = vmax.f32 %v3341_v17, %v3349_v55  ;;  %v1970_v48 = vcombine.high %v1968_v62, %v1968_v62  ;;  %v9210_v54 = vrot.slane %v1969_v28, 9  ;;  %v9211_v41 = vrot.slane %v1968_v62, 9 }
 0x21d   :  { %v3492_v34 = vmax.f32 %v3340_v40, %v3348_v50  ;;  %v3494_v21 = vmax.f32 %v3342_v63, %v3350_v19  ;;  %v4114_v11 = vrot.slane %v3491_v29, %v10774_v0  ;;  %v3351_v51 = vmax.f32 %v1961_v9, %v9209_v24 }
 0x21e   :  { %v4122_v49 = vrot.slane %v3493_v26, %v10774_v0  ;;  %v9212_v3 = vrot.slane %v1970_v48, 9  ;;  %v3352_v8 = vmax.f32 %v1969_v28, %v9210_v54  ;;  %v3353_v10 = vmax.f32 %v1968_v62, %v9211_v41 }
 0x21f   :  { %v4118_v37 = vrot.slane %v3492_v34, %v10774_v0  ;;  %v4126_v6 = vrot.slane %v3494_v21, %v10774_v0  ;;  %v944_v23 = vmax.f32 %v816_v12, %v880_v15  ;;  %v9993_v61 = vpack.i.bf16 %v11525_v13, %v11486_v44 }
 0x220   :  { %v3354_v59 = vmax.f32 %v1970_v48, %v9212_v3  ;;  %v9998_v5 = vpack.i.bf16 %v11528_v22, %v11535_v43  ;;  %v750_v32 = vmul.f32 %v11312_v31, %v11228_v7  ;;  %v748_v2 = vmul.f32 %v11312_v31, %v11231_v45 }
 0x221   :  { %v4305_v4 = vsel %vm4207_vm6, %v4118_v37, %v4114_v11  ;;  %v1920_v56 = vcombine.high %v944_v23, %v944_v23  ;;  %v1927_v42 = vrot.slane %v944_v23, %v10769_v57  ;;  %9994 = vrot.lane.b32.xlu0 %v9993_v61, %s10421_s26  ;;  %v751_v44 = vmul.f32 %v11312_v31, %v11234_v60 }
 0x222   :  { %v4306_v50 = vsel %vm4209_vm7, %v4122_v49, %v4305_v4  ;;  %9999 = vrot.lane.b32.xlu1 %v9998_v5, %s10422_s30  ;;  %v821_v55 = vadd.f32 %v11326_v16, %v750_v32  ;;  %v819_v7 = vadd.f32 %v11326_v16, %v748_v2  ;;  %v749_v45 = vmul.f32 %v11312_v31, %v11247_v36 }
 0x223   :  { %v1934_v33 = vrot.slane %v1920_v56, %v10769_v57  ;;  %v1935_v27 = vcombine.high %v1927_v42, %v1927_v42  ;;  %v9201_v1 = vrot.slane %v1927_v42, 9  ;;  %v4307_v30 = vsel %vm4211_vm8, %v4126_v6, %v4306_v50  ;;  %v11569_v50 = vld [vmem:[#allocation2 + $0xd0] sm:$0xff] }
 0x224   :  { %v885_v19 = vmul.f32 0.1, %v821_v55  ;;  %v883_v25 = vmul.f32 0.1, %v819_v7  ;;  %v822_v60 = vadd.f32 %v11326_v16, %v751_v44  ;;  %v820_v39 = vadd.f32 %v11326_v16, %v749_v45 }
 0x225   :  { %v1936_v9 = vcombine.high %v1934_v33, %v1934_v33  ;;  %v9202_v35 = vrot.slane %v1935_v27, 9  ;;  %v9203_v18 = vrot.slane %v1934_v33, 9  ;;  %v3343_v14 = vmax.f32 %v1927_v42, %v9201_v1 }
 0x226   :  { %v949_v12 = vmax.f32 %v821_v55, %v885_v19  ;;  %v947_v17 = vmax.f32 %v819_v7, %v883_v25  ;;  %v886_v62 = vmul.f32 0.1, %v822_v60  ;;  %v884_v36 = vmul.f32 0.1, %v820_v39 }
 0x227   :  { %v9204_v31 = vrot.slane %v1936_v9, 9  ;;  %v3344_v28 = vmax.f32 %v1935_v27, %v9202_v35  ;;  %v3345_v24 = vmax.f32 %v1934_v33, %v9203_v18  ;;  %v3495_v40 = vmax.f32 %v3343_v14, %v3351_v51 }
 0x228   :  { %v2005_v63 = vcombine.high %v949_v12, %v949_v12  ;;  %v2012_v29 = vrot.slane %v949_v12, %v10769_v57  ;;  %v1971_v15 = vcombine.high %v947_v17, %v947_v17  ;;  %v1978_v26 = vrot.slane %v947_v17, %v10769_v57 }
 0x229   :  { %v3346_v48 = vmax.f32 %v1936_v9, %v9204_v31  ;;  %v3496_v16 = vmax.f32 %v3344_v28, %v3352_v8  ;;  %v3497_v54 = vmax.f32 %v3345_v24, %v3353_v10  ;;  %v4130_v41 = vrot.slane %v3495_v40, %v10774_v0 }
 0x22a   :  { %v2019_v34 = vrot.slane %v2005_v63, %v10769_v57  ;;  %v2020_v21 = vcombine.high %v2012_v29, %v2012_v29  ;;  %v9221_v11 = vrot.slane %v2012_v29, 9  ;;  %v1985_v49 = vrot.slane %v1971_v15, %v10769_v57 }
 0x22b   :  { %v3498_v3 = vmax.f32 %v3346_v48, %v3354_v59  ;;  %v4134_v51 = vrot.slane %v3496_v16, %v10774_v0  ;;  %v4138_v37 = vrot.slane %v3497_v54, %v10774_v0  ;;  %v4308_v6 = vsel %vm4213_vm9, %v4130_v41, %v4307_v30 }
 0x22c   :  { %v2021_v23 = vcombine.high %v2019_v34, %v2019_v34  ;;  %v9222_v61 = vrot.slane %v2020_v21, 9  ;;  %v9223_v5 = vrot.slane %v2019_v34, 9  ;;  %v3363_v8 = vmax.f32 %v2012_v29, %v9221_v11  ;;  %v11579_v29 = vpop.permute.xlu1 %9869 }
 0x22d   :  { %v4142_v10 = vrot.slane %v3498_v3, %v10774_v0  ;;  %v4309_v32 = vsel %vm4215_vm10, %v4134_v51, %v4308_v6  ;;  %v1986_v2 = vcombine.high %v1978_v26, %v1978_v26  ;;  %v1987_v4 = vcombine.high %v1985_v49, %v1985_v49  ;;  %v11587_v51 = vld [vmem:[#allocation2 + $0xd1] sm:$0xff] }
 0x22e   :  { %v4310_v56 = vsel %vm4217_vm11, %v4138_v37, %v4309_v32  ;;  %v9224_v42 = vrot.slane %v2021_v23, 9  ;;  %v3364_v59 = vmax.f32 %v2020_v21, %v9222_v61  ;;  %v3365_v44 = vmax.f32 %v2019_v34, %v9223_v5 }
 0x22f   :  { %v4311_v55 = vsel %vm4219_vm12, %v4142_v10, %v4310_v56  ;;  %v9213_v7 = vrot.slane %v1978_v26, 9  ;;  %v9214_v45 = vrot.slane %v1986_v2, 9  ;;  %v9215_v33 = vrot.slane %v1985_v49, 9 }
 0x230   :  { %4356 = vst.msk [vmem:[#allocation2 + $0x101] sm:$0xff] %vm3515_vm3, %v4311_v55  ;;  %v3366_v27 = vmax.f32 %v2021_v23, %v9224_v42  ;;  %v9216_v1 = vrot.slane %v1987_v4, 9  ;;  %v950_v30 = vmax.f32 %v822_v60, %v886_v62  ;;  %v948_v19 = vmax.f32 %v820_v39, %v884_v36  ;;  %v11590_v5 = vpop.permute.xlu1 %9879 }
 0x231   :  { %v3355_v25 = vmax.f32 %v1978_v26, %v9213_v7  ;;  %v3356_v9 = vmax.f32 %v1986_v2, %v9214_v45  ;;  %v3357_v35 = vmax.f32 %v1985_v49, %v9215_v33  ;;  %v10003_v18 = vpack.i.bf16 %v11569_v50, %v11528_v22 }
 0x232   :  { %v3358_v14 = vmax.f32 %v1987_v4, %v9216_v1  ;;  %v2022_v12 = vcombine.high %v950_v30, %v950_v30  ;;  %v2029_v17 = vrot.slane %v950_v30, %v10769_v57  ;;  %v1988_v31 = vcombine.high %v948_v19, %v948_v19  ;;  %v11592_v4 = vld [vmem:[#allocation2 + $0xc1] sm:$0xff]  ;;  %v11601_v1 = vld [vmem:[#allocation2 + $0xd2] sm:$0xff]  ;;  %v11603_v30 = vpop.permute.xlu0 %9864 }
 0x233   :  { %v3499_v28 = vmax.f32 %v3355_v25, %v3363_v8  ;;  %v3500_v24 = vmax.f32 %v3356_v9, %v3364_v59  ;;  %v3501_v40 = vmax.f32 %v3357_v35, %v3365_v44  ;;  %v1995_v63 = vrot.slane %v948_v19, %v10769_v57  ;;  %10004 = vrot.lane.b32.xlu0 %v10003_v18, %s10420_s25  ;;  %v10415_v44 = vld [vmem:[%s12980_s2] ss:$0 sm:$0xff] }
 0x234   :  { %v3502_v60 = vmax.f32 %v3358_v14, %v3366_v27  ;;  %v2036_v39 = vrot.slane %v2022_v12, %v10769_v57  ;;  %v2037_v62 = vcombine.high %v2029_v17, %v2029_v17  ;;  %v9225_v36 = vrot.slane %v2029_v17, 9  ;;  %v11609_v19 = vld [vmem:[%s12981_s3] ss:$0 sm:$0xff]  ;;  %v11615_v35 = vpop.permute.xlu1 %9884 }
 0x235   :  { %v4146_v22 = vrot.slane %v3499_v28, %v10774_v0  ;;  %v4150_v15 = vrot.slane %v3500_v24, %v10774_v0  ;;  %v4154_v26 = vrot.slane %v3501_v40, %v10774_v0  ;;  %v2002_v48 = vrot.slane %v1988_v31, %v10769_v57 }
 0x236   :  { %v4158_v16 = vrot.slane %v3502_v60, %v10774_v0  ;;  %v2038_v54 = vcombine.high %v2036_v39, %v2036_v39  ;;  %v9226_v41 = vrot.slane %v2037_v62, 9  ;;  %v9227_v34 = vrot.slane %v2036_v39, 9 }
 0x237   :  { %v4312_v21 = vsel %vm4207_vm6, %v4150_v15, %v4146_v22  ;;  %v3367_v11 = vmax.f32 %v2029_v17, %v9225_v36  ;;  %v2003_v49 = vcombine.high %v1995_v63, %v1995_v63  ;;  %v2004_v3 = vcombine.high %v2002_v48, %v2002_v48 }
 0x238   :  { %v4313_v37 = vsel %vm4209_vm7, %v4154_v26, %v4312_v21  ;;  %v9228_v6 = vrot.slane %v2038_v54, 9  ;;  %v3368_v23 = vmax.f32 %v2037_v62, %v9226_v41  ;;  %v3369_v61 = vmax.f32 %v2036_v39, %v9227_v34  ;;  %v11628_v62 = vpop.permute.xlu0 %9874 }
 0x239   :  { %v9217_v8 = vrot.slane %v1995_v63, 9  ;;  %v9218_v10 = vrot.slane %v2003_v49, 9  ;;  %v9219_v32 = vrot.slane %v2002_v48, 9  ;;  %v9220_v2 = vrot.slane %v2004_v3, 9 }
 0x23a   :  { %v3370_v56 = vmax.f32 %v2038_v54, %v9228_v6  ;;  %v4314_v42 = vsel %vm4211_vm8, %v4158_v16, %v4313_v37  ;;  %v10013_v59 = vpack.i.bf16 %v11587_v51, %v11592_v4  ;;  %v754_v55 = vmul.f32 %v10415_v44, %v11287_v58  ;;  %v11644_v37 = vld [vmem:[#allocation2 + $0xe1] sm:$0xff]  ;;  %v11646_v6 = vpop.permute.xlu1 %9894 }
 0x23b   :  { %v3359_v7 = vmax.f32 %v1995_v63, %v9217_v8  ;;  %v3360_v45 = vmax.f32 %v2003_v49, %v9218_v10  ;;  %v3361_v33 = vmax.f32 %v2002_v48, %v9219_v32  ;;  %v3362_v27 = vmax.f32 %v2004_v3, %v9220_v2  ;;  %v11621_v63 = vld [vmem:[#allocation2 + $0xe2] sm:$0xff]  ;;  %v11634_v48 = vld [vmem:[#allocation2 + $0xf1] sm:$0xff] }
 0x23c   :  { %10014 = vrot.lane.b32.xlu1 %v10013_v59, %s10421_s26  ;;  %v825_v25 = vadd.f32 %v11609_v19, %v754_v55  ;;  %v752_v9 = vmul.f32 %v10415_v44, %v11290_v46  ;;  %v755_v58 = vmul.f32 %v10415_v44, %v11292_v20  ;;  %10009 = vrot.lane.b32.xlu0 %v10013_v59, %s10422_s30  ;;  %v11623_v46 = vld [vmem:[#allocation2 + $0xe0] sm:$0xff]  ;;  %v11654_v10 = vpop.permute.xlu0 %9889 }
 0x23d   :  { %v3503_v18 = vmax.f32 %v3359_v7, %v3367_v11  ;;  %v3504_v14 = vmax.f32 %v3360_v45, %v3368_v23  ;;  %v3505_v12 = vmax.f32 %v3361_v33, %v3369_v61  ;;  %v3506_v17 = vmax.f32 %v3362_v27, %v3370_v56 }
 0x23e   :  { %v889_v31 = vmul.f32 0.1, %v825_v25  ;;  %v823_v28 = vadd.f32 %v11609_v19, %v752_v9  ;;  %v826_v24 = vadd.f32 %v11609_v19, %v755_v58  ;;  %v10018_v40 = vpack.i.bf16 %v11601_v1, %v11525_v13  ;;  %v11632_v13 = vld [vmem:[#allocation2 + $0xf0] sm:$0xff] }
 0x23f   :  { %v4162_v20 = vrot.slane %v3503_v18, %v10774_v0  ;;  %v4166_v60 = vrot.slane %v3504_v14, %v10774_v0  ;;  %v4170_v39 = vrot.slane %v3505_v12, %v10774_v0  ;;  %v4174_v36 = vrot.slane %v3506_v17, %v10774_v0 }
 0x240   :  { %v953_v22 = vmax.f32 %v825_v25, %v889_v31  ;;  %v887_v15 = vmul.f32 0.1, %v823_v28  ;;  %v890_v26 = vmul.f32 0.1, %v826_v24  ;;  %10019 = vrot.lane.b32.xlu1 %v10018_v40, %s10420_s25  ;;  %v753_v54 = vmul.f32 %v10415_v44, %v11305_v52  ;;  %v11665_v12 = vpop.permute.xlu0 %9904  ;;  %v11668_v40 = vpop.permute.xlu1 %9899 }
 0x241   :  { %v4315_v16 = vsel %vm4213_vm9, %v4162_v20, %v4314_v42  ;;  %v10023_v41 = vpack.i.bf16 %v11621_v63, %v11601_v1  ;;  %v10028_v34 = vpack.i.bf16 %v11623_v46, %v11569_v50  ;;  %v10033_v52 = vpack.i.bf16 %v11632_v13, %v11623_v46 }
 0x242   :  { %v4316_v21 = vsel %vm4215_vm10, %v4166_v60, %v4315_v16  ;;  %v2073_v11 = vcombine.high %v953_v22, %v953_v22  ;;  %v2080_v49 = vrot.slane %v953_v22, %v10769_v57  ;;  %v951_v3 = vmax.f32 %v823_v28, %v887_v15 }
 0x243   :  { %v4317_v23 = vsel %vm4217_vm11, %v4170_v39, %v4316_v21  ;;  %v954_v61 = vmax.f32 %v826_v24, %v890_v26  ;;  %10024 = vrot.lane.b32.xlu0 %v10023_v41, %s10421_s26  ;;  %v10043_v8 = vpack.i.bf16 %v11634_v48, %v11644_v37  ;;  %v824_v26 = vadd.f32 %v11609_v19, %v753_v54  ;;  %v11679_v54 = vld [vmem:[#allocation2 + $0x100] sm:$0xff] }
 0x244   :  { %v4318_v32 = vsel %vm4219_vm12, %v4174_v36, %v4317_v23  ;;  %v2087_v2 = vrot.slane %v2073_v11, %v10769_v57  ;;  %v2088_v56 = vcombine.high %v2080_v49, %v2080_v49  ;;  %v9237_v42 = vrot.slane %v2080_v49, 9  ;;  %10029 = vrot.lane.b32.xlu1 %v10028_v34, %s10422_s30  ;;  %v11672_v11 = vld [vmem:[#allocation2 + $0xf2] sm:$0xff] }
 0x245   :  { %4357 = vst.msk [vmem:[#allocation2 + $0x111] sm:$0xff] %vm3515_vm3, %v4318_v32  ;;  %v2039_v59 = vcombine.high %v951_v3, %v951_v3  ;;  %v2046_v44 = vrot.slane %v951_v3, %v10769_v57  ;;  %v2090_v55 = vcombine.high %v954_v61, %v954_v61  ;;  %v2097_v7 = vrot.slane %v954_v61, %v10769_v57  ;;  %v11676_v61 = vld [vmem:[#allocation2 + $0x102] sm:$0xff] }
 0x246   :  { %v2089_v45 = vcombine.high %v2087_v2, %v2087_v2  ;;  %v9238_v33 = vrot.slane %v2088_v56, 9  ;;  %v9239_v27 = vrot.slane %v2087_v2, 9  ;;  %v3379_v25 = vmax.f32 %v2080_v49, %v9237_v42  ;;  %v11674_v49 = vpop.permute.xlu0 %9914 }
 0x247   :  { %v2053_v9 = vrot.slane %v2039_v59, %v10769_v57  ;;  %v2054_v58 = vcombine.high %v2046_v44, %v2046_v44  ;;  %v9229_v18 = vrot.slane %v2046_v44, 9  ;;  %v2104_v14 = vrot.slane %v2090_v55, %v10769_v57  ;;  %10034 = vrot.lane.b32.xlu0 %v10033_v52, %s10420_s25 }
 0x248   :  { %v9240_v17 = vrot.slane %v2089_v45, 9  ;;  %v3380_v31 = vmax.f32 %v2088_v56, %v9238_v33  ;;  %v3381_v28 = vmax.f32 %v2087_v2, %v9239_v27  ;;  %v2105_v24 = vcombine.high %v2097_v7, %v2097_v7  ;;  %10044 = vrot.lane.b32.xlu1 %v10043_v8, %s10421_s26 }
 0x249   :  { %v2055_v20 = vcombine.high %v2053_v9, %v2053_v9  ;;  %v9230_v60 = vrot.slane %v2054_v58, 9  ;;  %v9231_v39 = vrot.slane %v2053_v9, 9  ;;  %v3371_v36 = vmax.f32 %v2046_v44, %v9229_v18 }
 0x24a   :  { %v3382_v22 = vmax.f32 %v2089_v45, %v9240_v17  ;;  %v2106_v15 = vcombine.high %v2104_v14, %v2104_v14  ;;  %v9241_v3 = vrot.slane %v2097_v7, 9  ;;  %v9242_v23 = vrot.slane %v2105_v24, 9  ;;  %v11686_v45 = vpop.permute.xlu1 %9909 }
 0x24b   :  { %v9232_v16 = vrot.slane %v2055_v20, 9  ;;  %v3372_v41 = vmax.f32 %v2054_v58, %v9230_v60  ;;  %v3373_v34 = vmax.f32 %v2053_v9, %v9231_v39  ;;  %v3507_v21 = vmax.f32 %v3371_v36, %v3379_v25  ;;  %10039 = vrot.lane.b32.xlu0 %v10043_v8, %s10422_s30 }
 0x24c   :  { %v9872_v52 = vunpack.i.h.bf16 %v11579_v29  ;;  %v9243_v19 = vrot.slane %v2104_v14, 9  ;;  %v9244_v59 = vrot.slane %v2106_v15, 9  ;;  %v888_v8 = vmul.f32 0.1, %v824_v26  ;;  %v11684_v55 = vld [vmem:[#allocation2 + $0x110] sm:$0xff] }
 0x24d   :  { %v3374_v32 = vmax.f32 %v2055_v20, %v9232_v16  ;;  %v3508_v2 = vmax.f32 %v3372_v41, %v3380_v31  ;;  %v3509_v56 = vmax.f32 %v3373_v34, %v3381_v28  ;;  %v4178_v42 = vrot.slane %v3507_v21, %v10774_v0  ;;  %v11702_v39 = vld [vmem:[#allocation2 + $0x111] sm:$0xff] }
 0x24e   :  { %v10048_v44 = vpack.i.bf16 %v11672_v11, %v11621_v63  ;;  %v10053_v9 = vpack.i.bf16 %v11676_v61, %v11672_v11  ;;  %v3383_v58 = vmax.f32 %v2097_v7, %v9241_v3  ;;  %v11692_v18 = vmax.f32 %v2105_v24, %v9242_v23  ;;  %v11705_v24 = vpop.permute.xlu0 %9919  ;;  %v11709_v41 = vld [vmem:[#allocation2 + $0x112] sm:$0xff]  ;;  %v11712_v3 = vld [vmem:[#allocation2 + $0x101] sm:$0xff] }
 0x24f   :  { %v3510_v33 = vmax.f32 %v3374_v32, %v3382_v22  ;;  %v4182_v27 = vrot.slane %v3508_v2, %v10774_v0  ;;  %v4186_v25 = vrot.slane %v3509_v56, %v10774_v0  ;;  %v952_v17 = vmax.f32 %v824_v26, %v888_v8  ;;  %v4360_v8 = vld [vmem:[#allocation2 + $0x10] sm:$0xff] }
 0x250   :  { %10049 = vrot.lane.b32.xlu1 %v10048_v44, %s10420_s25  ;;  %v10058_v31 = vpack.i.bf16 %v11679_v54, %v11632_v13  ;;  %10054 = vrot.lane.b32.xlu0 %v10053_v9, %s10421_s26  ;;  %v10063_v60 = vpack.i.bf16 %v11684_v55, %v11679_v54  ;;  %v9867_v7 = vunpack.i.h.bf16 %v11603_v30  ;;  %v3385_v22 = vmax.f32 %v2104_v14, %v9243_v19  ;;  %v4359_v19 = vld [vmem:[#allocation2] sm:$0xff] }
 0x251   :  { %v4190_v28 = vrot.slane %v3510_v33, %v10774_v0  ;;  %v4319_v20 = vsel %vm4207_vm6, %v4182_v27, %v4178_v42  ;;  %v2056_v26 = vcombine.high %v952_v17, %v952_v17  ;;  %v2063_v16 = vrot.slane %v952_v17, %v10769_v57 }
 0x252   :  { %v4320_v36 = vsel %vm4209_vm7, %v4186_v25, %v4319_v20  ;;  %v3386_v34 = vmax.f32 %v2106_v15, %v9244_v59  ;;  %v9866_v23 = vunpack.i.l.bf16 %v11603_v30  ;;  %v9877_v32 = vunpack.i.h.bf16 %v11628_v62  ;;  %v11720_v15 = vpop.permute.xlu1 %9924 }
 0x253   :  { %v4321_v21 = vsel %vm4211_vm8, %v4190_v28, %v4320_v36  ;;  %v2070_v2 = vrot.slane %v2056_v26, %v10769_v57  ;;  %v2071_v56 = vcombine.high %v2063_v16, %v2063_v16  ;;  %v9233_v42 = vrot.slane %v2063_v16, 9 }
 0x254   :  { %10059 = vrot.lane.b32.xlu1 %v10058_v31, %s10422_s30  ;;  %v10073_v14 = vpack.i.bf16 %v11702_v39, %v11712_v3  ;;  %10064 = vrot.lane.b32.xlu0 %v10063_v60, %s10420_s25  ;;  %v9871_v59 = vunpack.i.l.bf16 %v11579_v29  ;;  %v4889_v30 = vsel %vm3515_vm3, %v4360_v8, %v9867_v7  ;;  %v10078_v44 = vpack.i.bf16 %v11709_v41, %v11676_v61  ;;  %v4424_v31 = vld [vmem:[#allocation2 + $0x21] sm:$0xff]  ;;  %v11730_v60 = vpop.permute.xlu0 %9934 }
 0x255   :  { %v9876_v33 = vunpack.i.l.bf16 %v11628_v62  ;;  %v2072_v27 = vcombine.high %v2070_v2, %v2070_v2  ;;  %v9234_v25 = vrot.slane %v2071_v56, 9  ;;  %v9235_v9 = vrot.slane %v2070_v2, 9  ;;  %v4423_v62 = vld [vmem:[#allocation2 + $0x11] sm:$0xff] }
 0x256   :  { %v3375_v17 = vmax.f32 %v2063_v16, %v9233_v42  ;;  %v4888_v28 = vsel %vm3515_vm3, %v4359_v19, %v9866_v23  ;;  %v4939_v20 = vsel %vm3515_vm3, %v4424_v31, %v9877_v32  ;;  %v9882_v42 = vunpack.i.h.bf16 %v11590_v5 }
 0x257   :  { %v9236_v36 = vrot.slane %v2072_v27, 9  ;;  %v3376_v7 = vmax.f32 %v2071_v56, %v9234_v25  ;;  %v3377_v26 = vmax.f32 %v2070_v2, %v9235_v9  ;;  %v4938_v16 = vsel %vm3515_vm3, %v4423_v62, %v9876_v33 }
 0x258   :  { %v3511_v8 = vmax.f32 %v3375_v17, %v3383_v58  ;;  %10074 = vrot.lane.b32.xlu1 %v10073_v14, %s10421_s26  ;;  %10069 = vrot.lane.b32.xlu0 %v10073_v14, %s10422_s30  ;;  %v9881_v23 = vunpack.i.l.bf16 %v11590_v5  ;;  %v9891_v32 = vunpack.i.l.bf16 %v11654_v10  ;;  %v11740_v58 = vpop.permute.xlu1 %9929  ;;  %v4905_v56 = vsel %vm4904_vm13, %v4888_v28, %v9871_v59  ;;  %v11746_v9 = vpop.permute.xlu0 %9944 }
 0x259   :  { %v3378_v19 = vmax.f32 %v2072_v27, %v9236_v36  ;;  %v3512_v31 = vmax.f32 %v3376_v7, %v11692_v18  ;;  %v3513_v38 = vmax.f32 %v3377_v26, %v3385_v22  ;;  %v9892_v14 = vunpack.i.h.bf16 %v11654_v10 }
 0x25a   :  { %v4194_v2 = vrot.slane %v3511_v8, %v10774_v0  ;;  %v9887_v33 = vunpack.i.h.bf16 %v11615_v35  ;;  %v9886_v25 = vunpack.i.l.bf16 %v11615_v35  ;;  %v4906_v22 = vsel %vm4904_vm13, %v4889_v30, %v9872_v52 }
 0x25b   :  { %v3514_v5 = vmax.f32 %v3378_v19, %v3386_v34  ;;  %v4198_v27 = vrot.slane %v3512_v31, %v10774_v0  ;;  %v4202_v59 = vrot.slane %v3513_v38, %v10774_v0  ;;  %v4923_v10 = vsel %vm4921_vm14, %v4906_v22, %v9882_v42  ;;  %v4362_v19 = vld [vmem:[#allocation2 + $0x30] sm:$0xff] }
 0x25c   :  { %v4322_v18 = vsel %vm4213_vm9, %v4194_v2, %v4321_v21  ;;  %10079 = vrot.lane.b32.xlu1 %v10078_v44, %s10420_s25  ;;  %v4955_v17 = vsel %vm4904_vm13, %v4939_v20, %v9887_v33  ;;  %v4954_v35 = vsel %vm4904_vm13, %v4938_v16, %v9886_v25  ;;  %v4922_v21 = vsel %vm4921_vm14, %v4905_v56, %v9881_v23  ;;  %v11768_v26 = vpop.permute.xlu1 %9939  ;;  %v11774_v23 = vpop.permute.xlu0 %9949  ;;  %v4425_v33 = vld [vmem:[#allocation2 + $0x31] sm:$0xff]  ;;  %v4426_v25 = vld [vmem:[#allocation2 + $0x41] sm:$0xff] }
 0x25d   :  { %v4206_v34 = vrot.slane %v3514_v5, %v10774_v0  ;;  %v4323_v28 = vsel %vm4215_vm10, %v4198_v27, %v4322_v18  ;;  %v4970_v44 = vsel %vm4921_vm14, %v4954_v35, %v9891_v32  ;;  %v9897_v52 = vunpack.i.h.bf16 %v11646_v6  ;;  %v4361_v32 = vld [vmem:[#allocation2 + $0x20] sm:$0xff] }
 0x25e   :  { %v4324_v29 = vsel %vm4217_vm11, %v4202_v59, %v4323_v28  ;;  %v9896_v38 = vunpack.i.l.bf16 %v11646_v6  ;;  %v4971_v30 = vsel %vm4921_vm14, %v4955_v17, %v9892_v14  ;;  %v9902_v7 = vunpack.i.h.bf16 %v11668_v40  ;;  %v10154_v6 = vld [vmem:[%s12982_s4 + $0x88] sm:$0xff]  }
 0x25f   :  { %v4325_v20 = vsel %vm4219_vm12, %v4206_v34, %v4324_v29  ;;  %v4987_v36 = vpack.c.bf16 %v4971_v30, %v4970_v44  ;;  %v4986_v8 = vpack.c.bf16 %v4923_v10, %v4922_v21  ;;  %v9901_v62 = vunpack.i.l.bf16 %v11668_v40  ;;  %v4363_v30 = vld [vmem:[#allocation2 + $0x40] sm:$0xff] }
 0x260   :  { %4358 = vst.msk [vmem:[#allocation2 + $0x121] sm:$0xff] %vm3515_vm3, %v4325_v20  ;;  %v9907_v16 = vunpack.i.h.bf16 %v11665_v12  ;;  %v9906_v42 = vunpack.i.l.bf16 %v11665_v12  ;;  %v9917_v31 = vunpack.i.h.bf16 %v11674_v49  ;;  %v9916_v2 = vunpack.i.l.bf16 %v11674_v49  ;;  %v11788_v22 = vpop.permute.xlu1 %9954 }
 0x261   :  { %5210 = vmatprep.mubr.bf16.mxu1 %v4987_v36  ;;  %v4890_v56 = vsel %vm3515_vm3, %v4361_v32, %v9896_v38  ;;  %v4891_v40 = vsel %vm3515_vm3, %v4362_v19, %v9897_v52  ;;  %v9922_v12 = vunpack.i.h.bf16 %v11705_v24  ;;  %v9912_v5 = vunpack.i.h.bf16 %v11686_v45  ;;  %v4427_v19 = vld [vmem:[#allocation2 + $0x51] sm:$0xff] }
 0x262   :  { %5211 = vmatmul.mubr.bf16.vlgmr.msra.gmra.mrb[64].mxu1 %v4986_v8  ;;  %v4908_v14 = vsel %vm4904_vm13, %v4891_v40, %v9902_v7  ;;  %v9911_v27 = vunpack.i.l.bf16 %v11686_v45  ;;  %v9921_v18 = vunpack.i.l.bf16 %v11705_v24  ;;  %v4907_v49 = vsel %vm4904_vm13, %v4890_v56, %v9901_v62  ;;  %v4364_v62 = vld [vmem:[#allocation2 + $0x50] sm:$0xff] }
 0x263   :  { %9809 = vmatpush3.bf16.msra.mxu1 %v11517_v53  ;;  %v4940_v59 = vsel %vm3515_vm3, %v4425_v33, %v9906_v42  ;;  %v4941_v10 = vsel %vm3515_vm3, %v4426_v25, %v9907_v16  ;;  %v9926_v17 = vunpack.i.l.bf16 %v11720_v15  ;;  %v9927_v45 = vunpack.i.h.bf16 %v11720_v15  ;;  %v4471_v42 = vld [vmem:[#allocation2 + $0x130] sm:$0xff] }
 0x264   :  { %9810 = vmatprep.subr.bf16.mxu1 %v10154_v6  ;;  %v4957_v35 = vsel %vm4904_vm13, %v4941_v10, %v9917_v31  ;;  %v4956_v34 = vsel %vm4904_vm13, %v4940_v59, %v9916_v2  ;;  %v9932_v24 = vunpack.i.h.bf16 %v11740_v58  ;;  %v9931_v28 = vunpack.i.l.bf16 %v11740_v58  ;;  %v9960_v56 = vpop.permute.xlu1 %9959  ;;  %v4487_v40 = vld [vmem:[#allocation2 + $0x131] sm:$0xff] }
 0x265   :  { %v9937_v53 = vunpack.i.h.bf16 %v11730_v60  ;;  %v4972_v21 = vsel %vm4921_vm14, %v4956_v34, %v9921_v18  ;;  %v4973_v44 = vsel %vm4921_vm14, %v4957_v35, %v9922_v12  ;;  %v9936_v20 = vunpack.i.l.bf16 %v11730_v60 }
 0x266   :  { %v4990_v36 = vpack.c.bf16 %v4973_v44, %v4972_v21  ;;  %v4924_v15 = vsel %vm4921_vm14, %v4907_v49, %v9911_v27  ;;  %v4925_v7 = vsel %vm4921_vm14, %v4908_v14, %v9912_v5  ;;  %v4892_v16 = vsel %vm3515_vm3, %v4363_v30, %v9926_v17  ;;  %v4428_v14 = vld [vmem:[#allocation2 + $0x61] sm:$0xff]  ;;  %v4429_v30 = vld [vmem:[#allocation2 + $0x71] sm:$0xff] }
 0x267   :  { %v9965_v29 = vpop.permute.xlu0 %9964  ;;  %v11803_v52 = vld [vmem:[#allocation2 + $0x122] sm:$0xff]  ;;  %9811 = vmatpush3.bf16.msra.mxu1 %v10154_v6  ;;  %v4893_v32 = vsel %vm3515_vm3, %v4364_v62, %v9927_v45  ;;  %v4989_v60 = vpack.c.bf16 %v4925_v7, %v4924_v15  ;;  %v9947_v31 = vunpack.i.h.bf16 %v11746_v9  ;;  %v9946_v2 = vunpack.i.l.bf16 %v11746_v9 }
 0x268   :  { %v4422_v38 = vld [vmem:[#allocation2 + $0x120] sm:$0xff]  ;;  %v10083_v58 = vpack.i.bf16 %v11803_v52, %v11709_v41  ;;  %5218 = vmatprep.mubr.bf16.mxu1 %v4990_v36  ;;  %v4910_v12 = vsel %vm4904_vm13, %v4893_v32, %v9932_v24  ;;  %v9941_v33 = vunpack.i.l.bf16 %v11768_v26  ;;  %v9952_v25 = vunpack.i.h.bf16 %v11774_v23 }
 0x269   :  { %v10098_v8 = vpack.i.bf16 %v4422_v38, %v11684_v55  ;;  %v11817_v6 = vld [vmem:[#allocation2 + $0x121] sm:$0xff]  ;;  %v9951_v5 = vunpack.i.l.bf16 %v11774_v23  ;;  %v4909_v9 = vsel %vm4904_vm13, %v4892_v16, %v9931_v28  ;;  %v4942_v18 = vsel %vm3515_vm3, %v4427_v19, %v9936_v20  ;;  %v9980_v20 = vpop.permute.xlu1 %9979 }
 0x26a   :  { %10084 = vrot.lane.b32.xlu0 %v10083_v58, %s10421_s26  ;;  %v4943_v49 = vsel %vm3515_vm3, %v4428_v14, %v9937_v53  ;;  %v9942_v59 = vunpack.i.h.bf16 %v11768_v26  ;;  %5219 = vmatmul.mubr.bf16.gmra.mrb[68].mxu1 %v4989_v60  ;;  %v10088_v10 = vpack.i.bf16 %v4471_v42, %v4422_v38  ;;  %v4958_v17 = vsel %vm4904_vm13, %v4942_v18, %v9946_v2  ;;  %v4365_v14 = vld [vmem:[#allocation2 + $0x60] sm:$0xff] }
 0x26b   :  { %10099 = vrot.lane.b32.xlu1 %v10098_v8, %s10422_s30  ;;  %v9970_v27 = vpop.permute.xlu0 %9969  ;;  %v9967_v35 = vunpack.i.h.bf16 %v9965_v29  ;;  %v9966_v34 = vunpack.i.l.bf16 %v9965_v29  ;;  %v10093_v45 = vpack.i.bf16 %v4487_v40, %v11817_v6  ;;  %v4959_v24 = vsel %vm4904_vm13, %v4943_v49, %v9947_v31  ;;  %v4430_v29 = vld [vmem:[#allocation2 + $0x81] sm:$0xff] }
 0x26c   :  { %v9957_v23 = vunpack.i.h.bf16 %v11788_v22  ;;  %v4974_v28 = vsel %vm4921_vm14, %v4958_v17, %v9951_v5  ;;  %v9956_v53 = vunpack.i.l.bf16 %v11788_v22  ;;  %v9962_v21 = vunpack.i.h.bf16 %v9960_v56 }
 0x26d   :  { %v4975_v26 = vsel %vm4921_vm14, %v4959_v24, %v9952_v25  ;;  %v4926_v44 = vsel %vm4921_vm14, %v4909_v9, %v9941_v33  ;;  %v4927_v15 = vsel %vm4921_vm14, %v4910_v12, %v9942_v59  ;;  %v9972_v7 = vunpack.i.h.bf16 %v9970_v27  ;;  %v4366_v33 = vld [vmem:[#allocation2 + $0x70] sm:$0xff] }
 0x26e   :  { %10089 = vrot.lane.b32.xlu0 %v10088_v10, %s10420_s25  ;;  %v4993_v36 = vpack.c.bf16 %v4975_v26, %v4974_v28  ;;  %v9971_v58 = vunpack.i.l.bf16 %v9970_v27  ;;  %v4944_v8 = vsel %vm3515_vm3, %v4429_v30, %v9966_v34  ;;  %v4945_v62 = vsel %vm3515_vm3, %v4430_v29, %v9967_v35  ;;  %v4367_v26 = vld [vmem:[#allocation2 + $0xa0] sm:$0xff] }
 0x26f   :  { %v9975_v38 = vpop.permute.xlu0 %9974  ;;  %v9961_v42 = vunpack.i.l.bf16 %v9960_v56  ;;  %v4992_v32 = vpack.c.bf16 %v4927_v15, %v4926_v44  ;;  %v4961_v60 = vsel %vm4904_vm13, %v4945_v62, %v9972_v7  ;;  %v9982_v31 = vunpack.i.h.bf16 %v9980_v20 }
 0x270   :  { %v9977_v16 = vunpack.i.h.bf16 %v9975_v38  ;;  %v9976_v22 = vunpack.i.l.bf16 %v9975_v38  ;;  %5226 = vmatprep.mubr.bf16.mxu1 %v4993_v36  ;;  %v4960_v19 = vsel %vm4904_vm13, %v4944_v8, %v9971_v58  ;;  %v9981_v2 = vunpack.i.l.bf16 %v9980_v20 }
 0x271   :  { %v4894_v56 = vsel %vm3515_vm3, %v4365_v14, %v9956_v53  ;;  %v4895_v5 = vsel %vm3515_vm3, %v4366_v33, %v9957_v23  ;;  %v5003_v27 = vpack.c.bf16 %v11672_v11, %v11621_v63  ;;  %v5006_v9 = vpack.c.bf16 %v11709_v41, %v11676_v61 }
 0x272   :  { %10094 = vrot.lane.b32.xlu0 %v10093_v45, %s10422_s30  ;;  %v4976_v40 = vsel %vm4921_vm14, %v4960_v19, %v9976_v22  ;;  %v4977_v12 = vsel %vm4921_vm14, %v4961_v60, %v9977_v16  ;;  %5227 = vmatmul.mubr.bf16.gmra.mrb[72].mxu1 %v4992_v32  ;;  %v4911_v18 = vsel %vm4904_vm13, %v4894_v56, %v9961_v42  ;;  %v4431_v16 = vld [vmem:[#allocation2 + $0xb1] sm:$0xff] }
 0x273   :  { %v4996_v25 = vpack.c.bf16 %v4977_v12, %v4976_v40  ;;  %v4912_v49 = vsel %vm4904_vm13, %v4895_v5, %v9962_v21  ;;  %v4928_v59 = vsel %vm4921_vm14, %v4911_v18, %v9981_v2 }
 0x274   :  { %v4929_v10 = vsel %vm4921_vm14, %v4912_v49, %v9982_v31 }
 0x275   :  { %5234 = vmatprep.mubr.bf16.mxu1 %v4996_v25  ;;  %v4995_v17 = vpack.c.bf16 %v4929_v10, %v4928_v59 }
 0x27a   :  { %5235 = vmatmul.mubr.bf16.gmra.mrb[76].mxu1 %v4995_v17 }
 0x27c   :  { %v9985_v35 = vpop.permute.xlu1 %9984 }
 0x27d   :  { %v9987_v23 = vunpack.i.h.bf16 %v9985_v35  ;;  %v9986_v28 = vunpack.i.l.bf16 %v9985_v35 }
 0x27f   :  { %v4896_v7 = vsel %vm3515_vm3, %v4367_v26, %v9986_v28  ;;  %v4897_v58 = vsel %vm3515_vm3, %v11535_v43, %v9987_v23 }
 0x280   :  { %v9990_v34 = vpop.permute.xlu1 %9989 }
 0x281   :  { %v9992_v44 = vunpack.i.h.bf16 %v9990_v34  ;;  %v9991_v38 = vunpack.i.l.bf16 %v9990_v34 }
 0x283   :  { %v4913_v8 = vsel %vm4904_vm13, %v4896_v7, %v9991_v38  ;;  %v4914_v62 = vsel %vm4904_vm13, %v4897_v58, %v9992_v44 }
 0x293   :  { %v9995_v45 = vpop.permute.xlu0 %9994 }
 0x294   :  { %v10000_v53 = vpop.permute.xlu1 %9999  ;;  %v9997_v30 = vunpack.i.h.bf16 %v9995_v45  ;;  %v9996_v29 = vunpack.i.l.bf16 %v9995_v45 }
 0x295   :  { %v10002_v21 = vunpack.i.h.bf16 %v10000_v53  ;;  %v10001_v20 = vunpack.i.l.bf16 %v10000_v53 }
 0x296   :  { %v4946_v32 = vsel %vm3515_vm3, %v4431_v16, %v9996_v29  ;;  %v4947_v19 = vsel %vm3515_vm3, %v11592_v4, %v9997_v30 }
 0x297   :  { %v4930_v43 = vsel %vm4921_vm14, %v4913_v8, %v10001_v20  ;;  %v4931_v12 = vsel %vm4921_vm14, %v4914_v62, %v10002_v21 }
 0x298   :  { %v4998_v5 = vpack.c.bf16 %v4931_v12, %v4930_v43 }
 0x2a5   :  { %v10005_v24 = vpop.permute.xlu0 %10004 }
 0x2a6   :  { %v10007_v36 = vunpack.i.h.bf16 %v10005_v24  ;;  %v10006_v15 = vunpack.i.l.bf16 %v10005_v24  ;;  %v4369_v24 = vld [vmem:[#allocation2 + $0xc0] sm:$0xff] }
 0x2a8   :  { %v4963_v2 = vsel %vm4904_vm13, %v4947_v19, %v10007_v36  ;;  %v4962_v40 = vsel %vm4904_vm13, %v4946_v32, %v10006_v15 }
 0x2ae   :  { %v10015_v22 = vpop.permute.xlu1 %10014  ;;  %v10010_v42 = vpop.permute.xlu0 %10009 }
 0x2af   :  { %v10012_v60 = vunpack.i.h.bf16 %v10010_v42  ;;  %v10011_v31 = vunpack.i.l.bf16 %v10010_v42  ;;  %v10017_v4 = vunpack.i.h.bf16 %v10015_v22  ;;  %v10016_v49 = vunpack.i.l.bf16 %v10015_v22 }
 0x2b1   :  { %v4978_v14 = vsel %vm4921_vm14, %v4962_v40, %v10011_v31  ;;  %v4979_v33 = vsel %vm4921_vm14, %v4963_v2, %v10012_v60  ;;  %v4898_v44 = vsel %vm3515_vm3, %v4369_v24, %v10016_v49  ;;  %v4899_v38 = vsel %vm3515_vm3, %v11569_v50, %v10017_v4 }
 0x2b2   :  { %v10020_v25 = vpop.permute.xlu1 %10019  ;;  %v4999_v56 = vpack.c.bf16 %v4979_v33, %v4978_v14 }
 0x2b3   :  { %v10022_v10 = vunpack.i.h.bf16 %v10020_v25  ;;  %v10021_v17 = vunpack.i.l.bf16 %v10020_v25 }
 0x2b4   :  { %5242 = vmatprep.mubr.bf16.mxu1 %v4999_v56 }
 0x2b5   :  { %v10025_v18 = vpop.permute.xlu0 %10024  ;;  %5243 = vmatmul.mubr.bf16.gmra.mrb[80].mxu1 %v4998_v5  ;;  %v4915_v29 = vsel %vm4904_vm13, %v4898_v44, %v10021_v17  ;;  %v4916_v21 = vsel %vm4904_vm13, %v4899_v38, %v10022_v10 }
 0x2b6   :  { %v10030_v59 = vpop.permute.xlu1 %10029  ;;  %v10027_v34 = vunpack.i.h.bf16 %v10025_v18  ;;  %v10026_v45 = vunpack.i.l.bf16 %v10025_v18 }
 0x2b7   :  { %v10032_v23 = vunpack.i.h.bf16 %v10030_v59  ;;  %v10031_v28 = vunpack.i.l.bf16 %v10030_v59 }
 0x2b8   :  { %v4948_v36 = vsel %vm3515_vm3, %v11587_v51, %v10026_v45  ;;  %v4949_v15 = vsel %vm3515_vm3, %v11644_v37, %v10027_v34 }
 0x2b9   :  { %v10035_v35 = vpop.permute.xlu0 %10034  ;;  %v4932_v50 = vsel %vm4921_vm14, %v4915_v29, %v10031_v28  ;;  %v4933_v16 = vsel %vm4921_vm14, %v4916_v21, %v10032_v23 }
 0x2ba   :  { %v10037_v53 = vunpack.i.h.bf16 %v10035_v35  ;;  %v10036_v26 = vunpack.i.l.bf16 %v10035_v35  ;;  %v10045_v30 = vpop.permute.xlu1 %10044  ;;  %v5001_v51 = vpack.c.bf16 %v4933_v16, %v4932_v50 }
 0x2bb   :  { %v10047_v37 = vunpack.i.h.bf16 %v10045_v30  ;;  %v10046_v31 = vunpack.i.l.bf16 %v10045_v30 }
 0x2bc   :  { %v4965_v8 = vsel %vm4904_vm13, %v4949_v15, %v10037_v53  ;;  %v4964_v62 = vsel %vm4904_vm13, %v4948_v36, %v10036_v26 }
 0x2bd   :  { %v10040_v20 = vpop.permute.xlu0 %10039  ;;  %v4900_v4 = vsel %vm3515_vm3, %v11623_v46, %v10046_v31  ;;  %v4901_v49 = vsel %vm3515_vm3, %v11632_v13, %v10047_v37 }
 0x2be   :  { %v10042_v7 = vunpack.i.h.bf16 %v10040_v20  ;;  %v10041_v58 = vunpack.i.l.bf16 %v10040_v20 }
 0x2c0   :  { %v4980_v22 = vsel %vm4921_vm14, %v4964_v62, %v10041_v58  ;;  %v4981_v42 = vsel %vm4921_vm14, %v4965_v8, %v10042_v7 }
 0x2c1   :  { %v5002_v32 = vpack.c.bf16 %v4981_v42, %v4980_v22 }
 0x2c2   :  { %v10050_v19 = vpop.permute.xlu1 %10049  ;;  %v10055_v60 = vpop.permute.xlu0 %10054 }
 0x2c3   :  { %5250 = vmatprep.mubr.bf16.mxu1 %v5002_v32  ;;  %v10052_v40 = vunpack.i.h.bf16 %v10050_v19  ;;  %v10051_v43 = vunpack.i.l.bf16 %v10050_v19  ;;  %v10057_v14 = vunpack.i.h.bf16 %v10055_v60  ;;  %v10056_v33 = vunpack.i.l.bf16 %v10055_v60 }
 0x2c4   :  { %5251 = vmatmul.mubr.bf16.gmra.mrb[84].mxu1 %v5001_v51 }
 0x2c5   :  { %v4917_v59 = vsel %vm4904_vm13, %v4900_v4, %v10051_v43  ;;  %v4918_v10 = vsel %vm4904_vm13, %v4901_v49, %v10052_v40  ;;  %v4950_v35 = vsel %vm3515_vm3, %v11634_v48, %v10056_v33  ;;  %v4951_v34 = vsel %vm3515_vm3, %v11712_v3, %v10057_v14  ;;  %v4493_v4 = vld [vmem:[#allocation2 + $0x72] sm:$0xff]  ;;  %v4490_v49 = vld [vmem:[#allocation2 + $0x42] sm:$0xff] }
 0x2c6   :  { %v10060_v2 = vpop.permute.xlu1 %10059  ;;  %v10065_v12 = vpop.permute.xlu0 %10064 }
 0x2c7   :  { %v10062_v25 = vunpack.i.h.bf16 %v10060_v2  ;;  %v10061_v56 = vunpack.i.l.bf16 %v10060_v2  ;;  %v10067_v5 = vunpack.i.h.bf16 %v10065_v12  ;;  %v10066_v18 = vunpack.i.l.bf16 %v10065_v12 }
 0x2c9   :  { %v4967_v23 = vsel %vm4904_vm13, %v4951_v34, %v10067_v5  ;;  %v4966_v46 = vsel %vm4904_vm13, %v4950_v35, %v10066_v18  ;;  %v4934_v28 = vsel %vm4921_vm14, %v4917_v59, %v10061_v56  ;;  %v4935_v13 = vsel %vm4921_vm14, %v4918_v10, %v10062_v25  ;;  %v4489_v25 = vld [vmem:[#allocation2 + $0x32] sm:$0xff]  ;;  %v4488_v5 = vld [vmem:[#allocation2 + $0x22] sm:$0xff] }
 0x2ca   :  { %v10070_v17 = vpop.permute.xlu0 %10069  ;;  %v5004_v38 = vpack.c.bf16 %v4935_v13, %v4934_v28  ;;  %v10075_v48 = vpop.permute.xlu1 %10074  ;;  %v4491_v18 = vld [vmem:[#allocation2 + $0x52] sm:$0xff]  ;;  %v4492_v10 = vld [vmem:[#allocation2 + $0x62] sm:$0xff] }
 0x2cb   :  { %v10072_v45 = vunpack.i.h.bf16 %v10070_v17  ;;  %v10071_v24 = vunpack.i.l.bf16 %v10070_v17  ;;  %v10077_v29 = vunpack.i.h.bf16 %v10075_v48  ;;  %v10076_v21 = vunpack.i.l.bf16 %v10075_v48  ;;  %v4494_v35 = vld [vmem:[#allocation2 + $0x82] sm:$0xff]  ;;  %v4495_v34 = vld [vmem:[#allocation2 + $0x92] sm:$0xff] }
 0x2cc   :  { %v4991_v59 = vpack.c.bf16 %v4491_v18, %v4490_v49  ;;  %v4994_v17 = vpack.c.bf16 %v4493_v4, %v4492_v10  ;;  %v12020_v10 = vld [vmem:[%s12983_s5] ss:$0 sm:$0xff] }
 0x2cd   :  { %v4982_v53 = vsel %vm4921_vm14, %v4966_v46, %v10071_v24  ;;  %v4983_v26 = vsel %vm4921_vm14, %v4967_v23, %v10072_v45  ;;  %v4902_v42 = vsel %vm3515_vm3, %v11679_v54, %v10076_v21  ;;  %v4903_v32 = vsel %vm3515_vm3, %v11684_v55, %v10077_v29  ;;  %v4496_v24 = vld [vmem:[#allocation2 + $0xc2] sm:$0xff]  ;;  %v4503_v46 = vld [vmem:[#allocation2 + $0x132] sm:$0xff] }
 0x2ce   :  { %v5005_v44 = vpack.c.bf16 %v4983_v26, %v4982_v53  ;;  %v10080_v3 = vpop.permute.xlu1 %10079  ;;  %v4997_v45 = vpack.c.bf16 %v4495_v34, %v4494_v35  ;;  %v5000_v23 = vpack.c.bf16 %v11601_v1, %v4496_v24  ;;  %v5009_v28 = vpack.c.bf16 %v4503_v46, %v11803_v52  ;;  %v12026_v34 = vld [vmem:[%s12984_s6] ss:$0 sm:$0xff] }
 0x2cf   :  { %v10082_v36 = vunpack.i.h.bf16 %v10080_v3  ;;  %v10081_v15 = vunpack.i.l.bf16 %v10080_v3 }
 0x2d0   :  { %5258 = vmatprep.mubr.bf16.mxu1 %v5005_v44 }
 0x2d1   :  { %5259 = vmatmul.mubr.bf16.gmra.mrb[88].mxu1 %v5004_v38  ;;  %v4919_v19 = vsel %vm4904_vm13, %v4902_v42, %v10081_v15  ;;  %v4920_v51 = vsel %vm4904_vm13, %v4903_v32, %v10082_v36 }
 0x2dc   :  { %v10085_v30 = vpop.permute.xlu0 %10084 }
 0x2dd   :  { %v10100_v20 = vpop.permute.xlu1 %10099  ;;  %v10087_v58 = vunpack.i.h.bf16 %v10085_v30  ;;  %v10086_v8 = vunpack.i.l.bf16 %v10085_v30 }
 0x2de   :  { %v10102_v62 = vunpack.i.h.bf16 %v10100_v20  ;;  %v10101_v50 = vunpack.i.l.bf16 %v10100_v20 }
 0x2df   :  { %v4952_v37 = vsel %vm3515_vm3, %v11702_v39, %v10086_v8  ;;  %v4953_v31 = vsel %vm3515_vm3, %v11817_v6, %v10087_v58  ;;  %v4988_v6 = vpack.c.bf16 %v4489_v25, %v4488_v5 }
 0x2e0   :  { %v10090_v7 = vpop.permute.xlu0 %10089  ;;  %v4936_v12 = vsel %vm4921_vm14, %v4919_v19, %v10101_v50  ;;  %v4937_v55 = vsel %vm4921_vm14, %v4920_v51, %v10102_v62 }
 0x2e1   :  { %v10092_v16 = vunpack.i.h.bf16 %v10090_v7  ;;  %v10091_v22 = vunpack.i.l.bf16 %v10090_v7  ;;  %v5007_v39 = vpack.c.bf16 %v4937_v55, %v4936_v12 }
 0x2e3   :  { %v4968_v43 = vsel %vm4904_vm13, %v4952_v37, %v10091_v22  ;;  %v4969_v54 = vsel %vm4904_vm13, %v4953_v31, %v10092_v16 }
 0x2e4   :  { %v10095_v60 = vpop.permute.xlu0 %10094 }
 0x2e5   :  { %v10097_v2 = vunpack.i.h.bf16 %v10095_v60  ;;  %v10096_v40 = vunpack.i.l.bf16 %v10095_v60 }
 0x2e7   :  { %v4984_v14 = vsel %vm4921_vm14, %v4968_v43, %v10096_v40  ;;  %v4985_v33 = vsel %vm4921_vm14, %v4969_v54, %v10097_v2 }
 0x2e8   :  { %v5008_v56 = vpack.c.bf16 %v4985_v33, %v4984_v14  ;;  %v12996_v33 = vmov 0.0  }
 0x2e9   :  { %6091 = vst.msk [vmem:[#allocation3] sm:$0x3f] %vm6090_vm15, %v12996_v33  ;;  %6092 = vst.msk [vmem:[#allocation3 + $0x30] sm:$0x3f] %vm6090_vm15, %v12996_v33 }
 0x2ea   :  { %5266 = vmatprep.mubr.bf16.mxu1 %v5008_v56  ;;  %6094 = vst.msk [vmem:[#allocation3 + $0x28] sm:$0x3f] %vm6090_vm15, %v12996_v33  ;;  %6095 = vst.msk [vmem:[#allocation3 + $0x58] sm:$0x3f] %vm6090_vm15, %v12996_v33 }
 0x2eb   :  { %5267 = vmatmul.mubr.bf16.gmra.mrb[92].mxu1 %v5007_v39  ;;  %6099 = vst.msk [vmem:[#allocation3 + $0x10] sm:$0x1] %vm6096_vm0, %v12996_v33  ;;  %6098 = vst.msk [vmem:[#allocation3 + $0x8] sm:$0x1] %vm6096_vm0, %v12996_v33 }
 0x2ec   :  { %9812 = vmatprep.mubr.msk.bf16.mxu1 %vm3515_vm3, %v4988_v6  ;;  %6100 = vst.msk [vmem:[#allocation3 + $0x18] sm:$0x1] %vm6096_vm0, %v12996_v33  ;;  %6101 = vst.msk [vmem:[#allocation3 + $0x20] sm:$0x1] %vm6096_vm0, %v12996_v33 }
 0x2ed   :  { %6104 = vst.msk [vmem:[#allocation3 + $0x38] sm:$0x1] %vm6096_vm0, %v12996_v33  ;;  %6105 = vst.msk [vmem:[#allocation3 + $0x40] sm:$0x1] %vm6096_vm0, %v12996_v33 }
 0x2ee   :  { %6106 = vst.msk [vmem:[#allocation3 + $0x48] sm:$0x1] %vm6096_vm0, %v12996_v33  ;;  %6107 = vst.msk [vmem:[#allocation3 + $0x50] sm:$0x1] %vm6096_vm0, %v12996_v33 }
 0x2ef   :  { %6110 = vst.msk [vmem:[#allocation3 + $0xd] sm:$0x1] %vm6096_vm0, %v12996_v33  ;;  %6111 = vst.msk [vmem:[#allocation3 + $0x15] sm:$0x1] %vm6096_vm0, %v12996_v33 }
 0x2f0   :  { %6112 = vst.msk [vmem:[#allocation3 + $0x1d] sm:$0x1] %vm6096_vm0, %v12996_v33  ;;  %6113 = vst.msk [vmem:[#allocation3 + $0x25] sm:$0x1] %vm6096_vm0, %v12996_v33  ;;  %v6331_v25 = vld [vmem:[#allocation3 + $0x1] sm:$0xf] }
 0x2f1   :  { %6116 = vst.msk [vmem:[#allocation3 + $0x3d] sm:$0x1] %vm6096_vm0, %v12996_v33  ;;  %6117 = vst.msk [vmem:[#allocation3 + $0x45] sm:$0x1] %vm6096_vm0, %v12996_v33  ;;  %6404 = vrot.lane.b32.xlu0 %v6331_v25, %s10420_s25  ;;  %v6335_v39 = vld [vmem:[#allocation3 + $0x31] sm:$0xf] }
 0x2f2   :  { %6118 = vst.msk [vmem:[#allocation3 + $0x4d] sm:$0x1] %vm6096_vm0, %v12996_v33  ;;  %6119 = vst.msk [vmem:[#allocation3 + $0x55] sm:$0x1] %vm6096_vm0, %v12996_v33 }
 0x2f3   :  { %9813 = vmatmul.mubr.msk.bf16.vlgmr.msra.gmra.mrb[96].mxu1 %vm3515_vm3, %v4991_v59  ;;  %6097 = vst.msk [vmem:[#allocation3] sm:$0x1] %vm6096_vm0, %v12996_v33  ;;  %6102 = vst.msk [vmem:[#allocation3 + $0x28] sm:$0x1] %vm6096_vm0, %v12996_v33 }
 0x2f4   :  { %9816 = vmatprep.mubr.msk.bf16.mxu1 %vm3515_vm3, %v4994_v17  ;;  %6103 = vst.msk [vmem:[#allocation3 + $0x30] sm:$0x1] %vm6096_vm0, %v12996_v33  ;;  %6108 = vst.msk [vmem:[#allocation3 + $0x58] sm:$0x1] %vm6096_vm0, %v12996_v33 }
 0x2f5   :  { %6109 = vst.msk [vmem:[#allocation3 + $0x5] sm:$0x1] %vm6096_vm0, %v12996_v33  ;;  %6114 = vst.msk [vmem:[#allocation3 + $0x2d] sm:$0x1] %vm6096_vm0, %v12996_v33  ;;  %6412 = vrot.lane.b32.xlu0 %v6335_v39, %s10420_s25 }
 0x2f6   :  { %6115 = vst.msk [vmem:[#allocation3 + $0x35] sm:$0x1] %vm6096_vm0, %v12996_v33  ;;  %6120 = vst.msk [vmem:[#allocation3 + $0x5d] sm:$0x1] %vm6096_vm0, %v12996_v33  ;;  %v10157_v33 = vld [vmem:[%s12985_s7 + $0x48] sm:$0xff]  }
 0x2fb   :  { %9817 = vmatmul.mubr.msk.bf16.gmra.mrb[100].mxu1 %vm3515_vm3, %v4997_v45 }
 0x2fc   :  { %9820 = vmatprep.mubr.msk.bf16.mxu1 %vm3515_vm3, %v5000_v23 }
 0x303   :  { %9821 = vmatmul.mubr.msk.bf16.gmra.mrb[104].mxu1 %vm3515_vm3, %v5003_v27 }
 0x304   :  { %9824 = vmatprep.mubr.msk.bf16.mxu1 %vm3515_vm3, %v5006_v9 }
 0x30b   :  { %9825 = vmatmul.mubr.msk.bf16.gmra.mrb[108].mxu1 %vm3515_vm3, %v5009_v28  ;;  %vm8915_vm3 = vcmask 1024  }
 0x335   :  { %v9620_v1 = vpop.f32.mrb[64].mxu1 }
 0x336   :  { %v9621_v13 = vpop.f32.mrb[65].mxu1 }
 0x337   :  { %v11931_v53 = vadd.f32 %v9621_v13, %v9620_v1  ;;  %v9623_v26 = vpop.f32.mrb[66].mxu1 }
 0x338   :  { %v9624_v44 = vpop.f32.mrb[67].mxu1 }
 0x339   :  { %v11933_v38 = vadd.f32 %v9624_v44, %v9623_v26 }
 0x33d   :  { %v9626_v63 = vpop.f32.mrb[68].mxu1 }
 0x33e   :  { %v9627_v11 = vpop.f32.mrb[69].mxu1 }
 0x33f   :  { %v11935_v27 = vadd.f32 %v9627_v11, %v9626_v63  ;;  %v9629_v61 = vpop.f32.mrb[70].mxu1 }
 0x340   :  { %v9630_v41 = vpop.f32.mrb[71].mxu1 }
 0x341   :  { %v11937_v9 = vadd.f32 %v9630_v41, %v9629_v61 }
 0x345   :  { %v9632_v48 = vpop.f32.mrb[72].mxu1 }
 0x346   :  { %v9633_v52 = vpop.f32.mrb[73].mxu1 }
 0x347   :  { %v11939_v3 = vadd.f32 %v9633_v52, %v9632_v48  ;;  %v9635_v30 = vpop.f32.mrb[74].mxu1 }
 0x348   :  { %v9636_v29 = vpop.f32.mrb[75].mxu1 }
 0x349   :  { %v11941_v21 = vadd.f32 %v9636_v29, %v9635_v30 }
 0x34d   :  { %v9638_v20 = vpop.f32.mrb[76].mxu1 }
 0x34e   :  { %v9639_v36 = vpop.f32.mrb[77].mxu1 }
 0x34f   :  { %v11943_v15 = vadd.f32 %v9639_v36, %v9638_v20  ;;  %v9641_v7 = vpop.f32.mrb[78].mxu1 }
 0x350   :  { %v9642_v58 = vpop.f32.mrb[79].mxu1 }
 0x351   :  { %v11945_v8 = vadd.f32 %v9642_v58, %v9641_v7 }
 0x388   :  { %v9644_v62 = vpop.f32.mrb[80].mxu1 }
 0x389   :  { %v9645_v50 = vpop.f32.mrb[81].mxu1 }
 0x38a   :  { %v11947_v16 = vadd.f32 %v9645_v50, %v9644_v62  ;;  %v9647_v22 = vpop.f32.mrb[82].mxu1 }
 0x38b   :  { %v9648_v42 = vpop.f32.mrb[83].mxu1 }
 0x38c   :  { %v11949_v32 = vadd.f32 %v9648_v42, %v9647_v22 }
 0x397   :  { %v9650_v19 = vpop.f32.mrb[84].mxu1 }
 0x398   :  { %v9651_v51 = vpop.f32.mrb[85].mxu1 }
 0x399   :  { %v11951_v60 = vadd.f32 %v9651_v51, %v9650_v19  ;;  %v9653_v37 = vpop.f32.mrb[86].mxu1  ;;  %v10155_v19 = vld [vmem:[%s12985_s7 + $0x40] sm:$0xff]  }
 0x39a   :  { %v9654_v31 = vpop.f32.mrb[87].mxu1  ;;  %9678 = vmatprep.subr.bf16.mxu1 %v10155_v19 }
 0x39b   :  { %v11953_v2 = vadd.f32 %v9654_v31, %v9653_v37  ;;  %v10156_v31 = vld [vmem:[%s12985_s7] sm:$0xff]  }
 0x39c   :  { %9679 = vmatpush3.bf16.msra.mxu1 %v10156_v31 }
 0x39d   :  { %9680 = vmatprep.subr.bf16.mxu1 %v10157_v33 }
 0x3a4   :  { %v9656_v40 = vpop.f32.mrb[88].mxu1 }
 0x3a5   :  { %v9657_v43 = vpop.f32.mrb[89].mxu1 }
 0x3a6   :  { %v11955_v54 = vadd.f32 %v9657_v43, %v9656_v40  ;;  %v9659_v12 = vpop.f32.mrb[90].mxu1 }
 0x3a7   :  { %v9660_v55 = vpop.f32.mrb[91].mxu1 }
 0x3a8   :  { %v11957_v14 = vadd.f32 %v9660_v55, %v9659_v12 }
 0x3be   :  { %v9662_v56 = vpop.f32.mrb[92].mxu1 }
 0x3bf   :  { %v9663_v5 = vpop.f32.mrb[93].mxu1 }
 0x3c0   :  { %v12012_v6 = vadd.f32 %v9663_v5, %v9662_v56  ;;  %v9665_v18 = vpop.f32.mrb[94].mxu1 }
 0x3c1   :  { %v9666_v4 = vpop.f32.mrb[95].mxu1 }
 0x3c2   :  { %v12015_v49 = vadd.f32 %v9666_v4, %v9665_v18  ;;  %v10158_v18 = vld [vmem:[%s12985_s7 + $0x8] sm:$0xff]  }
 0x3c3   :  { %9681 = vmatpush3.bf16.msra.mxu1 %v10158_v18 }
 0x3c6   :  { %v9814_v59 = vpop.f32.mrb[96].mxu1 }
 0x3c7   :  { %v5318_v17 = vadd.f32 %v9814_v59, %v11935_v27  ;;  %v5309_v35 = vpop.f32.mrb[97].mxu1 }
 0x3c8   :  { %v5310_v45 = vadd.f32 %v11931_v53, %v5309_v35  ;;  %v9815_v24 = vpop.f32.mrb[98].mxu1 }
 0x3c9   :  { %v5381_v23 = vmul.f32 %v12020_v10, %v5318_v17  ;;  %v5321_v46 = vadd.f32 %v9815_v24, %v11937_v9  ;;  %v5312_v28 = vpop.f32.mrb[99].mxu1 }
 0x3ca   :  { %v5379_v1 = vmul.f32 %v12020_v10, %v5310_v45  ;;  %v5313_v13 = vadd.f32 %v11933_v38, %v5312_v28 }
 0x3cb   :  { %v5404_v26 = vadd.f32 %v12026_v34, %v5381_v23  ;;  %v5382_v44 = vmul.f32 %v12020_v10, %v5321_v46 }
 0x3cc   :  { %v5402_v63 = vadd.f32 %v12026_v34, %v5379_v1  ;;  %v5380_v11 = vmul.f32 %v12020_v10, %v5313_v13 }
 0x3cd   :  { %v5420_v27 = vmul.f32 0.1, %v5404_v26  ;;  %v5405_v53 = vadd.f32 %v12026_v34, %v5382_v44 }
 0x3ce   :  { %v5418_v61 = vmul.f32 0.1, %v5402_v63  ;;  %v5403_v41 = vadd.f32 %v12026_v34, %v5380_v11  ;;  %v9818_v9 = vpop.f32.mrb[100].mxu1 }
 0x3cf   :  { %v5436_v48 = vmax.f32 %v5404_v26, %v5420_v27  ;;  %v5421_v52 = vmul.f32 0.1, %v5405_v53  ;;  %v5334_v30 = vadd.f32 %v9818_v9, %v11943_v15  ;;  %v5325_v38 = vpop.f32.mrb[101].mxu1 }
 0x3d0   :  { %v5434_v29 = vmax.f32 %v5402_v63, %v5418_v61  ;;  %v5419_v20 = vmul.f32 0.1, %v5403_v41  ;;  %v5326_v36 = vadd.f32 %v11939_v3, %v5325_v38  ;;  %v12041_v7 = vpop.f32.mrb[102].mxu1 }
 0x3d1   :  { %v5500_v58 = vcombine.high %v5436_v48, %v5436_v48  ;;  %v5507_v62 = vrot.slane %v5436_v48, %v10769_v57  ;;  %v5437_v50 = vmax.f32 %v5405_v53, %v5421_v52  ;;  %v5385_v22 = vmul.f32 %v12020_v10, %v5334_v30  ;;  %v12045_v42 = vpop.f32.mrb[103].mxu1 }
 0x3d2   :  { %v5466_v15 = vcombine.high %v5434_v29, %v5434_v29  ;;  %v5473_v51 = vrot.slane %v5434_v29, %v10769_v57  ;;  %v5435_v37 = vmax.f32 %v5403_v41, %v5419_v20  ;;  %v12052_v3 = vmul.f32 %v12020_v10, %v5326_v36 }
 0x3d3   :  { %v5514_v40 = vrot.slane %v5500_v58, %v10769_v57  ;;  %v5515_v43 = vcombine.high %v5507_v62, %v5507_v62  ;;  %v9281_v12 = vrot.slane %v5507_v62, 9  ;;  %v5517_v55 = vcombine.high %v5437_v50, %v5437_v50 }
 0x3d4   :  { %v5480_v25 = vrot.slane %v5466_v15, %v10769_v57  ;;  %v5481_v56 = vcombine.high %v5473_v51, %v5473_v51  ;;  %v9273_v39 = vrot.slane %v5473_v51, 9  ;;  %v5524_v5 = vrot.slane %v5437_v50, %v10769_v57 }
 0x3d5   :  { %v5516_v4 = vcombine.high %v5514_v40, %v5514_v40  ;;  %v9282_v59 = vrot.slane %v5515_v43, 9  ;;  %v9283_v17 = vrot.slane %v5514_v40, 9  ;;  %v6002_v35 = vmax.f32 %v5507_v62, %v9281_v12 }
 0x3d6   :  { %v5482_v45 = vcombine.high %v5480_v25, %v5480_v25  ;;  %v9274_v24 = vrot.slane %v5481_v56, 9  ;;  %v9275_v23 = vrot.slane %v5480_v25, 9  ;;  %v12066_v46 = vmax.f32 %v5473_v51, %v9273_v39  ;;  %v12068_v28 = vpop.f32.mrb[104].mxu1 }
 0x3d7   :  { %v9284_v1 = vrot.slane %v5516_v4, 9  ;;  %v6003_v13 = vmax.f32 %v5515_v43, %v9282_v59  ;;  %v6004_v26 = vmax.f32 %v5514_v40, %v9283_v17  ;;  %v5531_v44 = vrot.slane %v5517_v55, %v10769_v57  ;;  %v12071_v63 = vpop.f32.mrb[105].mxu1 }
 0x3d8   :  { %v9276_v11 = vrot.slane %v5482_v45, 9  ;;  %v5995_v27 = vmax.f32 %v5481_v56, %v9274_v24  ;;  %v5996_v53 = vmax.f32 %v5480_v25, %v9275_v23  ;;  %v5532_v61 = vcombine.high %v5524_v5, %v5524_v5  ;;  %v12073_v41 = vpop.f32.mrb[106].mxu1 }
 0x3d9   :  { %v6005_v9 = vmax.f32 %v5516_v4, %v9284_v1  ;;  %v5533_v48 = vcombine.high %v5531_v44, %v5531_v44  ;;  %v9285_v52 = vrot.slane %v5524_v5, 9  ;;  %v9287_v30 = vrot.slane %v5531_v44, 9  ;;  %v12075_v38 = vpop.f32.mrb[107].mxu1 }
 0x3da   :  { %v5997_v29 = vmax.f32 %v5482_v45, %v9276_v11  ;;  %v9286_v20 = vrot.slane %v5532_v61, 9  ;;  %v5483_v36 = vcombine.high %v5435_v37, %v5435_v37  ;;  %v5490_v58 = vrot.slane %v5435_v37, %v10769_v57 }
 0x3db   :  { %v9288_v62 = vrot.slane %v5533_v48, 9  ;;  %v6006_v50 = vmax.f32 %v5524_v5, %v9285_v52  ;;  %v6008_v19 = vmax.f32 %v5531_v44, %v9287_v30  ;;  %v5408_v15 = vadd.f32 %v12026_v34, %v5385_v22  ;;  %v10160_v52 = vld [vmem:[%s12985_s7 + $0x10] sm:$0xff]  }
 0x3dc   :  { %v6007_v51 = vmax.f32 %v5532_v61, %v9286_v20  ;;  %v5497_v31 = vrot.slane %v5483_v36, %v10769_v57  ;;  %v5498_v40 = vcombine.high %v5490_v58, %v5490_v58  ;;  %v9277_v43 = vrot.slane %v5490_v58, 9 }
 0x3dd   :  { %v6009_v12 = vmax.f32 %v5533_v48, %v9288_v62  ;;  %v6062_v55 = vmax.f32 %v6002_v35, %v6006_v50  ;;  %v6064_v33 = vmax.f32 %v6004_v26, %v6008_v19  ;;  %v5424_v25 = vmul.f32 0.1, %v5408_v15  ;;  %v10159_v48 = vld [vmem:[%s12985_s7 + $0x50] sm:$0xff]  }
 0x3de   :  { %v6063_v56 = vmax.f32 %v6003_v13, %v6007_v51  ;;  %v5499_v39 = vcombine.high %v5497_v31, %v5497_v31  ;;  %v9278_v18 = vrot.slane %v5498_v40, 9  ;;  %v9279_v4 = vrot.slane %v5497_v31, 9  ;;  %v12080_v59 = vpop.f32.mrb[108].mxu1  ;;  %9682 = vmatprep.subr.bf16.mxu1 %v10159_v48 }
 0x3df   :  { %v6065_v37 = vmax.f32 %v6005_v9, %v6009_v12  ;;  %v6172_v5 = vrot.slane %v6062_v55, %v10774_v0  ;;  %v6180_v22 = vrot.slane %v6064_v33, %v10774_v0  ;;  %v5998_v17 = vmax.f32 %v5490_v58, %v9277_v43  ;;  %v12084_v45 = vpop.f32.mrb[109].mxu1  ;;  %9683 = vmatpush3.bf16.msra.mxu1 %v10160_v52  ;;  %v10161_v12 = vld [vmem:[%s12985_s7 + $0x58] sm:$0xff]  }
 0x3e0   :  { %v6176_v24 = vrot.slane %v6063_v56, %v10774_v0  ;;  %v9280_v23 = vrot.slane %v5499_v39, 9  ;;  %v5999_v35 = vmax.f32 %v5498_v40, %v9278_v18  ;;  %v6000_v1 = vmax.f32 %v5497_v31, %v9279_v4  ;;  %v12087_v26 = vpop.f32.mrb[110].mxu1  ;;  %9684 = vmatprep.subr.bf16.mxu1 %v10161_v12 }
 0x3e1   :  { %v6184_v13 = vrot.slane %v6065_v37, %v10774_v0  ;;  %v6058_v44 = vmax.f32 %v12066_v46, %v5998_v17  ;;  %v5440_v11 = vmax.f32 %v5408_v15, %v5424_v25  ;;  %v5406_v61 = vadd.f32 %v12026_v34, %v12052_v3  ;;  %v12093_v9 = vpop.f32.mrb[111].mxu1 }
 0x3e2   :  { %v6284_v30 = vsel %vm4207_vm6, %v6176_v24, %v6172_v5  ;;  %v6001_v20 = vmax.f32 %v5499_v39, %v9280_v23  ;;  %v6059_v36 = vmax.f32 %v5995_v27, %v5999_v35  ;;  %v6060_v58 = vmax.f32 %v5996_v53, %v6000_v1 }
 0x3e3   :  { %v6285_v46 = vsel %vm4209_vm7, %v6180_v22, %v6284_v30  ;;  %v6156_v62 = vrot.slane %v6058_v44, %v10774_v0  ;;  %v5568_v3 = vcombine.high %v5440_v11, %v5440_v11  ;;  %v5575_v50 = vrot.slane %v5440_v11, %v10769_v57 }
 0x3e4   :  { %v6286_v19 = vsel %vm4211_vm8, %v6184_v13, %v6285_v46  ;;  %v6061_v15 = vmax.f32 %v5997_v29, %v6001_v20  ;;  %v6160_v51 = vrot.slane %v6059_v36, %v10774_v0  ;;  %v6164_v31 = vrot.slane %v6060_v58, %v10774_v0  ;;  %v10162_v29 = vld [vmem:[%s12985_s7 + $0x18] sm:$0xff]  }
 0x3e5   :  { %6316 = vst.msk [vmem:[#allocation3 + $0x11] sm:$0xf] %vm6314_vm1, %v6286_v19  ;;  %v5582_v27 = vrot.slane %v5568_v3, %v10769_v57  ;;  %v5583_v53 = vcombine.high %v5575_v50, %v5575_v50  ;;  %v9297_v40 = vrot.slane %v5575_v50, 9  ;;  %v5422_v43 = vmul.f32 0.1, %v5406_v61  ;;  %9685 = vmatpush3.bf16.msra.mxu1 %v10162_v29 }
 0x3e6   :  { %v6168_v55 = vrot.slane %v6061_v15, %v10774_v0  ;;  %v6281_v33 = vsel %vm4207_vm6, %v6160_v51, %v6156_v62  ;;  %v5337_v25 = vadd.f32 %v12041_v7, %v11945_v8  ;;  %v5329_v56 = vadd.f32 %v11941_v21, %v12045_v42 }
 0x3e7   :  { %v6282_v39 = vsel %vm4209_vm7, %v6164_v31, %v6281_v33  ;;  %v5584_v18 = vcombine.high %v5582_v27, %v5582_v27  ;;  %v9298_v4 = vrot.slane %v5583_v53, 9  ;;  %v9299_v37 = vrot.slane %v5582_v27, 9 }
 0x3e8   :  { %v6283_v5 = vsel %vm4211_vm8, %v6168_v55, %v6282_v39  ;;  %v5438_v22 = vmax.f32 %v5406_v61, %v5422_v43  ;;  %v5386_v17 = vmul.f32 %v12020_v10, %v5337_v25  ;;  %v12126_v23 = vmax.f32 %v5575_v50, %v9297_v40 }
 0x3e9   :  { %6315 = vst.msk [vmem:[#allocation3 + $0x9] sm:$0xf] %vm6314_vm1, %v6283_v5  ;;  %v9300_v24 = vrot.slane %v5584_v18, 9  ;;  %v12128_v8 = vmax.f32 %v5583_v53, %v9298_v4  ;;  %v5384_v21 = vmul.f32 %v12020_v10, %v5329_v56  ;;  %v5350_v1 = vadd.f32 %v12068_v28, %v11951_v60 }
 0x3ea   :  { %v5534_v7 = vcombine.high %v5438_v22, %v5438_v22  ;;  %v5541_v42 = vrot.slane %v5438_v22, %v10769_v57  ;;  %v5409_v35 = vadd.f32 %v12026_v34, %v5386_v17  ;;  %v12135_v13 = vmax.f32 %v5582_v27, %v9299_v37 }
 0x3eb   :  { %v5407_v44 = vadd.f32 %v12026_v34, %v5384_v21  ;;  %v5342_v11 = vadd.f32 %v11947_v16, %v12071_v63  ;;  %v5353_v61 = vadd.f32 %v12073_v41, %v11953_v2  ;;  %v12143_v58 = vmax.f32 %v5584_v18, %v9300_v24 }
 0x3ec   :  { %v5548_v48 = vrot.slane %v5534_v7, %v10769_v57  ;;  %v5549_v52 = vcombine.high %v5541_v42, %v5541_v42  ;;  %v9289_v30 = vrot.slane %v5541_v42, 9  ;;  %v5425_v20 = vmul.f32 0.1, %v5409_v35  ;;  %v6348_v36 = vld [vmem:[#allocation3 + $0x10] sm:$0xf] }
 0x3ed   :  { %v5423_v46 = vmul.f32 0.1, %v5407_v44  ;;  %v5389_v60 = vmul.f32 %v12020_v10, %v5350_v1  ;;  %v5387_v28 = vmul.f32 %v12020_v10, %v5342_v11  ;;  %6438 = vrot.lane.b32.xlu1 %v6348_v36, %s10420_s25  ;;  %v6333_v62 = vld [vmem:[#allocation3 + $0x11] sm:$0xf]  ;;  %v5390_v2 = vmul.f32 %v12020_v10, %v5353_v61 }
 0x3ee   :  { %v5550_v16 = vcombine.high %v5548_v48, %v5548_v48  ;;  %v9290_v63 = vrot.slane %v5549_v52, 9  ;;  %v9291_v3 = vrot.slane %v5548_v48, 9  ;;  %6408 = vrot.lane.b32.xlu0 %v6333_v62, %s10420_s25  ;;  %v5441_v41 = vmax.f32 %v5409_v35, %v5425_v20  ;;  %v6380_v33 = vld [vmem:[#allocation3 + $0x11] sm:$0xf] }
 0x3ef   :  { %v5439_v50 = vmax.f32 %v5407_v44, %v5423_v46  ;;  %v5412_v19 = vadd.f32 %v12026_v34, %v5389_v60  ;;  %v5410_v15 = vadd.f32 %v12026_v34, %v5387_v28  ;;  %v6010_v31 = vmax.f32 %v5541_v42, %v9289_v30 }
 0x3f0   :  { %v9292_v51 = vrot.slane %v5550_v16, 9  ;;  %v6011_v27 = vmax.f32 %v5549_v52, %v9290_v63  ;;  %v6012_v53 = vmax.f32 %v5548_v48, %v9291_v3  ;;  %v6332_v40 = vld [vmem:[#allocation3 + $0x9] sm:$0xf]  ;;  %v5585_v43 = vcombine.high %v5441_v41, %v5441_v41 }
 0x3f1   :  { %v5592_v12 = vrot.slane %v5441_v41, %v10769_v57  ;;  %v5551_v29 = vcombine.high %v5439_v50, %v5439_v50  ;;  %v5558_v55 = vrot.slane %v5439_v50, %v10769_v57  ;;  %6406 = vrot.lane.b32.xlu1 %v6332_v40, %s10420_s25  ;;  %v5428_v56 = vmul.f32 0.1, %v5412_v19  ;;  %v6347_v17 = vld [vmem:[#allocation3 + $0x8] sm:$0xf] }
 0x3f2   :  { %v6013_v25 = vmax.f32 %v5550_v16, %v9292_v51  ;;  %v5426_v39 = vmul.f32 0.1, %v5410_v15  ;;  %v12156_v18 = vadd.f32 %v12026_v34, %v5390_v2  ;;  %6500 = vrot.lane.b32.xlu0 %v6380_v33, %s10420_s25  ;;  %v5599_v4 = vrot.slane %v5585_v43, %v10769_v57 }
 0x3f3   :  { %v5600_v37 = vcombine.high %v5592_v12, %v5592_v12  ;;  %v9301_v5 = vrot.slane %v5592_v12, 9  ;;  %v5565_v22 = vrot.slane %v5551_v29, %v10769_v57  ;;  %v5566_v24 = vcombine.high %v5558_v55, %v5558_v55 }
 0x3f4   :  { %v9293_v21 = vrot.slane %v5558_v55, 9  ;;  %v5444_v7 = vmax.f32 %v5412_v19, %v5428_v56  ;;  %v12161_v42 = vmax.f32 %v5410_v15, %v5426_v39  ;;  %v5601_v35 = vcombine.high %v5599_v4, %v5599_v4 }
 0x3f5   :  { %v9302_v1 = vrot.slane %v5600_v37, 9  ;;  %v9303_v44 = vrot.slane %v5599_v4, 9  ;;  %v6022_v11 = vmax.f32 %v5592_v12, %v9301_v5  ;;  %v5567_v61 = vcombine.high %v5565_v22, %v5565_v22 }
 0x3f6   :  { %v9294_v48 = vrot.slane %v5566_v24, 9  ;;  %v9295_v52 = vrot.slane %v5565_v22, 9  ;;  %v6014_v30 = vmax.f32 %v5558_v55, %v9293_v21  ;;  %6436 = vrot.lane.b32.xlu0 %v6347_v17, %s10420_s25  ;;  %v9304_v20 = vrot.slane %v5601_v35, 9 }
 0x3f7   :  { %v6023_v36 = vmax.f32 %v5600_v37, %v9302_v1  ;;  %v6024_v46 = vmax.f32 %v5599_v4, %v9303_v44  ;;  %v6070_v60 = vmax.f32 %v12126_v23, %v6022_v11  ;;  %v9296_v28 = vrot.slane %v5567_v61, 9 }
 0x3f8   :  { %v6015_v62 = vmax.f32 %v5566_v24, %v9294_v48  ;;  %v6016_v16 = vmax.f32 %v5565_v22, %v9295_v52  ;;  %v6066_v63 = vmax.f32 %v6010_v31, %v6014_v30  ;;  %v6025_v3 = vmax.f32 %v5601_v35, %v9304_v20  ;;  %v10166_v35 = vld [vmem:[%s12985_s7 + $0x28] sm:$0xff]  }
 0x3f9   :  { %v6071_v2 = vmax.f32 %v12128_v8, %v6023_v36  ;;  %v6072_v41 = vmax.f32 %v12135_v13, %v6024_v46  ;;  %v6204_v50 = vrot.slane %v6070_v60, %v10774_v0  ;;  %v6017_v19 = vmax.f32 %v5567_v61, %v9296_v28  ;;  %v10163_v8 = vld [vmem:[%s12985_s7 + $0x60] sm:$0xff]   ;;  %v10167_v46 = vld [vmem:[%s12985_s7 + $0x70] sm:$0xff]  }
 0x3fa   :  { %v6067_v15 = vmax.f32 %v6011_v27, %v6015_v62  ;;  %v6068_v51 = vmax.f32 %v6012_v53, %v6016_v16  ;;  %v6188_v40 = vrot.slane %v6066_v63, %v10774_v0  ;;  %v6073_v43 = vmax.f32 %v12143_v58, %v6025_v3  ;;  %v10164_v13 = vld [vmem:[%s12985_s7 + $0x20] sm:$0xff]   ;;  %9686 = vmatprep.subr.bf16.mxu1 %v10163_v8  ;;  %v10168_v60 = vld [vmem:[%s12985_s7 + $0x30] sm:$0xff]  }
 0x3fb   :  { %v6208_v23 = vrot.slane %v6071_v2, %v10774_v0  ;;  %v6212_v12 = vrot.slane %v6072_v41, %v10774_v0  ;;  %v5636_v29 = vcombine.high %v5444_v7, %v5444_v7  ;;  %v6069_v31 = vmax.f32 %v6013_v25, %v6017_v19  ;;  %9687 = vmatpush3.bf16.msra.mxu1 %v10164_v13 }
 0x3fc   :  { %v6192_v27 = vrot.slane %v6067_v15, %v10774_v0  ;;  %v6196_v53 = vrot.slane %v6068_v51, %v10774_v0  ;;  %v5643_v58 = vrot.slane %v5444_v7, %v10769_v57  ;;  %v6216_v55 = vrot.slane %v6073_v43, %v10774_v0  ;;  %v10165_v7 = vld [vmem:[%s12985_s7 + $0x68] sm:$0xff]  }
 0x3fd   :  { %v6290_v33 = vsel %vm4207_vm6, %v6208_v23, %v6204_v50  ;;  %v5650_v56 = vrot.slane %v5636_v29, %v10769_v57  ;;  %v5429_v39 = vmul.f32 0.1, %v12156_v18  ;;  %v6200_v37 = vrot.slane %v6069_v31, %v10774_v0  ;;  %9688 = vmatprep.subr.bf16.mxu1 %v10165_v7 }
 0x3fe   :  { %v6291_v4 = vsel %vm4209_vm7, %v6212_v12, %v6290_v33  ;;  %v6287_v25 = vsel %vm4207_vm6, %v6192_v27, %v6188_v40  ;;  %v5651_v5 = vcombine.high %v5643_v58, %v5643_v58  ;;  %v9313_v21 = vrot.slane %v5643_v58, 9 }
 0x3ff   :  { %v6292_v22 = vsel %vm4211_vm8, %v6216_v55, %v6291_v4  ;;  %v6288_v17 = vsel %vm4209_vm7, %v6196_v53, %v6287_v25  ;;  %v5652_v24 = vcombine.high %v5650_v56, %v5650_v56  ;;  %v5602_v11 = vcombine.high %v12161_v42, %v12161_v42  ;;  %9689 = vmatpush3.bf16.msra.mxu1 %v10166_v35  ;;  %v6383_v53 = vld [vmem:[#allocation3 + $0x29] sm:$0xf] }
 0x400   :  { %6318 = vst.msk [vmem:[#allocation3 + $0x21] sm:$0xf] %vm6314_vm1, %v6292_v22  ;;  %v6289_v1 = vsel %vm4211_vm8, %v6200_v37, %v6288_v17  ;;  %v9314_v44 = vrot.slane %v5651_v5, 9  ;;  %v9315_v61 = vrot.slane %v5650_v56, 9  ;;  %v12203_v48 = vrot.slane %v12161_v42, %v10769_v57  ;;  %9690 = vmatprep.subr.bf16.mxu1 %v10167_v46  ;;  %v10169_v22 = vld [vmem:[%s12985_s7 + $0x78] sm:$0xff]  }
 0x401   :  { %6317 = vst.msk [vmem:[#allocation3 + $0x19] sm:$0xf] %vm6314_vm1, %v6289_v1  ;;  %v5445_v52 = vmax.f32 %v12156_v18, %v5429_v39  ;;  %v9316_v30 = vrot.slane %v5652_v24, 9  ;;  %v6034_v20 = vmax.f32 %v5643_v58, %v9313_v21  ;;  %v12213_v62 = vrot.slane %v5602_v11, %v10769_v57  ;;  %v10170_v17 = vld [vmem:[%s12985_s7 + $0x38] sm:$0xff]  }
 0x402   :  { %v6035_v28 = vmax.f32 %v5651_v5, %v9314_v44  ;;  %v5345_v18 = vadd.f32 %v11949_v32, %v12075_v38  ;;  %v6036_v16 = vmax.f32 %v5650_v56, %v9315_v61  ;;  %v12220_v63 = vcombine.high %v12203_v48, %v12203_v48 }
 0x403   :  { %v5653_v36 = vcombine.high %v5445_v52, %v5445_v52  ;;  %v5660_v42 = vrot.slane %v5445_v52, %v10769_v57  ;;  %v5366_v2 = vadd.f32 %v12080_v59, %v12012_v6  ;;  %v9305_v41 = vrot.slane %v12203_v48, 9  ;;  %9691 = vmatpush3.bf16.msra.mxu1 %v10168_v60  ;;  %v10171_v52 = vld [vmem:[%s12985_s7 + $0xc0] sm:$0xff]   ;;  %v6364_v60 = vld [vmem:[#allocation3 + $0x12] sm:$0xf] }
 0x404   :  { %v5388_v15 = vmul.f32 %v12020_v10, %v5345_v18  ;;  %v6037_v51 = vmax.f32 %v5652_v24, %v9316_v30  ;;  %v5358_v6 = vadd.f32 %v11955_v54, %v12084_v45  ;;  %v5369_v27 = vadd.f32 %v12087_v26, %v12015_v49  ;;  %9692 = vmatprep.subr.bf16.mxu1 %v10169_v22 }
 0x405   :  { %v5667_v3 = vrot.slane %v5653_v36, %v10769_v57  ;;  %v5668_v50 = vcombine.high %v5660_v42, %v5660_v42  ;;  %v9317_v19 = vrot.slane %v5660_v42, 9  ;;  %v5393_v40 = vmul.f32 %v12020_v10, %v5366_v2 }
 0x406   :  { %v5411_v29 = vadd.f32 %v12026_v34, %v5388_v15  ;;  %v5391_v56 = vmul.f32 %v12020_v10, %v5358_v6  ;;  %v5394_v4 = vmul.f32 %v12020_v10, %v5369_v27  ;;  %v5618_v37 = vcombine.high %v12213_v62, %v12213_v62 }
 0x407   :  { %v5669_v32 = vcombine.high %v5667_v3, %v5667_v3  ;;  %v9319_v38 = vrot.slane %v5667_v3, 9  ;;  %v6350_v43 = vld [vmem:[#allocation3 + $0x20] sm:$0xf]  ;;  %v9318_v23 = vrot.slane %v5668_v50, 9  ;;  %v6038_v12 = vmax.f32 %v5660_v42, %v9317_v19  ;;  %9693 = vmatpush3.bf16.msra.mxu1 %v10170_v17 }
 0x408   :  { %6442 = vrot.lane.b32.xlu1 %v6350_v43, %s10420_s25  ;;  %v6349_v59 = vld [vmem:[#allocation3 + $0x18] sm:$0xf]  ;;  %v5416_v31 = vadd.f32 %v12026_v34, %v5393_v40  ;;  %v5427_v33 = vmul.f32 0.1, %v5411_v29  ;;  %v9307_v25 = vrot.slane %v12213_v62, 9  ;;  %v9306_v24 = vrot.slane %v12220_v63, 9  ;;  %9706 = vmatprep.subr.bf16.mxu1 %v10171_v52 }
 0x409   :  { %v9320_v8 = vrot.slane %v5669_v32, 9  ;;  %v6040_v13 = vmax.f32 %v5667_v3, %v9319_v38  ;;  %6440 = vrot.lane.b32.xlu0 %v6349_v59, %s10420_s25  ;;  %v6039_v58 = vmax.f32 %v5668_v50, %v9318_v23  ;;  %v6078_v55 = vmax.f32 %v6034_v20, %v6038_v12  ;;  %v6382_v26 = vld [vmem:[#allocation3 + $0x21] sm:$0xf]  ;;  %v6363_v3 = vld [vmem:[#allocation3 + $0xa] sm:$0xf] }
 0x40a   :  { %v5432_v45 = vmul.f32 0.1, %v5416_v31  ;;  %v5443_v49 = vmax.f32 %v5411_v29, %v5427_v33  ;;  %v6026_v30 = vmax.f32 %v12203_v48, %v9305_v41  ;;  %v5414_v36 = vadd.f32 %v12026_v34, %v5391_v56  ;;  %v6334_v12 = vld [vmem:[#allocation3 + $0x19] sm:$0xf] }
 0x40b   :  { %v6041_v39 = vmax.f32 %v5669_v32, %v9320_v8  ;;  %v6080_v54 = vmax.f32 %v6036_v16, %v6040_v13  ;;  %v6079_v5 = vmax.f32 %v6035_v28, %v6039_v58  ;;  %v6236_v1 = vrot.slane %v6078_v55, %v10774_v0 }
 0x40c   :  { %6506 = vrot.lane.b32.xlu1 %v6383_v53, %s10420_s25  ;;  %v5448_v35 = vmax.f32 %v5416_v31, %v5432_v45  ;;  %v5619_v11 = vcombine.high %v5443_v49, %v5443_v49  ;;  %v5626_v61 = vrot.slane %v5443_v49, %v10769_v57  ;;  %v5417_v46 = vadd.f32 %v12026_v34, %v5394_v4 }
 0x40d   :  { %v6081_v21 = vmax.f32 %v6037_v51, %v6041_v39  ;;  %v6244_v7 = vrot.slane %v6080_v54, %v10774_v0  ;;  %6504 = vrot.lane.b32.xlu0 %v6382_v26, %s10420_s25  ;;  %v6240_v44 = vrot.slane %v6079_v5, %v10774_v0  ;;  %v9308_v2 = vrot.slane %v5618_v37, 9  ;;  %v6381_v54 = vld [vmem:[#allocation3 + $0x19] sm:$0xf] }
 0x40e   :  { %v5633_v42 = vrot.slane %v5619_v11, %v10769_v57  ;;  %v5634_v18 = vcombine.high %v5626_v61, %v5626_v61  ;;  %v9309_v16 = vrot.slane %v5626_v61, 9  ;;  %v6028_v48 = vmax.f32 %v12213_v62, %v9307_v25 }
 0x40f   :  { %v6248_v20 = vrot.slane %v6081_v21, %v10774_v0  ;;  %v6296_v28 = vsel %vm4207_vm6, %v6240_v44, %v6236_v1  ;;  %v5704_v50 = vcombine.high %v5448_v35, %v5448_v35  ;;  %v5711_v40 = vrot.slane %v5448_v35, %v10769_v57 }
 0x410   :  { %6470 = vrot.lane.b32.xlu1 %v6364_v60, %s10420_s25  ;;  %v6297_v41 = vsel %vm4209_vm7, %v6244_v7, %v6296_v28  ;;  %v5635_v15 = vcombine.high %v5633_v42, %v5633_v42  ;;  %v9310_v51 = vrot.slane %v5634_v18, 9  ;;  %v9311_v32 = vrot.slane %v5633_v42, 9 }
 0x411   :  { %6468 = vrot.lane.b32.xlu0 %v6363_v3, %s10420_s25  ;;  %v6298_v19 = vsel %vm4211_vm8, %v6248_v20, %v6297_v41  ;;  %v6030_v38 = vmax.f32 %v5626_v61, %v9309_v16  ;;  %v5430_v43 = vmul.f32 0.1, %v5414_v36  ;;  %v5433_v23 = vmul.f32 0.1, %v5417_v46 }
 0x412   :  { %6320 = vst.msk [vmem:[#allocation3 + $0x41] sm:$0xf] %vm6314_vm1, %v6298_v19  ;;  %v6027_v62 = vmax.f32 %v12220_v63, %v9306_v24  ;;  %v9312_v29 = vrot.slane %v5635_v15, 9  ;;  %v6031_v6 = vmax.f32 %v5634_v18, %v9310_v51  ;;  %v6032_v59 = vmax.f32 %v5633_v42, %v9311_v32 }
 0x413   :  { %v6074_v8 = vmax.f32 %v6026_v30, %v6030_v38  ;;  %v5718_v13 = vrot.slane %v5704_v50, %v10769_v57  ;;  %v6029_v31 = vmax.f32 %v5618_v37, %v9308_v2  ;;  %v5719_v55 = vcombine.high %v5711_v40, %v5711_v40 }
 0x414   :  { %6410 = vrot.lane.b32.xlu1 %v6334_v12, %s10420_s25  ;;  %v6033_v27 = vmax.f32 %v5635_v15, %v9312_v29  ;;  %v6075_v53 = vmax.f32 %v6027_v62, %v6031_v6  ;;  %v6076_v58 = vmax.f32 %v6028_v48, %v6032_v59  ;;  %v5446_v33 = vmax.f32 %v5414_v36, %v5430_v43 }
 0x415   :  { %v5449_v56 = vmax.f32 %v5417_v46, %v5433_v23  ;;  %v5361_v39 = vadd.f32 %v11957_v14, %v12093_v9  ;;  %v6220_v45 = vrot.slane %v6074_v8, %v10774_v0  ;;  %v5720_v37 = vcombine.high %v5718_v13, %v5718_v13 }
 0x416   :  { %v6077_v63 = vmax.f32 %v6029_v31, %v6033_v27  ;;  %v6224_v4 = vrot.slane %v6075_v53, %v10774_v0  ;;  %v6228_v25 = vrot.slane %v6076_v58, %v10774_v0  ;;  %v9329_v17 = vrot.slane %v5711_v40, 9 }
 0x417   :  { %v5721_v5 = vcombine.high %v5449_v56, %v5449_v56  ;;  %v5728_v49 = vrot.slane %v5449_v56, %v10769_v57  ;;  %v9330_v24 = vrot.slane %v5719_v55, 9  ;;  %v5392_v7 = vmul.f32 %v12020_v10, %v5361_v39 }
 0x418   :  { %6502 = vrot.lane.b32.xlu1 %v6381_v54, %s10420_s25  ;;  %v6232_v26 = vrot.slane %v6077_v63, %v10774_v0  ;;  %v6293_v22 = vsel %vm4207_vm6, %v6224_v4, %v6220_v45  ;;  %v9331_v44 = vrot.slane %v5718_v13, 9  ;;  %v5670_v11 = vcombine.high %v5446_v33, %v5446_v33 }
 0x419   :  { %v6337_v14 = vld [vmem:[#allocation3 + $0x41] sm:$0xf]  ;;  %v6294_v9 = vsel %vm4209_vm7, %v6228_v25, %v6293_v22  ;;  %v5735_v21 = vrot.slane %v5721_v5, %v10769_v57  ;;  %v5736_v61 = vcombine.high %v5728_v49, %v5728_v49  ;;  %v9332_v52 = vrot.slane %v5720_v37, 9 }
 0x41a   :  { %6416 = vrot.lane.b32.xlu0 %v6337_v14, %s10420_s25  ;;  %v6352_v35 = vld [vmem:[#allocation3 + $0x40] sm:$0xf]  ;;  %v6295_v1 = vsel %vm4211_vm8, %v6232_v26, %v6294_v9  ;;  %v9333_v20 = vrot.slane %v5728_v49, 9  ;;  %v6050_v36 = vmax.f32 %v5711_v40, %v9329_v17  ;;  %v5677_v46 = vrot.slane %v5446_v33, %v10769_v57 }
 0x41b   :  { %6319 = vst.msk [vmem:[#allocation3 + $0x39] sm:$0xf] %vm6314_vm1, %v6295_v1  ;;  %v5737_v30 = vcombine.high %v5735_v21, %v5735_v21  ;;  %v9334_v60 = vrot.slane %v5736_v61, 9  ;;  %v9335_v10 = vrot.slane %v5735_v21, 9  ;;  %v6051_v28 = vmax.f32 %v5719_v55, %v9330_v24 }
 0x41c   :  { %6446 = vrot.lane.b32.xlu1 %v6352_v35, %s10420_s25  ;;  %v6054_v18 = vmax.f32 %v5728_v49, %v9333_v20  ;;  %v5415_v16 = vadd.f32 %v12026_v34, %v5392_v7  ;;  %v6052_v3 = vmax.f32 %v5718_v13, %v9331_v44  ;;  %v5684_v2 = vrot.slane %v5670_v11, %v10769_v57 }
 0x41d   :  { %v9336_v42 = vrot.slane %v5737_v30, 9  ;;  %v6055_v48 = vmax.f32 %v5736_v61, %v9334_v60  ;;  %v6056_v41 = vmax.f32 %v5735_v21, %v9335_v10  ;;  %v6053_v50 = vmax.f32 %v5720_v37, %v9332_v52  ;;  %v6366_v10 = vld [vmem:[#allocation3 + $0x22] sm:$0xf] }
 0x41e   :  { %v6086_v15 = vmax.f32 %v6050_v36, %v6054_v18  ;;  %v5431_v51 = vmul.f32 0.1, %v5415_v16  ;;  %v5685_v32 = vcombine.high %v5677_v46, %v5677_v46  ;;  %v9321_v43 = vrot.slane %v5677_v46, 9  ;;  %v6387_v18 = vld [vmem:[#allocation3 + $0x59] sm:$0xf] }
 0x41f   :  { %v6057_v19 = vmax.f32 %v5737_v30, %v9336_v42  ;;  %v6087_v38 = vmax.f32 %v6051_v28, %v6055_v48  ;;  %v6088_v40 = vmax.f32 %v6052_v3, %v6056_v41  ;;  %v5686_v62 = vcombine.high %v5684_v2, %v5684_v2  ;;  %v6384_v3 = vld [vmem:[#allocation3 + $0x41] sm:$0xf] }
 0x420   :  { %v5447_v12 = vmax.f32 %v5415_v16, %v5431_v51  ;;  %v6268_v29 = vrot.slane %v6086_v15, %v10774_v0  ;;  %v9322_v53 = vrot.slane %v5685_v32, 9  ;;  %v9323_v58 = vrot.slane %v5684_v2, 9  ;;  %v6365_v16 = vld [vmem:[#allocation3 + $0x1a] sm:$0xf]  ;;  %v6405_v51 = vpop.permute.xlu0 %6404 }
 0x421   :  { %v6089_v23 = vmax.f32 %v6053_v50, %v6057_v19  ;;  %v6272_v34 = vrot.slane %v6087_v38, %v10774_v0  ;;  %v6276_v6 = vrot.slane %v6088_v40, %v10774_v0  ;;  %v9324_v63 = vrot.slane %v5686_v62, 9 }
 0x422   :  { %v6351_v59 = vld [vmem:[#allocation3 + $0x38] sm:$0xf]  ;;  %v5687_v31 = vcombine.high %v5447_v12, %v5447_v12  ;;  %v5694_v27 = vrot.slane %v5447_v12, %v10769_v57  ;;  %v6042_v45 = vmax.f32 %v5677_v46, %v9321_v43  ;;  %v6043_v26 = vmax.f32 %v5685_v32, %v9322_v53 }
 0x423   :  { %v6336_v8 = vld [vmem:[#allocation3 + $0x39] sm:$0xf]  ;;  %v6280_v13 = vrot.slane %v6089_v23, %v10774_v0  ;;  %6444 = vrot.lane.b32.xlu0 %v6351_v59, %s10420_s25  ;;  %v6302_v55 = vsel %vm4207_vm6, %v6272_v34, %v6268_v29  ;;  %v6044_v22 = vmax.f32 %v5684_v2, %v9323_v58  ;;  %v6045_v21 = vmax.f32 %v5686_v62, %v9324_v63  ;;  %v6368_v2 = vld [vmem:[#allocation3 + $0x42] sm:$0xf]  ;;  %v6324_v63 = vld [vmem:[#allocation3 + $0x8] sm:$0xf] }
 0x424   :  { %6414 = vrot.lane.b32.xlu1 %v6336_v8, %s10420_s25  ;;  %v6303_v33 = vsel %vm4209_vm7, %v6276_v6, %v6302_v55  ;;  %v5701_v56 = vrot.slane %v5687_v31, %v10769_v57  ;;  %v5702_v39 = vcombine.high %v5694_v27, %v5694_v27  ;;  %v9325_v54 = vrot.slane %v5694_v27, 9  ;;  %v6367_v50 = vld [vmem:[#allocation3 + $0x3a] sm:$0xf]  ;;  %v12325_v32 = vpop.permute.xlu0 %6412  ;;  %v6339_v62 = vld [vmem:[#allocation3 + $0x2] sm:$0xf] }
 0x425   :  { %v6304_v4 = vsel %vm4211_vm8, %v6280_v13, %v6303_v33  ;;  %v6340_v6 = vld [vmem:[#allocation3 + $0xa] sm:$0xf]  ;;  %v6342_v59 = vld [vmem:[#allocation3 + $0x1a] sm:$0xf]  ;;  %v6341_v8 = vld [vmem:[#allocation3 + $0x12] sm:$0xf] }
 0x426   :  { %6322 = vst.msk [vmem:[#allocation3 + $0x51] sm:$0xf] %vm6314_vm1, %v6304_v4  ;;  %v5703_v25 = vcombine.high %v5701_v56, %v5701_v56  ;;  %v9326_v37 = vrot.slane %v5702_v39, 9  ;;  %v9327_v5 = vrot.slane %v5701_v56, 9  ;;  %v6046_v49 = vmax.f32 %v5694_v27, %v9325_v54  ;;  %v6323_v54 = vld [vmem:[#allocation3] sm:$0xf] }
 0x427   :  { %v6325_v4 = vld [vmem:[#allocation3 + $0x10] sm:$0xf] }
 0x428   :  { %v9328_v17 = vrot.slane %v5703_v25, 9  ;;  %v6047_v14 = vmax.f32 %v5702_v39, %v9326_v37  ;;  %v6048_v9 = vmax.f32 %v5701_v56, %v9327_v5  ;;  %v6082_v24 = vmax.f32 %v6042_v45, %v6046_v49 }
 0x429   :  { %v6524_v5 = vsel %vm4904_vm13, %v6323_v54, %v6405_v51  ;;  %v6373_v51 = vld [vmem:[#allocation3 + $0x18] sm:$0xf] }
 0x42a   :  { %v6049_v7 = vmax.f32 %v5703_v25, %v9328_v17  ;;  %v6083_v35 = vmax.f32 %v6043_v26, %v6047_v14  ;;  %v6084_v1 = vmax.f32 %v6044_v22, %v6048_v9  ;;  %v6252_v11 = vrot.slane %v6082_v24, %v10774_v0  ;;  %v6326_v25 = vld [vmem:[#allocation3 + $0x18] sm:$0xf]  ;;  %v10172_v14 = vld [vmem:[%s12985_s7 + $0x80] sm:$0xff]   ;;  %v10173_v24 = vld [vmem:[%s12985_s7 + $0xc8] sm:$0xff]  }
 0x42c   :  { %v6085_v44 = vmax.f32 %v6045_v21, %v6049_v7  ;;  %v6256_v61 = vrot.slane %v6083_v35, %v10774_v0  ;;  %v6260_v52 = vrot.slane %v6084_v1, %v10774_v0  ;;  %v10174_v21 = vld [vmem:[%s12985_s7 + $0x88] sm:$0xff]   ;;  %v10175_v7 = vld [vmem:[%s12985_s7 + $0xd0] sm:$0xff]  }
 0x42d   :  { %v6354_v30 = vld [vmem:[#allocation3 + $0x50] sm:$0xf] }
 0x42e   :  { %v6264_v20 = vrot.slane %v6085_v44, %v10774_v0  ;;  %v6299_v36 = vsel %vm4207_vm6, %v6256_v61, %v6252_v11  ;;  %6450 = vrot.lane.b32.xlu1 %v6354_v30, %s10420_s25  ;;  %v6386_v48 = vld [vmem:[#allocation3 + $0x51] sm:$0xf]  ;;  %v10177_v44 = vld [vmem:[%s12985_s7 + $0xd8] sm:$0xff]  }
 0x42f   :  { %v6300_v46 = vsel %vm4209_vm7, %v6260_v52, %v6299_v36  ;;  %v6370_v19 = vld [vmem:[#allocation3 + $0x52] sm:$0xf]  ;;  %v10178_v11 = vld [vmem:[%s12985_s7 + $0x98] sm:$0xff]   ;;  %v10179_v52 = vld [vmem:[%s12985_s7 + $0xe0] sm:$0xff]  }
 0x430   :  { %v6301_v60 = vsel %vm4211_vm8, %v6264_v20, %v6300_v46  ;;  %v10176_v1 = vld [vmem:[%s12985_s7 + $0x90] sm:$0xff]   ;;  %v10180_v20 = vld [vmem:[%s12985_s7 + $0xa0] sm:$0xff]   ;;  %v10181_v36 = vld [vmem:[%s12985_s7 + $0xe8] sm:$0xff]  }
 0x431   :  { %6321 = vst.msk [vmem:[#allocation3 + $0x49] sm:$0xf] %vm6314_vm1, %v6301_v60 }
 0x432   :  { %6474 = vrot.lane.b32.xlu1 %v6366_v10, %s10420_s25  ;;  %v10182_v10 = vld [vmem:[%s12985_s7 + $0xa8] sm:$0xff]  }
 0x438   :  { %v6353_v28 = vld [vmem:[#allocation3 + $0x48] sm:$0xf] }
 0x439   :  { %v6338_v42 = vld [vmem:[#allocation3 + $0x49] sm:$0xf]  ;;  %6448 = vrot.lane.b32.xlu0 %v6353_v28, %s10420_s25  ;;  %v10183_v28 = vld [vmem:[%s12985_s7 + $0xf0] sm:$0xff]  }
 0x43a   :  { %6418 = vrot.lane.b32.xlu1 %v6338_v42, %s10420_s25  ;;  %v6385_v41 = vld [vmem:[#allocation3 + $0x49] sm:$0xf]  ;;  %v10184_v42 = vld [vmem:[%s12985_s7 + $0xb0] sm:$0xff]  }
 0x43b   :  { %v6369_v15 = vld [vmem:[#allocation3 + $0x4a] sm:$0xf] }
 0x43c   :  { %v6330_v54 = vld [vmem:[#allocation3 + $0x48] sm:$0xf] }
 0x43d   :  { %6472 = vrot.lane.b32.xlu0 %v6365_v16, %s10420_s25  ;;  %v10185_v16 = vld [vmem:[%s12985_s7 + $0xf8] sm:$0xff]  }
 0x43e   :  { %6514 = vrot.lane.b32.xlu1 %v6387_v18, %s10420_s25 }
 0x441   :  { %6508 = vrot.lane.b32.xlu0 %v6384_v3, %s10420_s25 }
 0x442   :  { %6478 = vrot.lane.b32.xlu1 %v6368_v2, %s10420_s25  ;;  %v10186_v2 = vld [vmem:[%s12985_s7 + $0xb8] sm:$0xff]  }
 0x445   :  { %6512 = vrot.lane.b32.xlu0 %v6386_v48, %s10420_s25  ;;  %v12391_v48 = vld [vmem:[%s12985_s7 + $0x100] sm:$0xff]  }
 0x446   :  { %6510 = vrot.lane.b32.xlu1 %v6385_v41, %s10420_s25 }
 0x449   :  { %6476 = vrot.lane.b32.xlu0 %v6367_v50, %s10420_s25 }
 0x44a   :  { %6482 = vrot.lane.b32.xlu1 %v6370_v19, %s10420_s25  ;;  %v6343_v19 = vld [vmem:[#allocation3 + $0x32] sm:$0xf] }
 0x44d   :  { %6480 = vrot.lane.b32.xlu0 %v6369_v15, %s10420_s25  ;;  %v6327_v15 = vld [vmem:[#allocation3 + $0x30] sm:$0xf] }
 0x45f   :  { %v6439_v40 = vpop.permute.xlu1 %6438 }
 0x460   :  { %v6409_v38 = vpop.permute.xlu0 %6408  ;;  %v6533_v31 = vsel %vm4904_vm13, %v6340_v6, %v6439_v40  ;;  %v6344_v40 = vld [vmem:[#allocation3 + $0x3a] sm:$0xf] }
 0x461   :  { %v6526_v49 = vsel %vm4904_vm13, %v6325_v4, %v6409_v38 }
 0x463   :  { %v6407_v23 = vpop.permute.xlu1 %6406 }
 0x464   :  { %v12327_v43 = vpop.permute.xlu0 %6500  ;;  %v6525_v45 = vsel %vm4904_vm13, %v6324_v63, %v6407_v23  ;;  %v6328_v23 = vld [vmem:[#allocation3 + $0x38] sm:$0xf] }
 0x465   :  { %v9337_v22 = vcombine.low %v6524_v5, %v6525_v45 }
 0x468   :  { %v6437_v12 = vpop.permute.xlu0 %6436 }
 0x469   :  { %v6532_v29 = vsel %vm4904_vm13, %v6339_v62, %v6437_v12  ;;  %v6346_v12 = vld [vmem:[#allocation3 + $0x4a] sm:$0xf]  ;;  %v6372_v62 = vld [vmem:[#allocation3 + $0x10] sm:$0xf] }
 0x46a   :  { %v9338_v58 = vcombine.low %v6532_v29, %v6533_v31  ;;  %v6375_v29 = vld [vmem:[#allocation3 + $0x28] sm:$0xf]  ;;  %v6528_v31 = vsel %vm4904_vm13, %v6327_v15, %v12325_v32 }
 0x46b   :  { %v10188_v15 = vld [vmem:[%s12985_s7 + $0x108] sm:$0xff]  }
 0x47a   :  { %v6443_v34 = vpop.permute.xlu1 %6442 }
 0x47b   :  { %v6441_v13 = vpop.permute.xlu0 %6440  ;;  %v6535_v27 = vsel %vm4904_vm13, %v6342_v59, %v6443_v34  ;;  %v6374_v34 = vld [vmem:[#allocation3 + $0x20] sm:$0xf] }
 0x47c   :  { %v6534_v53 = vsel %vm4904_vm13, %v6341_v8, %v6441_v13 }
 0x47d   :  { %v9342_v55 = vcombine.low %v6534_v53, %v6535_v27  ;;  %v6548_v27 = vsel %vm4904_vm13, %v6372_v62, %v12327_v43  ;;  %v6360_v62 = vld [vmem:[#allocation3 + $0x41] sm:$0xf] }
 0x47e   :  { %v12333_v33 = vpop.permute.xlu1 %6506 }
 0x47f   :  { %v6653_v56 = vpack.c.bf16 %v9342_v55, %v9338_v58  ;;  %v6505_v61 = vpop.permute.xlu0 %6504  ;;  %v6329_v58 = vld [vmem:[#allocation3 + $0x40] sm:$0xf]  ;;  %v6551_v43 = vsel %vm4904_vm13, %v6375_v29, %v12333_v33  ;;  %v6379_v33 = vld [vmem:[#allocation3 + $0x58] sm:$0xf]  ;;  %v6362_v29 = vld [vmem:[#allocation3 + $0x51] sm:$0xf] }
 0x480   :  { %v6550_v53 = vsel %vm4904_vm13, %v6374_v34, %v6505_v61  ;;  %v6345_v55 = vld [vmem:[#allocation3 + $0x42] sm:$0xf] }
 0x481   :  { %6988 = vmatprep.mubr.bf16.mxu1 %v6653_v56 }
 0x482   :  { %v12335_v39 = vpop.permute.xlu1 %6470 }
 0x483   :  { %v12371_v46 = vpop.permute.xlu0 %6468 }
 0x486   :  { %v6411_v37 = vpop.permute.xlu1 %6410 }
 0x487   :  { %v6527_v26 = vsel %vm4904_vm13, %v6326_v25, %v6411_v37 }
 0x488   :  { %v9341_v17 = vcombine.low %v6526_v49, %v6527_v26 }
 0x48a   :  { %v6652_v9 = vpack.c.bf16 %v9341_v17, %v9337_v22  ;;  %v6503_v35 = vpop.permute.xlu1 %6502  ;;  %v9344_v22 = vcombine.low %v6550_v53, %v6551_v43  ;;  %v10191_v53 = vld [vmem:[#allocation3 + $0x22] ss:$8 sps:$4 sm:$0xff]  }
 0x48b   :  { %v6549_v38 = vsel %vm4904_vm13, %v6373_v51, %v6503_v35  ;;  %v10203_v43 = vld [vmem:[%s12986_s10 + $0x20] ss:$8 sps:$4 sm:$0xff]  }
 0x48c   :  { %6989 = vmatmul.mubr.bf16.vlgmr.msra.gmra.mrb[112].mxu1 %v6652_v9  ;;  %v6417_v18 = vpop.permute.xlu0 %6416  ;;  %v9340_v4 = vcombine.low %v6548_v27, %v6549_v38  ;;  %v10190_v27 = vld [vmem:[#allocation3 + $0x12] ss:$8 sps:$4 sm:$0xff]  }
 0x48d   :  { %9707 = vmatpush3.bf16.msra.mxu1 %v10172_v14  ;;  %v6530_v45 = vsel %vm4904_vm13, %v6329_v58, %v6417_v18  ;;  %v10192_v58 = vld [vmem:[%s12985_s7 + $0x118] sm:$0xff]  }
 0x48e   :  { %9708 = vmatprep.subr.bf16.mxu1 %v10173_v24  ;;  %v6447_v30 = vpop.permute.xlu1 %6446  ;;  %v6655_v35 = vpack.c.bf16 %v9344_v22, %v9340_v4  ;;  %v10194_v4 = vld [vmem:[#allocation3 + $0x52] ss:$8 sps:$4 sm:$0xff]  }
 0x48f   :  { %v6537_v59 = vsel %vm4904_vm13, %v6344_v40, %v6447_v30  ;;  %v10204_v22 = vld [vmem:[%s12986_s10 + $0x34] ss:$8 sps:$4 sm:$0xff]  }
 0x491   :  { %9709 = vmatpush3.bf16.msra.mxu1 %v10174_v21  ;;  %v6358_v21 = vld [vmem:[#allocation3 + $0x21] sm:$0xf] }
 0x492   :  { %9710 = vmatprep.subr.bf16.mxu1 %v10175_v7 }
 0x495   :  { %9711 = vmatpush3.bf16.msra.mxu1 %v10176_v1  ;;  %v6445_v41 = vpop.permute.xlu0 %6444  ;;  %v6355_v1 = vld [vmem:[#allocation3 + $0x9] sm:$0xf] }
 0x496   :  { %9712 = vmatprep.subr.bf16.mxu1 %v10177_v44  ;;  %v6415_v60 = vpop.permute.xlu1 %6414  ;;  %v6536_v6 = vsel %vm4904_vm13, %v6343_v19, %v6445_v41  ;;  %v6357_v44 = vld [vmem:[#allocation3 + $0x19] sm:$0xf] }
 0x497   :  { %v6529_v8 = vsel %vm4904_vm13, %v6328_v23, %v6415_v60  ;;  %v9346_v5 = vcombine.low %v6536_v6, %v6537_v59  ;;  %v6359_v59 = vld [vmem:[#allocation3 + $0x39] sm:$0xf] }
 0x498   :  { %v9345_v49 = vcombine.low %v6528_v31, %v6529_v8  ;;  %v6361_v8 = vld [vmem:[#allocation3 + $0x49] sm:$0xf] }
 0x499   :  { %9713 = vmatpush3.bf16.msra.mxu1 %v10178_v11  ;;  %v6540_v11 = vsel %vm4904_vm13, %v6355_v1, %v12371_v46  ;;  %v10216_v1 = vld [vmem:[%s12986_s10 + $0x74] ss:$8 sps:$4 sm:$0xff]  }
 0x49a   :  { %9714 = vmatprep.subr.bf16.mxu1 %v10179_v52 }
 0x49d   :  { %9715 = vmatpush3.bf16.msra.mxu1 %v10180_v20  ;;  %v6356_v20 = vld [vmem:[#allocation3 + $0x11] sm:$0xf] }
 0x49e   :  { %9716 = vmatprep.subr.bf16.mxu1 %v10181_v36  ;;  %v6541_v60 = vsel %vm4904_vm13, %v6356_v20, %v12335_v39  ;;  %v10227_v20 = vld [vmem:[%s12986_s10 + $0xa0] ss:$8 sps:$4 sm:$0xff]  }
 0x4a0   :  { %v6451_v3 = vpop.permute.xlu1 %6450 }
 0x4a1   :  { %9717 = vmatpush3.bf16.msra.mxu1 %v10182_v10  ;;  %v6539_v13 = vsel %vm4904_vm13, %v6346_v12, %v6451_v3  ;;  %v9339_v10 = vcombine.low %v6540_v11, %v6541_v60  ;;  %v6377_v3 = vld [vmem:[#allocation3 + $0x48] sm:$0xf]  ;;  %v10189_v12 = vld [vmem:[%s12985_s7 + $0x110] sm:$0xff]   ;;  %v10219_v11 = vld [vmem:[%s12986_s10 + $0x84] ss:$8 sps:$4 sm:$0xff]  }
 0x4a2   :  { %9718 = vmatprep.subr.bf16.mxu1 %v10183_v28 }
 0x4a4   :  { %v6475_v50 = vpop.permute.xlu1 %6474 }
 0x4a5   :  { %9719 = vmatpush3.bf16.msra.mxu1 %v10184_v42  ;;  %v6543_v7 = vsel %vm4904_vm13, %v6358_v21, %v6475_v50  ;;  %v6376_v42 = vld [vmem:[#allocation3 + $0x40] sm:$0xf]  ;;  %v10212_v21 = vld [vmem:[%s12986_s10 + $0x50] ss:$8 sps:$4 sm:$0xff]  }
 0x4a6   :  { %9720 = vmatprep.subr.bf16.mxu1 %v10185_v16  ;;  %v6378_v16 = vld [vmem:[#allocation3 + $0x50] sm:$0xf] }
 0x4a9   :  { %9721 = vmatpush3.bf16.msra.mxu1 %v10186_v2 }
 0x4aa   :  { %9828 = vmatprep.subr.bf16.mxu1 %v12391_v48 }
 0x4ab   :  { %v6449_v56 = vpop.permute.xlu0 %6448 }
 0x4ac   :  { %v6419_v63 = vpop.permute.xlu1 %6418  ;;  %v6538_v25 = vsel %vm4904_vm13, %v6345_v55, %v6449_v56 }
 0x4ad   :  { %v6531_v37 = vsel %vm4904_vm13, %v6330_v54, %v6419_v63  ;;  %v9350_v32 = vcombine.low %v6538_v25, %v6539_v13  ;;  %v6656_v63 = vpack.c.bf16 %v10191_v53, %v10190_v27 }
 0x4ae   :  { %v9349_v26 = vcombine.low %v6530_v45, %v6531_v37  ;;  %v10193_v45 = vld [vmem:[#allocation3 + $0x42] ss:$8 sps:$4 sm:$0xff]  }
 0x4af   :  { %v6473_v17 = vpop.permute.xlu0 %6472  ;;  %v6658_v14 = vpack.c.bf16 %v9350_v32, %v9346_v5  ;;  %v6661_v25 = vpack.c.bf16 %v10194_v4, %v10193_v45  ;;  %v10195_v37 = vld [vmem:[%s12986_s10 + $0x4] ss:$8 sps:$4 sm:$0xff]   ;;  %v10197_v5 = vld [vmem:[%s12986_s10] ss:$8 sps:$4 sm:$0xff]   ;;  %v10200_v32 = vld [vmem:[%s12986_s10 + $0x10] ss:$8 sps:$4 sm:$0xff]  }
 0x4b0   :  { %v6515_v9 = vpop.permute.xlu1 %6514  ;;  %v6657_v24 = vpack.c.bf16 %v9349_v26, %v9345_v49  ;;  %v6542_v61 = vsel %vm4904_vm13, %v6357_v44, %v6473_v17  ;;  %8575 = vmatprep.subr.bf16.mxu0 %v10195_v37  ;;  %v10198_v49 = vld [vmem:[%s12986_s10 + $0x14] ss:$8 sps:$4 sm:$0xff]   ;;  %v10201_v26 = vld [vmem:[%s12986_s10 + $0x24] ss:$8 sps:$4 sm:$0xff]   ;;  %v10206_v17 = vld [vmem:[%s12986_s10 + $0x30] ss:$8 sps:$4 sm:$0xff]  }
 0x4b1   :  { %6996 = vmatprep.mubr.bf16.mxu1 %v6658_v14  ;;  %v9343_v36 = vcombine.low %v6542_v61, %v6543_v7  ;;  %v6555_v28 = vsel %vm4904_vm13, %v6379_v33, %v6515_v9  ;;  %8576 = vmatpush1.bf16.msra.mxu0 %v10197_v5  ;;  %v10207_v14 = vld [vmem:[%s12986_s10 + $0x44] ss:$8 sps:$4 sm:$0xff]   ;;  %v10209_v9 = vld [vmem:[%s12986_s10 + $0x40] ss:$8 sps:$4 sm:$0xff]   ;;  %v10218_v44 = vld [vmem:[%s12986_s10 + $0x70] ss:$8 sps:$4 sm:$0xff]  }
 0x4b2   :  { %6997 = vmatmul.mubr.bf16.gmra.mrb[116].mxu1 %v6657_v24  ;;  %8577 = vmatprep.subr.bf16.mxu0 %v10198_v49  ;;  %v10210_v24 = vld [vmem:[%s12986_s10 + $0x54] ss:$8 sps:$4 sm:$0xff]   ;;  %v10213_v7 = vld [vmem:[%s12986_s10 + $0x64] ss:$8 sps:$4 sm:$0xff]   ;;  %v10221_v61 = vld [vmem:[%s12986_s10 + $0x80] ss:$8 sps:$4 sm:$0xff]  }
 0x4b3   :  { %v6509_v52 = vpop.permute.xlu0 %6508  ;;  %7037 = vmatprep.mubr.bf16.mxu1 %v6655_v35  ;;  %v6654_v41 = vpack.c.bf16 %v9343_v36, %v9339_v10  ;;  %v10215_v35 = vld [vmem:[%s12986_s10 + $0x60] ss:$8 sps:$4 sm:$0xff]   ;;  %v10224_v33 = vld [vmem:[%s12986_s10 + $0x90] ss:$8 sps:$4 sm:$0xff]   ;;  %v10228_v36 = vld [vmem:[%s12986_s10 + $0xb4] ss:$8 sps:$4 sm:$0xff]  }
 0x4b4   :  { %v6479_v30 = vpop.permute.xlu1 %6478  ;;  %v6552_v46 = vsel %vm4904_vm13, %v6376_v42, %v6509_v52  ;;  %v10222_v52 = vld [vmem:[%s12986_s10 + $0x94] ss:$8 sps:$4 sm:$0xff]   ;;  %v9391_v5 = vld [vmem:[%s12987_s8] ss:$0 sm:$0xff] }
 0x4b5   :  { %v6545_v34 = vsel %vm4904_vm13, %v6360_v62, %v6479_v30  ;;  %8578 = vmatpush1.bf16.msra.mxu0 %v10200_v32  ;;  %v10225_v30 = vld [vmem:[%s12986_s10 + $0xa4] ss:$8 sps:$4 sm:$0xff]  }
 0x4b6   :  { %8579 = vmatprep.subr.bf16.mxu0 %v10201_v26  ;;  %v9392_v26 = vld [vmem:[%s12988_s9] ss:$0 sm:$0xff] }
 0x4b7   :  { %v6513_v18 = vpop.permute.xlu0 %6512 }
 0x4b8   :  { %v6511_v2 = vpop.permute.xlu1 %6510  ;;  %v6554_v50 = vsel %vm4904_vm13, %v6378_v16, %v6513_v18  ;;  %v10231_v16 = vld [vmem:[%s12986_s10 + $0xc4] ss:$8 sps:$4 sm:$0xff]  }
 0x4b9   :  { %v6553_v19 = vsel %vm4904_vm13, %v6377_v3, %v6511_v2  ;;  %v9352_v39 = vcombine.low %v6554_v50, %v6555_v28  ;;  %8580 = vmatpush1.bf16.msra.mxu0 %v10203_v43  ;;  %v10230_v28 = vld [vmem:[%s12986_s10 + $0xb0] ss:$8 sps:$4 sm:$0xff]  }
 0x4ba   :  { %v9348_v51 = vcombine.low %v6552_v46, %v6553_v19  ;;  %7038 = vmatmul.mubr.bf16.vlgmr.msra.gmra.mrb[120].mxu1 %v6654_v41  ;;  %8581 = vmatprep.subr.bf16.mxu0 %v10204_v22  ;;  %v10233_v46 = vld [vmem:[%s12986_s10 + $0xc0] ss:$8 sps:$4 sm:$0xff]   ;;  %v10234_v41 = vld [vmem:[%s12986_s10 + $0xd4] ss:$8 sps:$4 sm:$0xff]   ;;  %v10236_v50 = vld [vmem:[%s12986_s10 + $0xd0] ss:$8 sps:$4 sm:$0xff]  }
 0x4bb   :  { %v6477_v38 = vpop.permute.xlu0 %6476  ;;  %9829 = vmatpush3.bf16.msra.mxu1 %v12391_v48  ;;  %v10237_v19 = vld [vmem:[%s12986_s10 + $0xe4] ss:$8 sps:$4 sm:$0xff]  }
 0x4bc   :  { %v6483_v40 = vpop.permute.xlu1 %6482  ;;  %v6660_v23 = vpack.c.bf16 %v9352_v39, %v9348_v51  ;;  %9830 = vmatprep.subr.bf16.mxu1 %v10188_v15  ;;  %v6544_v48 = vsel %vm4904_vm13, %v6359_v59, %v6477_v38  ;;  %v10240_v39 = vld [vmem:[%s12986_s10 + $0xf4] ss:$8 sps:$4 sm:$0xff]   ;;  %v10242_v51 = vld [vmem:[%s12986_s10 + $0xf0] ss:$8 sps:$4 sm:$0xff]   ;;  %v10245_v38 = vld [vmem:[%s12986_s10 + $0x104] ss:$8 sps:$4 sm:$0xff]  }
 0x4bd   :  { %v6547_v6 = vsel %vm4904_vm13, %v6362_v29, %v6483_v40  ;;  %v9347_v55 = vcombine.low %v6544_v48, %v6545_v34  ;;  %8582 = vmatpush1.bf16.msra.mxu0 %v10206_v17 }
 0x4be   :  { %7045 = vmatprep.mubr.bf16.mxu1 %v6660_v23  ;;  %8583 = vmatprep.subr.bf16.mxu0 %v10207_v14 }
 0x4bf   :  { %v6481_v13 = vpop.permute.xlu0 %6480  ;;  %9831 = vmatpush3.bf16.msra.mxu1 %v10188_v15  ;;  %v10239_v15 = vld [vmem:[%s12986_s10 + $0xe0] ss:$8 sps:$4 sm:$0xff]  }
 0x4c0   :  { %v6546_v31 = vsel %vm4904_vm13, %v6361_v8, %v6481_v13  ;;  %9832 = vmatprep.subr.bf16.mxu1 %v10189_v12 }
 0x4c1   :  { %v9351_v56 = vcombine.low %v6546_v31, %v6547_v6  ;;  %8584 = vmatpush1.bf16.msra.mxu0 %v10209_v9 }
 0x4c2   :  { %8585 = vmatprep.subr.bf16.mxu0 %v10210_v24 }
 0x4c3   :  { %v6659_v54 = vpack.c.bf16 %v9351_v56, %v9347_v55  ;;  %9833 = vmatpush3.bf16.msra.mxu1 %v10189_v12 }
 0x4c4   :  { %9834 = vmatprep.subr.bf16.mxu1 %v10192_v58 }
 0x4c5   :  { %7046 = vmatmul.mubr.bf16.gmra.mrb[124].mxu1 %v6659_v54  ;;  %8586 = vmatpush1.bf16.msra.mxu0 %v10212_v21 }
 0x4c6   :  { %9836 = vmatprep.mubr.msk.bf16.mxu1 %vm4904_vm13, %v6656_v63  ;;  %8587 = vmatprep.subr.bf16.mxu0 %v10213_v7 }
 0x4c7   :  { %9835 = vmatpush3.bf16.msra.mxu1 %v10192_v58 }
 0x4c9   :  { %8588 = vmatpush1.bf16.msra.mxu0 %v10215_v35 }
 0x4ca   :  { %8589 = vmatprep.subr.bf16.mxu0 %v10216_v1 }
 0x4cd   :  { %9837 = vmatmul.mubr.msk.bf16.vlgmr.msra.gmra.mrb[128].mxu1 %vm4904_vm13, %v6661_v25  ;;  %8590 = vmatpush1.bf16.msra.mxu0 %v10218_v44 }
 0x4ce   :  { %8591 = vmatprep.subr.bf16.mxu0 %v10219_v11 }
 0x4d1   :  { %8592 = vmatpush1.bf16.msra.mxu0 %v10221_v61 }
 0x4d2   :  { %8593 = vmatprep.subr.bf16.mxu0 %v10222_v52 }
 0x4d5   :  { %8594 = vmatpush1.bf16.msra.mxu0 %v10224_v33 }
 0x4d6   :  { %8595 = vmatprep.subr.bf16.mxu0 %v10225_v30 }
 0x4d9   :  { %8596 = vmatpush1.bf16.msra.mxu0 %v10227_v20 }
 0x4da   :  { %8597 = vmatprep.subr.bf16.mxu0 %v10228_v36 }
 0x4dd   :  { %8598 = vmatpush1.bf16.msra.mxu0 %v10230_v28 }
 0x4de   :  { %8599 = vmatprep.subr.bf16.mxu0 %v10231_v16 }
 0x4e1   :  { %8600 = vmatpush1.bf16.msra.mxu0 %v10233_v46 }
 0x4e2   :  { %8601 = vmatprep.subr.bf16.mxu0 %v10234_v41 }
 0x4e5   :  { %8602 = vmatpush1.bf16.msra.mxu0 %v10236_v50 }
 0x4e6   :  { %8603 = vmatprep.subr.bf16.mxu0 %v10237_v19 }
 0x4e9   :  { %8604 = vmatpush1.bf16.msra.mxu0 %v10239_v15 }
 0x4ea   :  { %8605 = vmatprep.subr.bf16.mxu0 %v10240_v39 }
 0x4ed   :  { %8606 = vmatpush1.bf16.msra.mxu0 %v10242_v51 }
 0x4ee   :  { %8616 = vmatprep.subr.bf16.mxu0 %v10245_v38 }
 0x55f   :  { %v9694_v60 = vpop.f32.mrb[112].mxu1 }
 0x560   :  { %v9695_v10 = vpop.f32.mrb[113].mxu1 }
 0x561   :  { %v9696_v42 = vadd.f32 %v9695_v10, %v9694_v60  ;;  %v9697_v18 = vpop.f32.mrb[114].mxu1 }
 0x562   :  { %v9698_v3 = vpop.f32.mrb[115].mxu1 }
 0x563   :  { %v9699_v2 = vadd.f32 %v9698_v3, %v9697_v18 }
 0x585   :  { %v9700_v40 = vpop.f32.mrb[116].mxu1 }
 0x586   :  { %v9701_v23 = vpop.f32.mrb[117].mxu1 }
 0x587   :  { %v9702_v12 = vadd.f32 %v9701_v23, %v9700_v40  ;;  %v9703_v62 = vpop.f32.mrb[118].mxu1 }
 0x588   :  { %v9704_v29 = vpop.f32.mrb[119].mxu1 }
 0x589   :  { %v9705_v34 = vadd.f32 %v9704_v29, %v9703_v62 }
 0x58d   :  { %v9722_v6 = vpop.f32.mrb[120].mxu1 }
 0x58e   :  { %v9723_v59 = vpop.f32.mrb[121].mxu1 }
 0x58f   :  { %v9724_v8 = vadd.f32 %v9723_v59, %v9722_v6  ;;  %v9725_v13 = vpop.f32.mrb[122].mxu1 }
 0x590   :  { %v9726_v48 = vpop.f32.mrb[123].mxu1 }
 0x591   :  { %v9727_v31 = vadd.f32 %v9726_v48, %v9725_v13  ;;  %v7040_v27 = vadd.f32 %v9724_v8, %v9696_v42 }
 0x593   :  { %v7043_v53 = vadd.f32 %v9727_v31, %v9699_v2 }
 0x598   :  { %v9728_v58 = vpop.f32.mrb[124].mxu1 }
 0x599   :  { %v9729_v55 = vpop.f32.mrb[125].mxu1 }
 0x59a   :  { %v9730_v56 = vadd.f32 %v9729_v55, %v9728_v58  ;;  %v9731_v54 = vpop.f32.mrb[126].mxu1 }
 0x59b   :  { %v9732_v63 = vpop.f32.mrb[127].mxu1 }
 0x59c   :  { %v9733_v45 = vadd.f32 %v9732_v63, %v9731_v54  ;;  %v7048_v4 = vadd.f32 %v9730_v56, %v9702_v12 }
 0x59e   :  { %v7051_v25 = vadd.f32 %v9733_v45, %v9705_v34 }
 0x5a0   :  { %v9838_v37 = vpop.f32.mrb[128].mxu1 }
 0x5a1   :  { %v7097_v49 = vadd.f32 %v9838_v37, %v7048_v4  ;;  %v7088_v32 = vpop.f32.mrb[129].mxu1 }
 0x5a2   :  { %v7089_v43 = vadd.f32 %v7088_v32, %v7040_v27  ;;  %v9839_v22 = vpop.f32.mrb[130].mxu1 }
 0x5a3   :  { %v7112_v17 = vmul.f32 %v9391_v5, %v7097_v49  ;;  %v7100_v14 = vadd.f32 %v9839_v22, %v7051_v25  ;;  %v7091_v9 = vpop.f32.mrb[131].mxu1 }
 0x5a4   :  { %v7110_v24 = vmul.f32 %v9391_v5, %v7089_v43  ;;  %v7092_v21 = vadd.f32 %v7091_v9, %v7043_v53 }
 0x5a5   :  { %v7123_v7 = vadd.f32 %v9392_v26, %v7112_v17  ;;  %v7113_v35 = vmul.f32 %v9391_v5, %v7100_v14 }
 0x5a6   :  { %v7121_v1 = vadd.f32 %v9392_v26, %v7110_v24  ;;  %v7111_v44 = vmul.f32 %v9391_v5, %v7092_v21 }
 0x5a7   :  { %v7127_v11 = vmul.f32 0.1, %v7123_v7  ;;  %v7124_v61 = vadd.f32 %v9392_v26, %v7113_v35 }
 0x5a8   :  { %v7125_v52 = vmul.f32 0.1, %v7121_v1  ;;  %v7122_v33 = vadd.f32 %v9392_v26, %v7111_v44 }
 0x5a9   :  { %v7131_v30 = vmax.f32 %v7123_v7, %v7127_v11  ;;  %v7128_v20 = vmul.f32 0.1, %v7124_v61 }
 0x5aa   :  { %v7129_v36 = vmax.f32 %v7121_v1, %v7125_v52  ;;  %v7126_v60 = vmul.f32 0.1, %v7122_v33 }
 0x5ab   :  { %v7171_v10 = vcombine.high %v7131_v30, %v7131_v30  ;;  %v7178_v28 = vrot.slane %v7131_v30, %v10769_v57  ;;  %v7132_v42 = vmax.f32 %v7124_v61, %v7128_v20 }
 0x5ac   :  { %v7137_v18 = vcombine.high %v7129_v36, %v7129_v36  ;;  %v7144_v16 = vrot.slane %v7129_v36, %v10769_v57  ;;  %v7130_v3 = vmax.f32 %v7122_v33, %v7126_v60 }
 0x5ad   :  { %v7185_v2 = vrot.slane %v7171_v10, %v10769_v57  ;;  %v7186_v46 = vcombine.high %v7178_v28, %v7178_v28  ;;  %v9401_v41 = vrot.slane %v7178_v28, 9  ;;  %v7188_v50 = vcombine.high %v7132_v42, %v7132_v42 }
 0x5ae   :  { %v7151_v19 = vrot.slane %v7137_v18, %v10769_v57  ;;  %v7152_v15 = vcombine.high %v7144_v16, %v7144_v16  ;;  %v9393_v39 = vrot.slane %v7144_v16, 9  ;;  %v7195_v51 = vrot.slane %v7132_v42, %v10769_v57  ;;  %v7369_v42 = vld [vmem:[#allocation4 + $0x10] sm:$0x3] }
 0x5af   :  { %v7187_v38 = vcombine.high %v7185_v2, %v7185_v2  ;;  %v9402_v40 = vrot.slane %v7186_v46, 9  ;;  %v9403_v23 = vrot.slane %v7185_v2, 9  ;;  %v7277_v12 = vmax.f32 %v7178_v28, %v9401_v41  ;;  %v7373_v18 = vld [vmem:[#allocation4 + $0x11] sm:$0x3] }
 0x5b0   :  { %v7153_v62 = vcombine.high %v7151_v19, %v7151_v19  ;;  %v9394_v29 = vrot.slane %v7152_v15, 9  ;;  %v9395_v34 = vrot.slane %v7151_v19, 9  ;;  %v7269_v6 = vmax.f32 %v7144_v16, %v9393_v39  ;;  %v7367_v16 = vld [vmem:[#allocation4] sm:$0x3] }
 0x5b1   :  { %v9404_v59 = vrot.slane %v7187_v38, 9  ;;  %v7278_v8 = vmax.f32 %v7186_v46, %v9402_v40  ;;  %v7279_v13 = vmax.f32 %v7185_v2, %v9403_v23  ;;  %v7202_v48 = vrot.slane %v7188_v50, %v10769_v57 }
 0x5b2   :  { %v9396_v31 = vrot.slane %v7153_v62, 9  ;;  %v7270_v27 = vmax.f32 %v7152_v15, %v9394_v29  ;;  %v7271_v53 = vmax.f32 %v7151_v19, %v9395_v34  ;;  %v7203_v58 = vcombine.high %v7195_v51, %v7195_v51 }
 0x5b3   :  { %v7280_v55 = vmax.f32 %v7187_v38, %v9404_v59  ;;  %v7289_v56 = vmax.f32 %v7277_v12, %v7279_v13  ;;  %v7204_v54 = vcombine.high %v7202_v48, %v7202_v48  ;;  %v9405_v63 = vrot.slane %v7195_v51, 9 }
 0x5b4   :  { %v7272_v45 = vmax.f32 %v7153_v62, %v9396_v31  ;;  %v7285_v4 = vmax.f32 %v7269_v6, %v7271_v53  ;;  %v9406_v25 = vrot.slane %v7203_v58, 9  ;;  %v9407_v37 = vrot.slane %v7202_v48, 9  ;;  %v7377_v31 = vld [vmem:[#allocation4 + $0x12] sm:$0x3]  ;;  %v7395_v53 = vld [vmem:[#allocation4 + $0x1c] sm:$0x3] }
 0x5b5   :  { %v7290_v5 = vmax.f32 %v7278_v8, %v7280_v55  ;;  %v7341_v49 = vrot.slane %v7289_v56, %v10774_v0  ;;  %v9408_v32 = vrot.slane %v7204_v54, 9  ;;  %v7281_v43 = vmax.f32 %v7195_v51, %v9405_v63 }
 0x5b6   :  { %v7286_v26 = vmax.f32 %v7270_v27, %v7272_v45  ;;  %v7282_v22 = vmax.f32 %v7203_v58, %v9406_v25  ;;  %v7283_v17 = vmax.f32 %v7202_v48, %v9407_v37  ;;  %v7154_v24 = vcombine.high %v7130_v3, %v7130_v3  ;;  %v7399_v58 = vld [vmem:[#allocation4 + $0x1d] sm:$0x3] }
 0x5b7   :  { %v7345_v14 = vrot.slane %v7290_v5, %v10774_v0  ;;  %v7284_v9 = vmax.f32 %v7204_v54, %v9408_v32  ;;  %v7161_v21 = vrot.slane %v7130_v3, %v10769_v57  ;;  %v7325_v7 = vrot.slane %v7285_v4, %v10774_v0  ;;  %v7371_v3 = vld [vmem:[#allocation4 + $0x1] sm:$0x3] }
 0x5b8   :  { %v7329_v35 = vrot.slane %v7286_v26, %v10774_v0  ;;  %v7291_v1 = vmax.f32 %v7281_v43, %v7283_v17  ;;  %v7168_v61 = vrot.slane %v7154_v24, %v10769_v57  ;;  %v7522_v19 = vcombine.low %v7369_v42, %v7373_v18  ;;  %v7393_v26 = vld [vmem:[#allocation4 + $0xc] sm:$0x3]  ;;  %v10243_v18 = vld [vmem:[%s12986_s10 + $0x100] ss:$8 sps:$4 sm:$0xff]  }
 0x5b9   :  { %v7356_v44 = vsel %vm4207_vm6, %v7345_v14, %v7341_v49  ;;  %v7292_v11 = vmax.f32 %v7282_v22, %v7284_v9  ;;  %v7169_v52 = vcombine.high %v7161_v21, %v7161_v21  ;;  %v9397_v20 = vrot.slane %v7161_v21, 9  ;;  %v7397_v14 = vld [vmem:[#allocation4 + $0xd] sm:$0x3] }
 0x5ba   :  { %7365 = vst [vmem:[#allocation4 + $0x15] sm:$0x3] %v7356_v44  ;;  %v7354_v33 = vsel %vm4207_vm6, %v7329_v35, %v7325_v7  ;;  %v7349_v30 = vrot.slane %v7291_v1, %v10774_v0  ;;  %v7170_v60 = vcombine.high %v7168_v61, %v7168_v61  ;;  %v9399_v28 = vrot.slane %v7168_v61, 9  ;;  %v7375_v7 = vld [vmem:[#allocation4 + $0x2] sm:$0x3] }
 0x5bb   :  { %7363 = vst [vmem:[#allocation4 + $0x5] sm:$0x3] %v7354_v33  ;;  %v7353_v36 = vrot.slane %v7292_v11, %v10774_v0  ;;  %v9398_v10 = vrot.slane %v7169_v52, 9  ;;  %v7273_v41 = vmax.f32 %v7161_v21, %v9397_v20  ;;  %v7440_v38 = vcombine.low %v7367_v16, %v7371_v3 }
 0x5bc   :  { %v9400_v46 = vrot.slane %v7170_v60, 9  ;;  %v7275_v50 = vmax.f32 %v7168_v61, %v9399_v28  ;;  %v7530_v34 = vrot.slane %v7522_v19, %v10769_v57  ;;  %v7581_v24 = vcombine.low %v7395_v53, %v7399_v58  ;;  %v10246_v53 = vld [vmem:[%s12986_s10 + $0x110] ss:$8 sps:$4 sm:$0xff]  }
 0x5bd   :  { %v7357_v2 = vsel %vm4207_vm6, %v7353_v36, %v7349_v30  ;;  %v7274_v15 = vmax.f32 %v7169_v52, %v9398_v10  ;;  %v7448_v13 = vrot.slane %v7440_v38, %v10769_v57  ;;  %v7499_v36 = vcombine.low %v7393_v26, %v7397_v14 }
 0x5be   :  { %7366 = vst [vmem:[#allocation4 + $0x19] sm:$0x3] %v7357_v2  ;;  %v7276_v39 = vmax.f32 %v7170_v60, %v9400_v46  ;;  %v7287_v51 = vmax.f32 %v7273_v41, %v7275_v50  ;;  %v7595_v42 = vrot.slane %v7581_v24, %v10769_v57  ;;  %v10257_v24 = vld [vmem:[%s12986_s10 + $0x144] ss:$8 sps:$4 sm:$0xff]  }
 0x5c0   :  { %v7288_v40 = vmax.f32 %v7274_v15, %v7276_v39  ;;  %v7333_v59 = vrot.slane %v7287_v51, %v10774_v0 }
 0x5c1   :  { %v7370_v23 = vld [vmem:[#allocation4 + $0x14] sm:$0x3]  ;;  %v7378_v27 = vld [vmem:[#allocation4 + $0x16] sm:$0x3] }
 0x5c2   :  { %v7374_v12 = vld [vmem:[#allocation4 + $0x15] sm:$0x3]  ;;  %v7368_v62 = vld [vmem:[#allocation4 + $0x4] sm:$0x3]  ;;  %v7337_v8 = vrot.slane %v7288_v40, %v10774_v0  ;;  %v7387_v33 = vld [vmem:[#allocation4 + $0x6] sm:$0x3] }
 0x5c3   :  { %v7372_v29 = vld [vmem:[#allocation4 + $0x5] sm:$0x3]  ;;  %v7563_v6 = vcombine.low %v7370_v23, %v7374_v12  ;;  %v7381_v56 = vld [vmem:[#allocation4 + $0x14] sm:$0x3]  ;;  %v7389_v63 = vld [vmem:[#allocation4 + $0x16] sm:$0x3] }
 0x5c4   :  { %v7481_v48 = vcombine.low %v7368_v62, %v7372_v29  ;;  %v7385_v54 = vld [vmem:[#allocation4 + $0x15] sm:$0x3]  ;;  %v7355_v45 = vsel %vm4207_vm6, %v7337_v8, %v7333_v59  ;;  %v7523_v35 = vcombine.low %v7377_v31, %v7381_v56  ;;  %v7379_v61 = vld [vmem:[#allocation4 + $0x4] sm:$0x3]  ;;  %v7376_v16 = vld [vmem:[#allocation4 + $0x6] sm:$0x3]  ;;  %v7513_v59 = vrot.slane %v7499_v36, %v10769_v57 }
 0x5c5   :  { %v7571_v55 = vrot.slane %v7563_v6, %v10769_v57  ;;  %v7382_v25 = vld [vmem:[#allocation4 + $0x18] sm:$0x3]  ;;  %v7390_v5 = vld [vmem:[#allocation4 + $0x1a] sm:$0x3]  ;;  %7364 = vst [vmem:[#allocation4 + $0x9] sm:$0x3] %v7355_v45  ;;  %v7539_v1 = vcombine.low %v7385_v54, %v7389_v63  ;;  %v7441_v3 = vcombine.low %v7375_v7, %v7379_v61 }
 0x5c6   :  { %v7489_v4 = vrot.slane %v7481_v48, %v10769_v57  ;;  %v7386_v37 = vld [vmem:[#allocation4 + $0x19] sm:$0x3]  ;;  %v7564_v32 = vcombine.low %v7378_v27, %v7382_v25  ;;  %v7383_v52 = vld [vmem:[#allocation4 + $0x5] sm:$0x3]  ;;  %v7537_v2 = vrot.slane %v7523_v35, %v10769_v57  ;;  %v10248_v23 = vld [vmem:[%s12986_s10 + $0x114] ss:$8 sps:$4 sm:$0xff]  }
 0x5c7   :  { %v9415_v49 = vcombine.low %v7530_v34, %v7571_v55  ;;  %v7580_v22 = vcombine.low %v7386_v37, %v7390_v5  ;;  %v7394_v17 = vld [vmem:[#allocation4 + $0x18] sm:$0x3]  ;;  %v7457_v46 = vcombine.low %v7383_v52, %v7387_v33  ;;  %v7547_v41 = vrot.slane %v7539_v1, %v10769_v57  ;;  %v10251_v54 = vld [vmem:[%s12986_s10 + $0x124] ss:$8 sps:$4 sm:$0xff]   ;;  %v10260_v7 = vld [vmem:[%s12986_s10 + $0x154] ss:$8 sps:$4 sm:$0xff]  }
 0x5c8   :  { %v9413_v43 = vcombine.low %v7448_v13, %v7489_v4  ;;  %v7398_v9 = vld [vmem:[#allocation4 + $0x19] sm:$0x3]  ;;  %v7578_v30 = vrot.slane %v7564_v32, %v10769_v57  ;;  %v7455_v13 = vrot.slane %v7441_v3, %v10769_v57  ;;  %v10263_v1 = vld [vmem:[%s12986_s10 + $0x164] ss:$8 sps:$4 sm:$0xff]   ;;  %v10267_v33 = vld [vmem:[%s12986_s10 + $0x180] ss:$8 sps:$4 sm:$0xff]  }
 0x5c9   :  { %v7628_v21 = vrot.slane %v9415_v49, %v10769_v57  ;;  %v7540_v44 = vcombine.low %v7394_v17, %v7398_v9  ;;  %v7588_v20 = vrot.slane %v7580_v22, %v10769_v57  ;;  %v7465_v31 = vrot.slane %v7457_v46, %v10769_v57  ;;  %v10249_v49 = vld [vmem:[%s12986_s10 + $0x120] ss:$8 sps:$4 sm:$0xff]   ;;  %v10252_v9 = vld [vmem:[%s12986_s10 + $0x130] ss:$8 sps:$4 sm:$0xff]   ;;  %v10269_v52 = vld [vmem:[%s12986_s10 + $0x184] ss:$8 sps:$4 sm:$0xff]  }
 0x5ca   :  { %v7614_v11 = vrot.slane %v9413_v43, %v10769_v57  ;;  %v9416_v40 = vcombine.low %v7537_v2, %v7578_v30  ;;  %v10254_v43 = vld [vmem:[%s12986_s10 + $0x134] ss:$8 sps:$4 sm:$0xff]   ;;  %v10258_v35 = vld [vmem:[%s12986_s10 + $0x150] ss:$8 sps:$4 sm:$0xff]   ;;  %v10275_v36 = vld [vmem:[%s12986_s10 + $0x1a4] ss:$8 sps:$4 sm:$0xff]  }
 0x5cb   :  { %v7554_v28 = vrot.slane %v7540_v44, %v10769_v57  ;;  %v9419_v62 = vcombine.low %v7547_v41, %v7588_v20  ;;  %v10261_v44 = vld [vmem:[%s12986_s10 + $0x160] ss:$8 sps:$4 sm:$0xff]   ;;  %v10264_v61 = vld [vmem:[%s12986_s10 + $0x170] ss:$8 sps:$4 sm:$0xff]   ;;  %v10272_v30 = vld [vmem:[%s12986_s10 + $0x194] ss:$8 sps:$4 sm:$0xff]  }
 0x5cc   :  { %v7637_v60 = vcombine.high %v7614_v11, %v7628_v21  ;;  %v7636_v10 = vcombine.low %v7614_v11, %v7628_v21  ;;  %v7380_v15 = vld [vmem:[#allocation4 + $0x8] sm:$0x3]  ;;  %v7388_v51 = vld [vmem:[#allocation4 + $0xa] sm:$0x3]  ;;  %v12588_v56 = vrot.slane %v9416_v40, %v10769_v57  ;;  %v10266_v11 = vld [vmem:[%s12986_s10 + $0x174] ss:$8 sps:$4 sm:$0xff]  }
 0x5cd   :  { %v7384_v39 = vld [vmem:[#allocation4 + $0x9] sm:$0x3]  ;;  %v7482_v38 = vcombine.low %v7376_v16, %v7380_v15  ;;  %v9420_v8 = vcombine.low %v7554_v28, %v7595_v42  ;;  %v12594_v45 = vrot.slane %v9419_v62, %v10769_v57  ;;  %v10270_v20 = vld [vmem:[%s12986_s10 + $0x190] ss:$8 sps:$4 sm:$0xff]   ;;  %v10281_v42 = vld [vmem:[%s12986_s10 + $0x1c4] ss:$8 sps:$4 sm:$0xff]  }
 0x5ce   :  { %v7703_v50 = vpack.c.bf16 %v7637_v60, %v7637_v60  ;;  %v7702_v19 = vpack.c.bf16 %v7636_v10, %v7636_v10  ;;  %v7498_v12 = vcombine.low %v7384_v39, %v7388_v51  ;;  %v7392_v29 = vld [vmem:[#allocation4 + $0x8] sm:$0x3]  ;;  %v10278_v10 = vld [vmem:[%s12986_s10 + $0x1b4] ss:$8 sps:$4 sm:$0xff]   ;;  %v10276_v28 = vld [vmem:[%s12986_s10 + $0x1b0] ss:$8 sps:$4 sm:$0xff]  }
 0x5cf   :  { %v7396_v34 = vld [vmem:[#allocation4 + $0x9] sm:$0x3]  ;;  %v7496_v48 = vrot.slane %v7482_v38, %v10769_v57  ;;  %v12597_v25 = vrot.slane %v9420_v8, %v10769_v57  ;;  %v10284_v16 = vld [vmem:[%s12986_s10 + $0x1d4] ss:$8 sps:$4 sm:$0xff]   ;;  %v10282_v3 = vld [vmem:[%s12986_s10 + $0x1d0] ss:$8 sps:$4 sm:$0xff]  }
 0x5d0   :  { %8607 = vmatprep.mubr.bf16.mxu0 %v7703_v50  ;;  %v7458_v6 = vcombine.low %v7392_v29, %v7396_v34  ;;  %v7506_v27 = vrot.slane %v7498_v12, %v10769_v57  ;;  %v10255_v21 = vld [vmem:[%s12986_s10 + $0x140] ss:$8 sps:$4 sm:$0xff]   ;;  %v10287_v2 = vld [vmem:[%s12986_s10 + $0x1e4] ss:$8 sps:$4 sm:$0xff]   ;;  %v10290_v41 = vld [vmem:[%s12986_s10 + $0x1f4] ss:$8 sps:$4 sm:$0xff]  }
 0x5d1   :  { %8608 = vmatmul.mubr.bf16.vlgmr.msra.gmra.mrb[0].mxu0 %v7702_v19  ;;  %v9414_v55 = vcombine.low %v7455_v13, %v7496_v48  ;;  %v10273_v60 = vld [vmem:[%s12986_s10 + $0x1a0] ss:$8 sps:$4 sm:$0xff]   ;;  %v10288_v50 = vld [vmem:[%s12986_s10 + $0x1f0] ss:$8 sps:$4 sm:$0xff]   ;;  %v10293_v15 = vld [vmem:[%s12986_s10 + $0x204] ss:$8 sps:$4 sm:$0xff]  }
 0x5d2   :  { %8617 = vmatpush1.bf16.msra.mxu0 %v10243_v18  ;;  %v7472_v58 = vrot.slane %v7458_v6, %v10769_v57  ;;  %v9417_v63 = vcombine.low %v7465_v31, %v7506_v27  ;;  %v10279_v18 = vld [vmem:[%s12986_s10 + $0x1c0] ss:$8 sps:$4 sm:$0xff]   ;;  %v10296_v40 = vld [vmem:[%s12986_s10 + $0x214] ss:$8 sps:$4 sm:$0xff]   ;;  %v10294_v12 = vld [vmem:[%s12986_s10 + $0x210] ss:$8 sps:$4 sm:$0xff]  }
 0x5d3   :  { %8618 = vmatprep.subr.bf16.mxu0 %v10248_v23  ;;  %v12600_v37 = vrot.slane %v9414_v55, %v10769_v57  ;;  %v10285_v46 = vld [vmem:[%s12986_s10 + $0x1e0] ss:$8 sps:$4 sm:$0xff]   ;;  %v10299_v62 = vld [vmem:[%s12986_s10 + $0x224] ss:$8 sps:$4 sm:$0xff]   ;;  %v10302_v34 = vld [vmem:[%s12986_s10 + $0x234] ss:$8 sps:$4 sm:$0xff]  }
 0x5d4   :  { %v9418_v4 = vcombine.low %v7472_v58, %v7513_v59  ;;  %v12603_v5 = vrot.slane %v9417_v63, %v10769_v57  ;;  %v10291_v51 = vld [vmem:[%s12986_s10 + $0x200] ss:$8 sps:$4 sm:$0xff]   ;;  %v10300_v6 = vld [vmem:[%s12986_s10 + $0x230] ss:$8 sps:$4 sm:$0xff]   ;;  %v10305_v59 = vld [vmem:[%s12986_s10 + $0x244] ss:$8 sps:$4 sm:$0xff]  }
 0x5d5   :  { %v7639_v26 = vcombine.high %v12600_v37, %v12588_v56  ;;  %v7638_v19 = vcombine.low %v12600_v37, %v12588_v56  ;;  %v10297_v29 = vld [vmem:[%s12986_s10 + $0x220] ss:$8 sps:$4 sm:$0xff]   ;;  %v10308_v13 = vld [vmem:[%s12986_s10 + $0x254] ss:$8 sps:$4 sm:$0xff]   ;;  %v10306_v48 = vld [vmem:[%s12986_s10 + $0x250] ss:$8 sps:$4 sm:$0xff]  }
 0x5d6   :  { %8619 = vmatpush1.bf16.msra.mxu0 %v10246_v53  ;;  %v12609_v32 = vrot.slane %v9418_v4, %v10769_v57  ;;  %v12618_v22 = vcombine.low %v12603_v5, %v12594_v45  ;;  %v7673_v39 = vcombine.high %v12603_v5, %v12594_v45  ;;  %v10303_v8 = vld [vmem:[%s12986_s10 + $0x240] ss:$8 sps:$4 sm:$0xff]   ;;  %v10311_v31 = vld [vmem:[%s12986_s10 + $0x264] ss:$8 sps:$4 sm:$0xff]   ;;  %v10314_v53 = vld [vmem:[%s12986_s10 + $0x274] ss:$8 sps:$4 sm:$0xff]  }
 0x5d7   :  { %8620 = vmatprep.subr.bf16.mxu0 %v10251_v54  ;;  %v7705_v14 = vpack.c.bf16 %v7639_v26, %v7639_v26  ;;  %v7704_v38 = vpack.c.bf16 %v7638_v19, %v7638_v19  ;;  %v10309_v27 = vld [vmem:[%s12986_s10 + $0x260] ss:$8 sps:$4 sm:$0xff]   ;;  %v10312_v58 = vld [vmem:[%s12986_s10 + $0x270] ss:$8 sps:$4 sm:$0xff]   ;;  %v10317_v55 = vld [vmem:[%s12986_s10 + $0x284] ss:$8 sps:$4 sm:$0xff]  }
 0x5d8   :  { %v12622_v17 = vcombine.low %v12609_v32, %v12597_v25  ;;  %v7707_v23 = vpack.c.bf16 %v7673_v39, %v7673_v39  ;;  %v10315_v56 = vld [vmem:[%s12986_s10 + $0x280] ss:$8 sps:$4 sm:$0xff]   ;;  %v10320_v54 = vld [vmem:[%s12986_s10 + $0x294] ss:$8 sps:$4 sm:$0xff]   ;;  %v10318_v63 = vld [vmem:[%s12986_s10 + $0x290] ss:$8 sps:$4 sm:$0xff]  }
 0x5d9   :  { %8648 = vmatprep.mubr.bf16.mxu0 %v7705_v14  ;;  %v10323_v45 = vld [vmem:[%s12986_s10 + $0x2a4] ss:$8 sps:$4 sm:$0xff]   ;;  %v10321_v4 = vld [vmem:[%s12986_s10 + $0x2a0] ss:$8 sps:$4 sm:$0xff]   ;;  %v10326_v37 = vld [vmem:[%s12986_s10 + $0x2b4] ss:$8 sps:$4 sm:$0xff]  }
 0x5da   :  { %8621 = vmatpush1.bf16.msra.mxu0 %v10249_v49  ;;  %v10324_v5 = vld [vmem:[%s12986_s10 + $0x2b0] ss:$8 sps:$4 sm:$0xff]   ;;  %v10329_v49 = vld [vmem:[%s12986_s10 + $0x2c4] ss:$8 sps:$4 sm:$0xff]   ;;  %v10327_v26 = vld [vmem:[%s12986_s10 + $0x2c0] ss:$8 sps:$4 sm:$0xff]  }
 0x5db   :  { %8622 = vmatprep.subr.bf16.mxu0 %v10254_v43  ;;  %v10332_v43 = vld [vmem:[%s12986_s10 + $0x2d4] ss:$8 sps:$4 sm:$0xff]   ;;  %v10330_v14 = vld [vmem:[%s12986_s10 + $0x2d0] ss:$8 sps:$4 sm:$0xff]   ;;  %v10369_v19 = vld [vmem:[%s12986_s10 + $0x3a0] ss:$8 sps:$4 sm:$0xff]  }
 0x5dc   :  { %v10372_v39 = vld [vmem:[%s12986_s10 + $0x3b0] ss:$8 sps:$4 sm:$0xff]  }
 0x5de   :  { %8623 = vmatpush1.bf16.msra.mxu0 %v10252_v9  ;;  %v10335_v9 = vld [vmem:[%s12986_s10 + $0x2e4] ss:$8 sps:$4 sm:$0xff]  }
 0x5df   :  { %8624 = vmatprep.subr.bf16.mxu0 %v10257_v24  ;;  %v10333_v24 = vld [vmem:[%s12986_s10 + $0x2e0] ss:$8 sps:$4 sm:$0xff]  }
 0x5e2   :  { %8625 = vmatpush1.bf16.msra.mxu0 %v10255_v21  ;;  %v10338_v21 = vld [vmem:[%s12986_s10 + $0x2f4] ss:$8 sps:$4 sm:$0xff]  }
 0x5e3   :  { %8626 = vmatprep.subr.bf16.mxu0 %v10260_v7  ;;  %v10336_v7 = vld [vmem:[%s12986_s10 + $0x2f0] ss:$8 sps:$4 sm:$0xff]  }
 0x5e6   :  { %8627 = vmatpush1.bf16.msra.mxu0 %v10258_v35  ;;  %v10341_v35 = vld [vmem:[%s12986_s10 + $0x304] ss:$8 sps:$4 sm:$0xff]  }
 0x5e7   :  { %8628 = vmatprep.subr.bf16.mxu0 %v10263_v1  ;;  %v7675_v1 = vcombine.high %v12609_v32, %v12597_v25  ;;  %v10342_v25 = vld [vmem:[%s12986_s10 + $0x310] ss:$8 sps:$4 sm:$0xff]   ;;  %v10347_v32 = vld [vmem:[%s12986_s10 + $0x324] ss:$8 sps:$4 sm:$0xff]  }
 0x5ea   :  { %8629 = vmatpush1.bf16.msra.mxu0 %v10261_v44  ;;  %v10339_v44 = vld [vmem:[%s12986_s10 + $0x300] ss:$8 sps:$4 sm:$0xff]  }
 0x5eb   :  { %8630 = vmatprep.subr.bf16.mxu0 %v10266_v11  ;;  %v7706_v11 = vpack.c.bf16 %v12618_v22, %v12618_v22  ;;  %v10345_v22 = vld [vmem:[%s12986_s10 + $0x320] ss:$8 sps:$4 sm:$0xff]  }
 0x5ee   :  { %8631 = vmatpush1.bf16.msra.mxu0 %v10264_v61  ;;  %v10344_v61 = vld [vmem:[%s12986_s10 + $0x314] ss:$8 sps:$4 sm:$0xff]  }
 0x5ef   :  { %8632 = vmatprep.subr.bf16.mxu0 %v10269_v52  ;;  %v7709_v52 = vpack.c.bf16 %v7675_v1, %v7675_v1 }
 0x5f2   :  { %8633 = vmatpush1.bf16.msra.mxu0 %v10267_v33  ;;  %v10350_v33 = vld [vmem:[%s12986_s10 + $0x334] ss:$8 sps:$4 sm:$0xff]  }
 0x5f3   :  { %8634 = vmatprep.subr.bf16.mxu0 %v10272_v30  ;;  %v10348_v30 = vld [vmem:[%s12986_s10 + $0x330] ss:$8 sps:$4 sm:$0xff]  }
 0x5f6   :  { %8635 = vmatpush1.bf16.msra.mxu0 %v10270_v20  ;;  %v10353_v20 = vld [vmem:[%s12986_s10 + $0x344] ss:$8 sps:$4 sm:$0xff]  }
 0x5f7   :  { %8636 = vmatprep.subr.bf16.mxu0 %v10275_v36  ;;  %v10351_v36 = vld [vmem:[%s12986_s10 + $0x340] ss:$8 sps:$4 sm:$0xff]  }
 0x5fa   :  { %8637 = vmatpush1.bf16.msra.mxu0 %v10273_v60  ;;  %v10356_v60 = vld [vmem:[%s12986_s10 + $0x354] ss:$8 sps:$4 sm:$0xff]  }
 0x5fb   :  { %8638 = vmatprep.subr.bf16.mxu0 %v10278_v10  ;;  %v10354_v10 = vld [vmem:[%s12986_s10 + $0x350] ss:$8 sps:$4 sm:$0xff]  }
 0x5fe   :  { %8639 = vmatpush1.bf16.msra.mxu0 %v10276_v28  ;;  %v10359_v28 = vld [vmem:[%s12986_s10 + $0x364] ss:$8 sps:$4 sm:$0xff]  }
 0x5ff   :  { %8640 = vmatprep.subr.bf16.mxu0 %v10281_v42  ;;  %v10357_v42 = vld [vmem:[%s12986_s10 + $0x360] ss:$8 sps:$4 sm:$0xff]  }
 0x602   :  { %8641 = vmatpush1.bf16.msra.mxu0 %v10279_v18  ;;  %v10362_v18 = vld [vmem:[%s12986_s10 + $0x374] ss:$8 sps:$4 sm:$0xff]  }
 0x603   :  { %8642 = vmatprep.subr.bf16.mxu0 %v10284_v16  ;;  %v10360_v16 = vld [vmem:[%s12986_s10 + $0x370] ss:$8 sps:$4 sm:$0xff]  }
 0x606   :  { %8643 = vmatpush1.bf16.msra.mxu0 %v10282_v3  ;;  %v10365_v3 = vld [vmem:[%s12986_s10 + $0x384] ss:$8 sps:$4 sm:$0xff]  }
 0x607   :  { %8644 = vmatprep.subr.bf16.mxu0 %v10287_v2  ;;  %v10363_v2 = vld [vmem:[%s12986_s10 + $0x380] ss:$8 sps:$4 sm:$0xff]  }
 0x60a   :  { %8645 = vmatpush1.bf16.msra.mxu0 %v10285_v46  ;;  %v10368_v46 = vld [vmem:[%s12986_s10 + $0x394] ss:$8 sps:$4 sm:$0xff]  }
 0x60b   :  { %8646 = vmatprep.subr.bf16.mxu0 %v10290_v41  ;;  %v10366_v41 = vld [vmem:[%s12986_s10 + $0x390] ss:$8 sps:$4 sm:$0xff]  }
 0x60e   :  { %8647 = vmatpush1.bf16.msra.mxu0 %v10288_v50  ;;  %v10371_v50 = vld [vmem:[%s12986_s10 + $0x3a4] ss:$8 sps:$4 sm:$0xff]  }
 0x60f   :  { %8657 = vmatprep.subr.bf16.mxu0 %v10293_v15  ;;  %v10374_v15 = vld [vmem:[%s12986_s10 + $0x3b4] ss:$8 sps:$4 sm:$0xff]  }
 0x611   :  { %8649 = vmatmul.mubr.bf16.vlgmr.msra.gmra.mrb[0].mxu0 %v7704_v38  ;;  %v10375_v38 = vld [vmem:[%s12986_s10 + $0x3c0] ss:$8 sps:$4 sm:$0xff]  }
 0x612   :  { %8658 = vmatpush1.bf16.msra.mxu0 %v10291_v51  ;;  %8689 = vmatprep.mubr.bf16.mxu0 %v7707_v23  ;;  %v10377_v51 = vld [vmem:[%s12986_s10 + $0x3c4] ss:$8 sps:$4 sm:$0xff]   ;;  %v10378_v23 = vld [vmem:[%s12986_s10 + $0x3d0] ss:$8 sps:$4 sm:$0xff]  }
 0x613   :  { %8659 = vmatprep.subr.bf16.mxu0 %v10296_v40  ;;  %v10380_v40 = vld [vmem:[%s12986_s10 + $0x3d4] ss:$8 sps:$4 sm:$0xff]  }
 0x616   :  { %8660 = vmatpush1.bf16.msra.mxu0 %v10294_v12  ;;  %v10383_v12 = vld [vmem:[%s12986_s10 + $0x3e4] ss:$8 sps:$4 sm:$0xff]  }
 0x617   :  { %8661 = vmatprep.subr.bf16.mxu0 %v10299_v62  ;;  %v10381_v62 = vld [vmem:[%s12986_s10 + $0x3e0] ss:$8 sps:$4 sm:$0xff]  }
 0x61a   :  { %8662 = vmatpush1.bf16.msra.mxu0 %v10297_v29  ;;  %v10386_v29 = vld [vmem:[%s12986_s10 + $0x3f4] ss:$8 sps:$4 sm:$0xff]  }
 0x61b   :  { %8663 = vmatprep.subr.bf16.mxu0 %v10302_v34  ;;  %v10384_v34 = vld [vmem:[%s12986_s10 + $0x3f0] ss:$8 sps:$4 sm:$0xff]  }
 0x61e   :  { %8664 = vmatpush1.bf16.msra.mxu0 %v10300_v6  ;;  %v10389_v6 = vld [vmem:[%s12986_s10 + $0x404] ss:$8 sps:$4 sm:$0xff]  }
 0x61f   :  { %8665 = vmatprep.subr.bf16.mxu0 %v10305_v59  ;;  %v10387_v59 = vld [vmem:[%s12986_s10 + $0x400] ss:$8 sps:$4 sm:$0xff]  }
 0x622   :  { %8666 = vmatpush1.bf16.msra.mxu0 %v10303_v8  ;;  %v7708_v8 = vpack.c.bf16 %v12622_v17, %v12622_v17  ;;  %v10393_v17 = vld [vmem:[%s12986_s10 + $0x420] ss:$8 sps:$4 sm:$0xff]  }
 0x623   :  { %8667 = vmatprep.subr.bf16.mxu0 %v10308_v13  ;;  %v10392_v13 = vld [vmem:[%s12986_s10 + $0x414] ss:$8 sps:$4 sm:$0xff]  }
 0x626   :  { %8668 = vmatpush1.bf16.msra.mxu0 %v10306_v48  ;;  %v10390_v48 = vld [vmem:[%s12986_s10 + $0x410] ss:$8 sps:$4 sm:$0xff]  }
 0x627   :  { %8669 = vmatprep.subr.bf16.mxu0 %v10311_v31  ;;  %v10423_v31 = vmov 0  }
 0x62a   :  { %8670 = vmatpush1.bf16.msra.mxu0 %v10309_v27  ;;  %v10395_v27 = vld [vmem:[%s12986_s10 + $0x424] ss:$8 sps:$4 sm:$0xff]  }
 0x62b   :  { %8671 = vmatprep.subr.bf16.mxu0 %v10314_v53  ;;  %v10398_v53 = vld [vmem:[%s12986_s10 + $0x434] ss:$8 sps:$4 sm:$0xff]  }
 0x62e   :  { %8672 = vmatpush1.bf16.msra.mxu0 %v10312_v58  ;;  %v10396_v58 = vld [vmem:[%s12986_s10 + $0x430] ss:$8 sps:$4 sm:$0xff]  }
 0x62f   :  { %8673 = vmatprep.subr.bf16.mxu0 %v10317_v55  ;;  %v10401_v55 = vld [vmem:[%s12986_s10 + $0x444] ss:$8 sps:$4 sm:$0xff]  }
 0x632   :  { %8674 = vmatpush1.bf16.msra.mxu0 %v10315_v56  ;;  %v10399_v56 = vld [vmem:[%s12986_s10 + $0x440] ss:$8 sps:$4 sm:$0xff]  }
 0x633   :  { %8675 = vmatprep.subr.bf16.mxu0 %v10320_v54  ;;  %v9410_v54 = vld.sshfl [vmem:[#allocation4 + $0xe] sm:$0x3 pattern:$0x76325410] }
 0x636   :  { %8676 = vmatpush1.bf16.msra.mxu0 %v10318_v63  ;;  %v9412_v63 = vld.sshfl [vmem:[#allocation4 + $0x1e] sm:$0x3 pattern:$0x76325410] }
 0x637   :  { %8677 = vmatprep.subr.bf16.mxu0 %v10323_v45  ;;  %v10404_v45 = vld [vmem:[%s12986_s10 + $0x454] ss:$8 sps:$4 sm:$0xff]  }
 0x63a   :  { %8678 = vmatpush1.bf16.msra.mxu0 %v10321_v4  ;;  %v9411_v4 = vld.sshfl [vmem:[#allocation4 + $0x1a] sm:$0x3 pattern:$0x76325410] }
 0x63b   :  { %8679 = vmatprep.subr.bf16.mxu0 %v10326_v37  ;;  %v9409_v37 = vld.sshfl [vmem:[#allocation4 + $0xa] sm:$0x3 pattern:$0x76325410] }
 0x63e   :  { %8680 = vmatpush1.bf16.msra.mxu0 %v10324_v5  ;;  %v10402_v5 = vld [vmem:[%s12986_s10 + $0x450] ss:$8 sps:$4 sm:$0xff]  }
 0x63f   :  { %8681 = vmatprep.subr.bf16.mxu0 %v10329_v49  ;;  %v10407_v49 = vld [vmem:[%s12986_s10 + $0x464] ss:$8 sps:$4 sm:$0xff]  }
 0x642   :  { %8682 = vmatpush1.bf16.msra.mxu0 %v10327_v26  ;;  %v7676_v26 = vcombine.low %v9409_v37, %v9410_v54 }
 0x643   :  { %8683 = vmatprep.subr.bf16.mxu0 %v10332_v43  ;;  %v7677_v43 = vcombine.low %v9411_v4, %v9412_v63 }
 0x646   :  { %8684 = vmatpush1.bf16.msra.mxu0 %v10330_v14  ;;  %v10405_v14 = vld [vmem:[%s12986_s10 + $0x460] ss:$8 sps:$4 sm:$0xff]  }
 0x647   :  { %8685 = vmatprep.subr.bf16.mxu0 %v10335_v9  ;;  %v10410_v9 = vld [vmem:[%s12986_s10 + $0x474] ss:$8 sps:$4 sm:$0xff]  }
 0x64a   :  { %8686 = vmatpush1.bf16.msra.mxu0 %v10333_v24  ;;  %v7684_v24 = vrot.slane %v7676_v26, %v10769_v57 }
 0x64b   :  { %8687 = vmatprep.subr.bf16.mxu0 %v10338_v21  ;;  %v7691_v21 = vrot.slane %v7677_v43, %v10769_v57 }
 0x64e   :  { %8688 = vmatpush1.bf16.msra.mxu0 %v10336_v7  ;;  %v10408_v7 = vld [vmem:[%s12986_s10 + $0x470] ss:$8 sps:$4 sm:$0xff]  }
 0x64f   :  { %8698 = vmatprep.subr.bf16.mxu0 %v10341_v35  ;;  %v7692_v35 = vcombine.low %v7684_v24, %v7691_v21 }
 0x651   :  { %8690 = vmatmul.mubr.bf16.vlgmr.msra.gmra.mrb[0].mxu0 %v7706_v11  ;;  %v7710_v1 = vpack.c.bf16 %v7692_v35, %v7692_v35  ;;  %v8780_v11 = vld [vmem:[%s12990_s11] sm:$0x3] }
 0x652   :  { %8699 = vmatpush1.bf16.msra.mxu0 %v10339_v44  ;;  %8730 = vmatprep.mubr.bf16.mxu0 %v7709_v52  ;;  %v20_v44 = vstv %s12989_s14  ;;  %v8794_v52 = vld [vmem:[%s12991_s12] sm:$0x3] }
 0x653   :  { %8700 = vmatprep.subr.bf16.mxu0 %v10344_v61  ;;  %21 = vst [vmem:[#allocation5] sm:$0x1] %v20_v44  ;;  %v8788_v61 = vsub.s32 1, %v10761_v47 }
 0x656   :  { %8701 = vmatpush1.bf16.msra.mxu0 %v10342_v25  ;;  %v8785_v25 = vrot.slane %v8780_v11, %v10774_v0 }
 0x657   :  { %8702 = vmatprep.subr.bf16.mxu0 %v10347_v32  ;;  %v8789_v32 = vrot.slane %v8780_v11, %v8788_v61 }
 0x65a   :  { %8703 = vmatpush1.bf16.msra.mxu0 %v10345_v22  ;;  %v8799_v22 = vrot.slane %v8794_v52, %v10774_v0  ;;  %v9569_v43 = vld [vmem:[#allocation5] ss:$0 sm:$0xff] }
 0x65b   :  { %8704 = vmatprep.subr.bf16.mxu0 %v10350_v33 }
 0x65e   :  { %8705 = vmatpush1.bf16.msra.mxu0 %v10348_v30  ;;  %v8803_v30 = vrot.slane %v8794_v52, %v8788_v61 }
 0x65f   :  { %8706 = vmatprep.subr.bf16.mxu0 %v10353_v20 }
 0x662   :  { %8707 = vmatpush1.bf16.msra.mxu0 %v10351_v36 }
 0x663   :  { %8708 = vmatprep.subr.bf16.mxu0 %v10356_v60 }
 0x666   :  { %8709 = vmatpush1.bf16.msra.mxu0 %v10354_v10  ;;  %v8856_v10 = vld [vmem:[%s12992_s13] sm:$0x3] }
 0x667   :  { %8710 = vmatprep.subr.bf16.mxu0 %v10359_v28 }
 0x66a   :  { %8711 = vmatpush1.bf16.msra.mxu0 %v10357_v42 }
 0x66b   :  { %8712 = vmatprep.subr.bf16.mxu0 %v10362_v18 }
 0x66e   :  { %8713 = vmatpush1.bf16.msra.mxu0 %v10360_v16 }
 0x66f   :  { %8714 = vmatprep.subr.bf16.mxu0 %v10365_v3 }
 0x672   :  { %8715 = vmatpush1.bf16.msra.mxu0 %v10363_v2  ;;  %v8861_v2 = vrot.slane %v8856_v10, %v10774_v0 }
 0x673   :  { %8716 = vmatprep.subr.bf16.mxu0 %v10368_v46  ;;  %v8865_v46 = vrot.slane %v8856_v10, %v8788_v61 }
 0x676   :  { %8717 = vmatpush1.bf16.msra.mxu0 %v10366_v41 }
 0x677   :  { %8718 = vmatprep.subr.bf16.mxu0 %v10371_v50 }
 0x67a   :  { %8719 = vmatpush1.bf16.msra.mxu0 %v10369_v19 }
 0x67b   :  { %8720 = vmatprep.subr.bf16.mxu0 %v10374_v15  ;;  %v8866_v15 = vcombine.low %v8861_v2, %v8865_v46 }
 0x67e   :  { %8721 = vmatpush1.bf16.msra.mxu0 %v10372_v39 }
 0x67f   :  { %8722 = vmatprep.subr.bf16.mxu0 %v10377_v51 }
 0x682   :  { %8723 = vmatpush1.bf16.msra.mxu0 %v10375_v38 }
 0x683   :  { %8724 = vmatprep.subr.bf16.mxu0 %v10380_v40 }
 0x686   :  { %8725 = vmatpush1.bf16.msra.mxu0 %v10378_v23  ;;  %v8873_v23 = vrot.slane %v8866_v15, %v10769_v57 }
 0x687   :  { %8726 = vmatprep.subr.bf16.mxu0 %v10383_v12 }
 0x68a   :  { %8727 = vmatpush1.bf16.msra.mxu0 %v10381_v62 }
 0x68b   :  { %8728 = vmatprep.subr.bf16.mxu0 %v10386_v29 }
 0x68e   :  { %8729 = vmatpush1.bf16.msra.mxu0 %v10384_v34 }
 0x68f   :  { %8739 = vmatprep.subr.bf16.mxu0 %v10389_v6 }
 0x691   :  { %8731 = vmatmul.mubr.bf16.vlgmr.msra.gmra.mrb[0].mxu0 %v7708_v8  ;;  %v8874_v8 = vrot.slane %v8873_v23, 1 }
 0x692   :  { %8740 = vmatpush1.bf16.msra.mxu0 %v10387_v59  ;;  %8771 = vmatprep.mubr.bf16.mxu0 %v10423_v31 }
 0x693   :  { %8741 = vmatprep.subr.bf16.mxu0 %v10392_v13 }
 0x696   :  { %8742 = vmatpush1.bf16.msra.mxu0 %v10390_v48 }
 0x697   :  { %8743 = vmatprep.subr.bf16.mxu0 %v10395_v27 }
 0x69a   :  { %8744 = vmatpush1.bf16.msra.mxu0 %v10393_v17 }
 0x69b   :  { %8745 = vmatprep.subr.bf16.mxu0 %v10398_v53 }
 0x69e   :  { %8746 = vmatpush1.bf16.msra.mxu0 %v10396_v58  ;;  %v8887_v58 = vsub.s32 2, %v10761_v47 }
 0x69f   :  { %8747 = vmatprep.subr.bf16.mxu0 %v10401_v55 }
 0x6a2   :  { %8748 = vmatpush1.bf16.msra.mxu0 %v10399_v56 }
 0x6a3   :  { %8749 = vmatprep.subr.bf16.mxu0 %v10404_v45 }
 0x6a6   :  { %8750 = vmatpush1.bf16.msra.mxu0 %v10402_v5 }
 0x6a7   :  { %8751 = vmatprep.subr.bf16.mxu0 %v10407_v49 }
 0x6aa   :  { %8752 = vmatpush1.bf16.msra.mxu0 %v10405_v14 }
 0x6ab   :  { %8753 = vmatprep.subr.bf16.mxu0 %v10410_v9 }
 0x6ae   :  { %8754 = vmatpush1.bf16.msra.mxu0 %v10408_v7 }
 0x6b1   :  { %8772 = vmatmul.mubr.bf16.vlgmr.msra.gmra.mrb[0].mxu0 %v7710_v1 }
 0x784   :  { %v8773_v33 = vpop.f32.mrb[0].mxu0 }
 0x785   :  { %v8792_v20 = vmul.f32 %v8785_v25, %v8773_v33  ;;  %v8775_v36 = vpop.f32.mrb[1].mxu0 }
 0x786   :  { %v8793_v60 = vmul.f32 %v8789_v32, %v8775_v36  ;;  %v8777_v28 = vpop.f32.mrb[2].mxu0 }
 0x787   :  { %v8806_v42 = vadd.f32 %v8799_v22, %v8792_v20  ;;  %v8778_v18 = vpop.f32.mrb[3].mxu0 }
 0x788   :  { %v8807_v16 = vadd.f32 %v8803_v30, %v8793_v60 }
 0x789   :  { %v8808_v3 = vmul.f32 0.1, %v8806_v42 }
 0x78a   :  { %v8809_v41 = vmul.f32 0.1, %v8807_v16 }
 0x78b   :  { %v8810_v50 = vmax.f32 %v8806_v42, %v8808_v3 }
 0x78c   :  { %v8811_v19 = vmax.f32 %v8807_v16, %v8809_v41 }
 0x78e   :  { %v8814_v39 = vcombine.low %v8810_v50, %v8811_v19  ;;  %v8815_v51 = vcombine.high %v8810_v50, %v8811_v19 }
 0x790   :  { %v8822_v38 = vrot.slane %v8814_v39, %v10769_v57  ;;  %v8829_v40 = vrot.slane %v8815_v51, %v10769_v57 }
 0x792   :  { %v8830_v12 = vcombine.high %v8822_v38, %v8822_v38  ;;  %v8831_v62 = vcombine.high %v8829_v40, %v8829_v40  ;;  %v9565_v29 = vrot.slane %v8822_v38, 9  ;;  %v9567_v34 = vrot.slane %v8829_v40, 9 }
 0x794   :  { %v9566_v6 = vrot.slane %v8830_v12, 9  ;;  %v9568_v59 = vrot.slane %v8831_v62, 9  ;;  %v8848_v13 = vmax.f32 %v8822_v38, %v9565_v29  ;;  %v8850_v48 = vmax.f32 %v8829_v40, %v9567_v34 }
 0x796   :  { %v8849_v31 = vmax.f32 %v8830_v12, %v9566_v6  ;;  %v8851_v27 = vmax.f32 %v8831_v62, %v9568_v59 }
 0x798   :  { %v8852_v17 = vmax.f32 %v8848_v13, %v8849_v31  ;;  %v8853_v53 = vmax.f32 %v8850_v48, %v8851_v27 }
 0x79a   :  { %v8877_v55 = vmul.f32 %v8873_v23, %v8852_v17  ;;  %v8878_v56 = vmul.f32 %v8874_v8, %v8853_v53 }
 0x79c   :  { %v8884_v57 = vrot.slane %v8877_v55, %v10774_v0  ;;  %v8888_v54 = vrot.slane %v8877_v55, %v8887_v58  ;;  %v8892_v63 = vrot.slane %v8878_v56, %v10774_v0  ;;  %v8896_v45 = vrot.slane %v8878_v56, %v8887_v58 }
 0x79e   :  { %v8897_v4 = vsel %vm4207_vm6, %v8892_v63, %v8884_v57  ;;  %v8898_v37 = vsel %vm4207_vm6, %v8896_v45, %v8888_v54 }
 0x79f   :  { %v8902_v5 = vsel %vm8901_vm2, %v8897_v4, 0.0  ;;  %v8903_v49 = vsel %vm8901_vm2, %v8898_v37, 0.0 }
 0x7a0   :  { %v8904_v26 = vadd.f32 %v8903_v49, %v8902_v5 }
 0x7a2   :  { %8905 = vadd.xlane.f32.xlu0 %v8904_v26 }
 0x82f   :  { %v8906_v47 = vpop.xlane.xlu0 %8905 }
 0x830   :  { %v8914_v14 = vadd.f32 %v9569_v43, %v8906_v47 }
 0x832   :  { %8916 = vst.msk [vmem:[%s12993_s15] sm:$0x3] %vm8915_vm3, %v8914_v14 }

</bundles_post_ra>
